<compile_context>
chip_gen: v7x
topology: tpu7x:2x2x1
jax: 0.10.0
libtpu: 0.0.40
codegen_flags: <defaults>
</compile_context>

<pallas_src>
import functools
import math
import numpy as np

import jax
import jax.numpy as jnp
from jax import lax
from jax.experimental import pallas as pl
from jax.experimental.pallas import tpu as pltpu

N_PTS = 1024          # hardcoded in the torch module (ones / prod_ are 1024 long)
IMG = 64
N_PIX = IMG * IMG     # 4096
N_VIEWS = 3


# ----------------------- deterministic parameter setup -----------------------

def gaussian_block(sigma: float, k: int) -> np.ndarray:
    arr = np.zeros((k, k), dtype=np.float32)
    for i in range(k):
        for j in range(k):
            arr[i, j] = math.exp(-((i - k // 2) ** 2 + (j - k // 2) ** 2)
                                 / (2 * sigma * sigma)) / (2 * math.pi * sigma * sigma)
    return arr


def euler_xyz_to_matrix(angles) -> np.ndarray:
    # pytorch3d euler_angles_to_matrix(angles, 'XYZ') == Rx(a) @ Ry(b) @ Rz(c)
    ax, ay, az = [float(a) for a in angles]
    cx, sx = math.cos(ax), math.sin(ax)
    cy, sy = math.cos(ay), math.sin(ay)
    cz, sz = math.cos(az), math.sin(az)
    Rx = np.array([[1, 0, 0], [0, cx, -sx], [0, sx, cx]], dtype=np.float32)
    Ry = np.array([[cy, 0, sy], [0, 1, 0], [-sy, 0, cy]], dtype=np.float32)
    Rz = np.array([[cz, -sz, 0], [sz, cz, 0], [0, 0, 1]], dtype=np.float32)
    return (Rx @ Ry @ Rz).astype(np.float32)


def build_proj_matrices(rotations, fc=120.0, u=32.0, d=2.5) -> np.ndarray:
    K = np.array([[fc, 0, u], [0, fc, u], [0, 0, 1]], dtype=np.float32)
    T = np.array([[0.0], [0.0], [d]], dtype=np.float32)
    Ps = []
    for rot in rotations:
        R = euler_xyz_to_matrix(rot)
        Ps.append((K @ np.concatenate([R, T], axis=1)).astype(np.float32))  # (3, 4)
    return np.stack(Ps, axis=0)  # (3, 3, 4)


def build_blur_matrix(sigma: float = 1.2, k: int = 5) -> np.ndarray:
    """64x64 banded matrix applying the 1-D factor of the separable 5x5 blur,
    with the same boundary clipping the gaussianPlate rows use (zero padding).
    gaussianBlock[i, j] == g[i] * g[j], so
    Bu @ counts @ Bv^T == sum_p gaussianPlate[idx_p] exactly (in real arith)."""
    c = k // 2
    g = np.array([math.exp(-((i - c) ** 2) / (2.0 * sigma * sigma))
                  / math.sqrt(2.0 * math.pi * sigma * sigma)
                  for i in range(k)], dtype=np.float64)
    M = np.zeros((IMG, IMG), dtype=np.float32)
    for dst in range(IMG):
        for src in range(IMG):
            off = dst - src + c
            if 0 <= off < k:
                M[dst, src] = g[off]
    return M


def build_gaussian_plate(sigma: float = 1.2, k: int = 5) -> np.ndarray:
    """gaussianPlate of the torch module, flattened to (4096, 4096).
    Only used by the plain-JAX reference check (not by the kernel)."""
    blur = gaussian_block(sigma, k)
    plate = np.zeros((N_PIX, IMG, IMG), dtype=np.float32)
    idxg, idyg = np.meshgrid(np.arange(IMG), np.arange(IMG), indexing="ij")
    flat = (idxg * IMG + idyg).ravel()
    for i in range(k):
        for j in range(k):
            a = (idxg - k // 2 + i).ravel()
            b = (idyg - k // 2 + j).ravel()
            m = (a >= 0) & (a < IMG) & (b >= 0) & (b < IMG)
            np.add.at(plate, (flat[m], a[m], b[m]), blur[i, j])
    return plate.reshape(N_PIX, N_PIX)


def pairs_per_step(batch_pairs: int) -> int:
    """Pairs handled per grid step.  v7x has 2 TensorCores -> one pair per step
    so the parallel grid balances both cores; single-TC v5e/v6e keep all pairs
    in one step per view (each extra step is pure ~0.35us overhead there)."""
    try:
        kind = jax.devices()[0].device_kind.lower()
    except Exception:
        kind = ""
    if "7" in kind:           # v7x-family device_kind strings contain a '7'
        return 1
    return max(int(batch_pairs), 1)


# ------------------------------- Pallas kernel --------------------------------

def splat_loss_kernel(gt_ref, res_ref, p_ref, bl_ref, bd_ref, out_ref):
    # gt_ref  : (P, 3, 1024)    gt point clouds of this pair-block (points on lanes)
    # res_ref : (P, 3, 1024)    reconstructed point clouds of this pair-block
    # p_ref   : (1, 3, 4)       K @ [R_v | T] for the current view
    # bl_ref  : (64, 64)        row blur matrix Bu
    # bd_ref  : (64P, 64P)      block-diagonal kron(I_P, Bv^T)
    # out_ref : (1, 1, 8, 128)  per-step partial L1 sum (scalar, broadcast-filled)
    npairs = gt_ref.shape[0]
    P = p_ref[0]                                           # (3, 4)

    def pixel_ids(pts):                                    # pts: (P, 3, 1024)
        # proj1[b] = K[R|T] @ [pts_b ; 1]; translation applied as broadcast bias.
        proj = (P[None, :, 0:1] * pts[:, 0:1, :]
                + P[None, :, 1:2] * pts[:, 1:2, :]
                + P[None, :, 2:3] * pts[:, 2:3, :]
                + P[None, :, 3:4])                         # (P, 3, 1024)
        # Exact divide (approx reciprocal could flip round() at .5 boundaries).
        uv = proj[:, 0:2, :] / proj[:, 2:3, :]
        # prod_ = [[64...],[1...],[0...]] -> flat pixel index 64*round(u)+round(v)
        idx = (64.0 * jnp.round(uv[:, 0, :])
               + jnp.round(uv[:, 1, :])).astype(jnp.int32)  # (P, 1024)
        # gaussianPlate row n is the blur centered at (n//64, n%64).  Flat
        # indices outside [0, 4096) yield a row id outside [0, 64) -> the row
        # one-hot never matches and the point is silently dropped.
        # TODO(synk): torch raises on out-of-range gaussianPlate indices; the
        # kernel drops such points instead (only differs for degenerate inputs).
        return idx >> 6, idx & 63                           # row, col

    row_g, col_g = pixel_ids(gt_ref[...])
    row_r, col_r = pixel_ids(res_ref[...])

    bins = lax.broadcasted_iota(jnp.int32, (IMG, N_PTS), 0)  # (64, 1024)

    def counts(row, col, b):
        # Factored one-hots: bins on sublanes, points on lanes.  bf16 operands
        # (exact 0/1) feed the MXU at native rate; f32 accumulation keeps the
        # integer counts exact.
        ohu = (bins == row[b:b + 1]).astype(jnp.bfloat16)    # (64, 1024)
        ohv = (bins == col[b:b + 1]).astype(jnp.bfloat16)    # (64, 1024)
        return lax.dot_general(ohu, ohv, (((1,), (1,)), ((), ())),
                               preferred_element_type=jnp.float32)  # (64, 64)

    # Fused L1: blur only the count difference of each (gt, res) pair.
    diffs = [counts(row_g, col_g, b) - counts(row_r, col_r, b)
             for b in range(npairs)]
    diff = diffs[0] if npairs == 1 else jnp.concatenate(diffs, axis=1)  # (64, 64P)

    # image_diffs = [Bu C_b Bv^T]_b == Bu @ [C_0|...|C_{P-1}] @ kron(I_P, Bv^T)
    blurred = jnp.dot(bl_ref[...], diff, preferred_element_type=jnp.float32)
    imgs = jnp.dot(blurred, bd_ref[...], preferred_element_type=jnp.float32)

    # L1(reduction='sum') over pixels and over this step's pairs.
    l1 = jnp.sum(jnp.sum(jnp.abs(imgs), axis=1, keepdims=True),
                 axis=0, keepdims=True)                      # (1, 1)
    out_ref[0, 0] = jnp.broadcast_to(l1, (8, 128))


def _splat_l1(gt_t, res_t, proj_mats, blur_row, blur_block, npairs):
    B = gt_t.shape[0]
    n_blocks = B // npairs
    nb = IMG * npairs
    # Advisory cost estimate: counts matmuls dominate (2 clouds per pair).
    flops = (N_VIEWS * B * 2 * (2 * IMG * N_PTS * IMG)
             + N_VIEWS * n_blocks * 2 * (IMG * IMG * nb + IMG * nb * nb))
    bytes_accessed = (N_VIEWS * 2 * B * 3 * N_PTS * 4
                      + N_VIEWS * n_blocks * 8 * 128 * 4)
    out = pl.pallas_call(
        splat_loss_kernel,
        out_shape=jax.ShapeDtypeStruct((n_blocks, N_VIEWS, 8, 128), jnp.float32),
        grid_spec=pltpu.PrefetchScalarGridSpec(
            num_scalar_prefetch=0,
            grid=(n_blocks, N_VIEWS),
            in_specs=[
                pl.BlockSpec((npairs, 3, N_PTS), lambda p, v: (p, 0, 0)),
                pl.BlockSpec((npairs, 3, N_PTS), lambda p, v: (p, 0, 0)),
                pl.BlockSpec((1, 3, 4), lambda p, v: (v, 0, 0)),
                pl.BlockSpec((IMG, IMG), lambda p, v: (0, 0)),
                pl.BlockSpec((nb, nb), lambda p, v: (0, 0)),
            ],
            out_specs=pl.BlockSpec((1, 1, 8, 128), lambda p, v: (p, v, 0, 0)),
        ),
        compiler_params=pltpu.CompilerParams(
            # All steps independent -> megacore-shardable on v7x; no-op on v5e/v6e.
            dimension_semantics=("parallel", "parallel"),
        ),
        cost_estimate=pl.CostEstimate(flops=flops, transcendentals=0,
                                      bytes_accessed=bytes_accessed),
    )(gt_t, res_t, proj_mats, blur_row, blur_block)
    return out[:, :, 0, 0]   # (n_blocks, N_VIEWS) partial L1 sums


# --------------------------------- wrapper ------------------------------------

@functools.partial(jax.jit, static_argnames=("npairs",))
def projection_loss(gt_batch, res_batch, proj_mats, blur_row, blur_block, npairs):
    # gt_batch / res_batch: (B, 1024, 3) point clouds (torch NC3-style layout).
    B = gt_batch.shape[0]
    gt_t = jnp.transpose(gt_batch, (0, 2, 1))     # (B, 3, 1024), points on lanes
    res_t = jnp.transpose(res_batch, (0, 2, 1))
    partial = _splat_l1(gt_t, res_t, proj_mats, blur_row, blur_block, npairs)
    # view_reduction='sum' (summed over views), batch_reduction='mean'.
    return jnp.sum(partial) / B


# -------------------------- plain-JAX reference check -------------------------

def reference_loss(gt_batch, res_batch, proj_mats, plate_flat):
    """Faithful gaussianPlate gather formulation (like the torch module)."""
    B = gt_batch.shape[0]
    pc = jnp.concatenate([gt_batch, res_batch], axis=0)
    ones = jnp.ones((pc.shape[0], N_PTS, 1), dtype=pc.dtype)
    h_t = jnp.transpose(jnp.concatenate([pc, ones], axis=2), (0, 2, 1))  # (2B,4,1024)
    total = jnp.float32(0.0)
    for v in range(N_VIEWS):
        Pv = proj_mats[v]
        proj1 = (Pv[None, :, 0:1] * h_t[:, 0:1, :]
                 + Pv[None, :, 1:2] * h_t[:, 1:2, :]
                 + Pv[None, :, 2:3] * h_t[:, 2:3, :]
                 + Pv[None, :, 3:4] * h_t[:, 3:4, :])                   # (2B,3,1024)
        proj2 = proj1 / proj1[:, 2:3, :]
        idx = (64.0 * jnp.round(proj2[:, 0, :])
               + jnp.round(proj2[:, 1, :])).astype(jnp.int32)           # (2B,1024)
        img = jnp.sum(plate_flat[idx], axis=1)                          # (2B,4096)
        total = total + jnp.sum(jnp.abs(img[:B] - img[B:]))
    return total / B


# ----------------------------------- main --------------------------------------

if __name__ == "__main__":
    B = 2
    key = jax.random.PRNGKey(0)
    k1, k2 = jax.random.split(key)
    # Points inside a small cube so every view projects strictly inside the
    # 64x64 plate (torch would raise on out-of-range gaussianPlate indexing).
    gt = jax.random.uniform(k1, (B, N_PTS, 3), jnp.float32, -0.25, 0.25)
    res = jax.random.uniform(k2, (B, N_PTS, 3), jnp.float32, -0.25, 0.25)

    rotations = [[0.0, 0.0, 0.0],
                 [0.0, math.pi / 2, 0.0],
                 [math.pi / 2, 0.0, 0.0]]
    proj_mats = jnp.asarray(build_proj_matrices(rotations, fc=120.0, u=32.0, d=2.5))
    blur_np = build_blur_matrix(sigma=1.2, k=5)
    blur_row = jnp.asarray(blur_np)                               # Bu

    npairs = pairs_per_step(B)                                    # 1 on v7x, B elsewhere
    blur_block = jnp.asarray(
        np.kron(np.eye(npairs, dtype=np.float32), blur_np.T).astype(np.float32))

    loss = jax.block_until_ready(
        projection_loss(gt, res, proj_mats, blur_row, blur_block, npairs=npairs))

    plate_flat = jnp.asarray(build_gaussian_plate(sigma=1.2, k=5))
    ref = jax.block_until_ready(reference_loss(gt, res, proj_mats, plate_flat))

    assert np.isfinite(float(loss))
    # Tolerance absorbs f32 accumulation-order differences (separable-blur
    # matmuls on the count difference vs. plate-row gather-sum per cloud).
    np.testing.assert_allclose(float(loss), float(ref), rtol=1e-2, atol=1e-2)
    print("KERNEL_OK")
</pallas_src>

<mosaic_0001>
module attributes {stable_mosaic.version = 11 : i64} {
  func.func @splat_loss_kernel(%arg0: i32, %arg1: i32, %arg2: memref<2x3x1024xf32, #tpu.memory_space<vmem>>, %arg3: memref<2x3x1024xf32, #tpu.memory_space<vmem>>, %arg4: memref<1x3x4xf32, #tpu.memory_space<vmem>>, %arg5: memref<64x64xf32, #tpu.memory_space<vmem>>, %arg6: memref<128x128xf32, #tpu.memory_space<vmem>>, %arg7: memref<1x1x8x128xf32, #tpu.memory_space<vmem>>) attributes {dimension_semantics = [#tpu.dimension_semantics<parallel>, #tpu.dimension_semantics<parallel>], iteration_bounds = array<i64: 1, 3>, scalar_prefetch = 0 : i64, scratch_operands = 0 : i64, tpu.core_type = #tpu.core_type<tc>, window_params = [{transform_indices = @transform_0, window_bounds = array<i64: 2, 3, 1024>}, {transform_indices = @transform_1, window_bounds = array<i64: 2, 3, 1024>}, {transform_indices = @transform_2, window_bounds = array<i64: 1, 3, 4>}, {pipeline_mode = #tpu.pipeline_mode<synchronous>, transform_indices = @transform_3, window_bounds = array<i64: 64, 64>}, {pipeline_mode = #tpu.pipeline_mode<synchronous>, transform_indices = @transform_4, window_bounds = array<i64: 128, 128>}, {transform_indices = @transform_5, window_bounds = array<i64: 1, 1, 8, 128>}]} {
    %c0 = arith.constant 0 : index
    %c0_0 = arith.constant 0 : index
    %c0_1 = arith.constant 0 : index
    %0 = vector.load %arg4[%c0, %c0_0, %c0_1] : memref<1x3x4xf32, #tpu.memory_space<vmem>>, vector<1x3x4xf32>
    %1 = vector.shape_cast %0 : vector<1x3x4xf32> to vector<3x4xf32>
    %c0_2 = arith.constant 0 : index
    %c0_3 = arith.constant 0 : index
    %c0_4 = arith.constant 0 : index
    %2 = vector.load %arg2[%c0_2, %c0_3, %c0_4] : memref<2x3x1024xf32, #tpu.memory_space<vmem>>, vector<2x3x1024xf32>
    %3 = vector.extract_strided_slice %1 {offsets = [0, 0], sizes = [3, 1], strides = [1, 1]} : vector<3x4xf32> to vector<3x1xf32>
    %4 = vector.shape_cast %3 : vector<3x1xf32> to vector<1x3x1xf32>
    %5 = vector.extract_strided_slice %2 {offsets = [0, 0, 0], sizes = [2, 1, 1024], strides = [1, 1, 1]} : vector<2x3x1024xf32> to vector<2x1x1024xf32>
    %6 = vector.broadcast %4 : vector<1x3x1xf32> to vector<2x3x1024xf32>
    %7 = vector.broadcast %5 : vector<2x1x1024xf32> to vector<2x3x1024xf32>
    %8 = arith.mulf %6, %7 : vector<2x3x1024xf32>
    %9 = vector.extract_strided_slice %1 {offsets = [0, 1], sizes = [3, 1], strides = [1, 1]} : vector<3x4xf32> to vector<3x1xf32>
    %10 = vector.shape_cast %9 : vector<3x1xf32> to vector<1x3x1xf32>
    %11 = vector.extract_strided_slice %2 {offsets = [0, 1, 0], sizes = [2, 1, 1024], strides = [1, 1, 1]} : vector<2x3x1024xf32> to vector<2x1x1024xf32>
    %12 = vector.broadcast %10 : vector<1x3x1xf32> to vector<2x3x1024xf32>
    %13 = vector.broadcast %11 : vector<2x1x1024xf32> to vector<2x3x1024xf32>
    %14 = arith.mulf %12, %13 : vector<2x3x1024xf32>
    %15 = arith.addf %8, %14 : vector<2x3x1024xf32>
    %16 = vector.extract_strided_slice %1 {offsets = [0, 2], sizes = [3, 1], strides = [1, 1]} : vector<3x4xf32> to vector<3x1xf32>
    %17 = vector.shape_cast %16 : vector<3x1xf32> to vector<1x3x1xf32>
    %18 = vector.extract_strided_slice %2 {offsets = [0, 2, 0], sizes = [2, 1, 1024], strides = [1, 1, 1]} : vector<2x3x1024xf32> to vector<2x1x1024xf32>
    %19 = vector.broadcast %17 : vector<1x3x1xf32> to vector<2x3x1024xf32>
    %20 = vector.broadcast %18 : vector<2x1x1024xf32> to vector<2x3x1024xf32>
    %21 = arith.mulf %19, %20 : vector<2x3x1024xf32>
    %22 = arith.addf %15, %21 : vector<2x3x1024xf32>
    %23 = vector.extract_strided_slice %1 {offsets = [0, 3], sizes = [3, 1], strides = [1, 1]} : vector<3x4xf32> to vector<3x1xf32>
    %24 = vector.shape_cast %23 : vector<3x1xf32> to vector<1x3x1xf32>
    %25 = vector.broadcast %24 : vector<1x3x1xf32> to vector<2x3x1024xf32>
    %26 = arith.addf %22, %25 : vector<2x3x1024xf32>
    %27 = vector.extract_strided_slice %26 {offsets = [0, 0, 0], sizes = [2, 2, 1024], strides = [1, 1, 1]} : vector<2x3x1024xf32> to vector<2x2x1024xf32>
    %28 = vector.extract_strided_slice %26 {offsets = [0, 2, 0], sizes = [2, 1, 1024], strides = [1, 1, 1]} : vector<2x3x1024xf32> to vector<2x1x1024xf32>
    %29 = vector.broadcast %28 : vector<2x1x1024xf32> to vector<2x2x1024xf32>
    %30 = arith.divf %27, %29 : vector<2x2x1024xf32>
    %31 = vector.extract_strided_slice %30 {offsets = [0, 0, 0], sizes = [2, 1, 1024], strides = [1, 1, 1]} : vector<2x2x1024xf32> to vector<2x1x1024xf32>
    %32 = vector.shape_cast %31 : vector<2x1x1024xf32> to vector<2x1024xf32>
    %33 = math.roundeven %32 : vector<2x1024xf32>
    %cst = arith.constant 6.400000e+01 : f32
    %34 = vector.broadcast %cst : f32 to vector<2x1024xf32>
    %35 = arith.mulf %34, %33 : vector<2x1024xf32>
    %36 = vector.extract_strided_slice %30 {offsets = [0, 1, 0], sizes = [2, 1, 1024], strides = [1, 1, 1]} : vector<2x2x1024xf32> to vector<2x1x1024xf32>
    %37 = vector.shape_cast %36 : vector<2x1x1024xf32> to vector<2x1024xf32>
    %38 = math.roundeven %37 : vector<2x1024xf32>
    %39 = arith.addf %35, %38 : vector<2x1024xf32>
    %40 = arith.fptosi %39 : vector<2x1024xf32> to vector<2x1024xi32>
    %c6_i32 = arith.constant 6 : i32
    %41 = vector.broadcast %c6_i32 : i32 to vector<2x1024xi32>
    %42 = arith.shrsi %40, %41 : vector<2x1024xi32>
    %c63_i32 = arith.constant 63 : i32
    %43 = vector.broadcast %c63_i32 : i32 to vector<2x1024xi32>
    %44 = arith.andi %40, %43 : vector<2x1024xi32>
    %c0_5 = arith.constant 0 : index
    %c0_6 = arith.constant 0 : index
    %c0_7 = arith.constant 0 : index
    %45 = vector.load %arg3[%c0_5, %c0_6, %c0_7] : memref<2x3x1024xf32, #tpu.memory_space<vmem>>, vector<2x3x1024xf32>
    %46 = vector.extract_strided_slice %1 {offsets = [0, 0], sizes = [3, 1], strides = [1, 1]} : vector<3x4xf32> to vector<3x1xf32>
    %47 = vector.shape_cast %46 : vector<3x1xf32> to vector<1x3x1xf32>
    %48 = vector.extract_strided_slice %45 {offsets = [0, 0, 0], sizes = [2, 1, 1024], strides = [1, 1, 1]} : vector<2x3x1024xf32> to vector<2x1x1024xf32>
    %49 = vector.broadcast %47 : vector<1x3x1xf32> to vector<2x3x1024xf32>
    %50 = vector.broadcast %48 : vector<2x1x1024xf32> to vector<2x3x1024xf32>
    %51 = arith.mulf %49, %50 : vector<2x3x1024xf32>
    %52 = vector.extract_strided_slice %1 {offsets = [0, 1], sizes = [3, 1], strides = [1, 1]} : vector<3x4xf32> to vector<3x1xf32>
    %53 = vector.shape_cast %52 : vector<3x1xf32> to vector<1x3x1xf32>
    %54 = vector.extract_strided_slice %45 {offsets = [0, 1, 0], sizes = [2, 1, 1024], strides = [1, 1, 1]} : vector<2x3x1024xf32> to vector<2x1x1024xf32>
    %55 = vector.broadcast %53 : vector<1x3x1xf32> to vector<2x3x1024xf32>
    %56 = vector.broadcast %54 : vector<2x1x1024xf32> to vector<2x3x1024xf32>
    %57 = arith.mulf %55, %56 : vector<2x3x1024xf32>
    %58 = arith.addf %51, %57 : vector<2x3x1024xf32>
    %59 = vector.extract_strided_slice %1 {offsets = [0, 2], sizes = [3, 1], strides = [1, 1]} : vector<3x4xf32> to vector<3x1xf32>
    %60 = vector.shape_cast %59 : vector<3x1xf32> to vector<1x3x1xf32>
    %61 = vector.extract_strided_slice %45 {offsets = [0, 2, 0], sizes = [2, 1, 1024], strides = [1, 1, 1]} : vector<2x3x1024xf32> to vector<2x1x1024xf32>
    %62 = vector.broadcast %60 : vector<1x3x1xf32> to vector<2x3x1024xf32>
    %63 = vector.broadcast %61 : vector<2x1x1024xf32> to vector<2x3x1024xf32>
    %64 = arith.mulf %62, %63 : vector<2x3x1024xf32>
    %65 = arith.addf %58, %64 : vector<2x3x1024xf32>
    %66 = vector.extract_strided_slice %1 {offsets = [0, 3], sizes = [3, 1], strides = [1, 1]} : vector<3x4xf32> to vector<3x1xf32>
    %67 = vector.shape_cast %66 : vector<3x1xf32> to vector<1x3x1xf32>
    %68 = vector.broadcast %67 : vector<1x3x1xf32> to vector<2x3x1024xf32>
    %69 = arith.addf %65, %68 : vector<2x3x1024xf32>
    %70 = vector.extract_strided_slice %69 {offsets = [0, 0, 0], sizes = [2, 2, 1024], strides = [1, 1, 1]} : vector<2x3x1024xf32> to vector<2x2x1024xf32>
    %71 = vector.extract_strided_slice %69 {offsets = [0, 2, 0], sizes = [2, 1, 1024], strides = [1, 1, 1]} : vector<2x3x1024xf32> to vector<2x1x1024xf32>
    %72 = vector.broadcast %71 : vector<2x1x1024xf32> to vector<2x2x1024xf32>
    %73 = arith.divf %70, %72 : vector<2x2x1024xf32>
    %74 = vector.extract_strided_slice %73 {offsets = [0, 0, 0], sizes = [2, 1, 1024], strides = [1, 1, 1]} : vector<2x2x1024xf32> to vector<2x1x1024xf32>
    %75 = vector.shape_cast %74 : vector<2x1x1024xf32> to vector<2x1024xf32>
    %76 = math.roundeven %75 : vector<2x1024xf32>
    %cst_8 = arith.constant 6.400000e+01 : f32
    %77 = vector.broadcast %cst_8 : f32 to vector<2x1024xf32>
    %78 = arith.mulf %77, %76 : vector<2x1024xf32>
    %79 = vector.extract_strided_slice %73 {offsets = [0, 1, 0], sizes = [2, 1, 1024], strides = [1, 1, 1]} : vector<2x2x1024xf32> to vector<2x1x1024xf32>
    %80 = vector.shape_cast %79 : vector<2x1x1024xf32> to vector<2x1024xf32>
    %81 = math.roundeven %80 : vector<2x1024xf32>
    %82 = arith.addf %78, %81 : vector<2x1024xf32>
    %83 = arith.fptosi %82 : vector<2x1024xf32> to vector<2x1024xi32>
    %c6_i32_9 = arith.constant 6 : i32
    %84 = vector.broadcast %c6_i32_9 : i32 to vector<2x1024xi32>
    %85 = arith.shrsi %83, %84 : vector<2x1024xi32>
    %c63_i32_10 = arith.constant 63 : i32
    %86 = vector.broadcast %c63_i32_10 : i32 to vector<2x1024xi32>
    %87 = arith.andi %83, %86 : vector<2x1024xi32>
    %88 = tpu.iota {dimensions = array<i32: 0>} : vector<64x1024xi32>
    %89 = vector.extract_strided_slice %42 {offsets = [0, 0], sizes = [1, 1024], strides = [1, 1]} : vector<2x1024xi32> to vector<1x1024xi32>
    %90 = vector.broadcast %89 : vector<1x1024xi32> to vector<64x1024xi32>
    %91 = arith.cmpi eq, %88, %90 : vector<64x1024xi32>
    %92 = arith.extui %91 : vector<64x1024xi1> to vector<64x1024xi32>
    %93 = arith.sitofp %92 : vector<64x1024xi32> to vector<64x1024xf32>
    %94 = arith.truncf %93 : vector<64x1024xf32> to vector<64x1024xbf16>
    %95 = vector.extract_strided_slice %44 {offsets = [0, 0], sizes = [1, 1024], strides = [1, 1]} : vector<2x1024xi32> to vector<1x1024xi32>
    %96 = vector.broadcast %95 : vector<1x1024xi32> to vector<64x1024xi32>
    %97 = arith.cmpi eq, %88, %96 : vector<64x1024xi32>
    %98 = arith.extui %97 : vector<64x1024xi1> to vector<64x1024xi32>
    %99 = arith.sitofp %98 : vector<64x1024xi32> to vector<64x1024xf32>
    %100 = arith.truncf %99 : vector<64x1024xf32> to vector<64x1024xbf16>
    %cst_11 = arith.constant dense<0.000000e+00> : vector<64x64xf32>
    %101 = tpu.matmul %94, %100, %cst_11 {dimension_numbers = #tpu.dot_dimension_numbers<[1], [1], [0], [0], [0, 0, 1, 0], [], []>} : vector<64x1024xbf16>, vector<64x1024xbf16>, vector<64x64xf32> -> vector<64x64xf32>
    %102 = vector.extract_strided_slice %85 {offsets = [0, 0], sizes = [1, 1024], strides = [1, 1]} : vector<2x1024xi32> to vector<1x1024xi32>
    %103 = vector.broadcast %102 : vector<1x1024xi32> to vector<64x1024xi32>
    %104 = arith.cmpi eq, %88, %103 : vector<64x1024xi32>
    %105 = arith.extui %104 : vector<64x1024xi1> to vector<64x1024xi32>
    %106 = arith.sitofp %105 : vector<64x1024xi32> to vector<64x1024xf32>
    %107 = arith.truncf %106 : vector<64x1024xf32> to vector<64x1024xbf16>
    %108 = vector.extract_strided_slice %87 {offsets = [0, 0], sizes = [1, 1024], strides = [1, 1]} : vector<2x1024xi32> to vector<1x1024xi32>
    %109 = vector.broadcast %108 : vector<1x1024xi32> to vector<64x1024xi32>
    %110 = arith.cmpi eq, %88, %109 : vector<64x1024xi32>
    %111 = arith.extui %110 : vector<64x1024xi1> to vector<64x1024xi32>
    %112 = arith.sitofp %111 : vector<64x1024xi32> to vector<64x1024xf32>
    %113 = arith.truncf %112 : vector<64x1024xf32> to vector<64x1024xbf16>
    %cst_12 = arith.constant dense<0.000000e+00> : vector<64x64xf32>
    %114 = tpu.matmul %107, %113, %cst_12 {dimension_numbers = #tpu.dot_dimension_numbers<[1], [1], [0], [0], [0, 0, 1, 0], [], []>} : vector<64x1024xbf16>, vector<64x1024xbf16>, vector<64x64xf32> -> vector<64x64xf32>
    %115 = arith.subf %101, %114 : vector<64x64xf32>
    %116 = vector.extract_strided_slice %42 {offsets = [1, 0], sizes = [1, 1024], strides = [1, 1]} : vector<2x1024xi32> to vector<1x1024xi32>
    %117 = vector.broadcast %116 : vector<1x1024xi32> to vector<64x1024xi32>
    %118 = arith.cmpi eq, %88, %117 : vector<64x1024xi32>
    %119 = arith.extui %118 : vector<64x1024xi1> to vector<64x1024xi32>
    %120 = arith.sitofp %119 : vector<64x1024xi32> to vector<64x1024xf32>
    %121 = arith.truncf %120 : vector<64x1024xf32> to vector<64x1024xbf16>
    %122 = vector.extract_strided_slice %44 {offsets = [1, 0], sizes = [1, 1024], strides = [1, 1]} : vector<2x1024xi32> to vector<1x1024xi32>
    %123 = vector.broadcast %122 : vector<1x1024xi32> to vector<64x1024xi32>
    %124 = arith.cmpi eq, %88, %123 : vector<64x1024xi32>
    %125 = arith.extui %124 : vector<64x1024xi1> to vector<64x1024xi32>
    %126 = arith.sitofp %125 : vector<64x1024xi32> to vector<64x1024xf32>
    %127 = arith.truncf %126 : vector<64x1024xf32> to vector<64x1024xbf16>
    %cst_13 = arith.constant dense<0.000000e+00> : vector<64x64xf32>
    %128 = tpu.matmul %121, %127, %cst_13 {dimension_numbers = #tpu.dot_dimension_numbers<[1], [1], [0], [0], [0, 0, 1, 0], [], []>} : vector<64x1024xbf16>, vector<64x1024xbf16>, vector<64x64xf32> -> vector<64x64xf32>
    %129 = vector.extract_strided_slice %85 {offsets = [1, 0], sizes = [1, 1024], strides = [1, 1]} : vector<2x1024xi32> to vector<1x1024xi32>
    %130 = vector.broadcast %129 : vector<1x1024xi32> to vector<64x1024xi32>
    %131 = arith.cmpi eq, %88, %130 : vector<64x1024xi32>
    %132 = arith.extui %131 : vector<64x1024xi1> to vector<64x1024xi32>
    %133 = arith.sitofp %132 : vector<64x1024xi32> to vector<64x1024xf32>
    %134 = arith.truncf %133 : vector<64x1024xf32> to vector<64x1024xbf16>
    %135 = vector.extract_strided_slice %87 {offsets = [1, 0], sizes = [1, 1024], strides = [1, 1]} : vector<2x1024xi32> to vector<1x1024xi32>
    %136 = vector.broadcast %135 : vector<1x1024xi32> to vector<64x1024xi32>
    %137 = arith.cmpi eq, %88, %136 : vector<64x1024xi32>
    %138 = arith.extui %137 : vector<64x1024xi1> to vector<64x1024xi32>
    %139 = arith.sitofp %138 : vector<64x1024xi32> to vector<64x1024xf32>
    %140 = arith.truncf %139 : vector<64x1024xf32> to vector<64x1024xbf16>
    %cst_14 = arith.constant dense<0.000000e+00> : vector<64x64xf32>
    %141 = tpu.matmul %134, %140, %cst_14 {dimension_numbers = #tpu.dot_dimension_numbers<[1], [1], [0], [0], [0, 0, 1, 0], [], []>} : vector<64x1024xbf16>, vector<64x1024xbf16>, vector<64x64xf32> -> vector<64x64xf32>
    %142 = arith.subf %128, %141 : vector<64x64xf32>
    %143 = tpu.concatenate %115, %142 in 1 : vector<64x64xf32>, vector<64x64xf32> -> vector<64x128xf32>
    %c0_15 = arith.constant 0 : index
    %c0_16 = arith.constant 0 : index
    %144 = vector.load %arg5[%c0_15, %c0_16] : memref<64x64xf32, #tpu.memory_space<vmem>>, vector<64x64xf32>
    %cst_17 = arith.constant dense<0.000000e+00> : vector<64x128xf32>
    %145 = tpu.matmul %144, %143, %cst_17 {dimension_numbers = #tpu.dot_dimension_numbers<[1], [0], [0], [1], [0, 0, 1, 1], [], []>} : vector<64x64xf32>, vector<64x128xf32>, vector<64x128xf32> -> vector<64x128xf32>
    %c0_18 = arith.constant 0 : index
    %c0_19 = arith.constant 0 : index
    %146 = vector.load %arg6[%c0_18, %c0_19] : memref<128x128xf32, #tpu.memory_space<vmem>>, vector<128x128xf32>
    %cst_20 = arith.constant dense<0.000000e+00> : vector<64x128xf32>
    %147 = tpu.matmul %145, %146, %cst_20 {dimension_numbers = #tpu.dot_dimension_numbers<[1], [0], [0], [1], [0, 0, 1, 1], [], []>} : vector<64x128xf32>, vector<128x128xf32>, vector<64x128xf32> -> vector<64x128xf32>
    %148 = math.absf %147 : vector<64x128xf32>
    %cst_21 = arith.constant dense<0.000000e+00> : vector<64xf32>
    %149 = vector.multi_reduction <add>, %148, %cst_21 [1] : vector<64x128xf32> to vector<64xf32>
    %150 = vector.shape_cast %149 : vector<64xf32> to vector<64x1xf32>
    %cst_22 = arith.constant dense<0.000000e+00> : vector<1xf32>
    %151 = vector.multi_reduction <add>, %150, %cst_22 [0] : vector<64x1xf32> to vector<1xf32>
    %152 = vector.shape_cast %151 : vector<1xf32> to vector<1x1xf32>
    %153 = vector.shape_cast %152 : vector<1x1xf32> to vector<1x1xf32>
    %154 = vector.broadcast %153 : vector<1x1xf32> to vector<8x128xf32>
    %c0_23 = arith.constant 0 : index
    %c0_24 = arith.constant 0 : index
    %c0_25 = arith.constant 0 : index
    %c0_26 = arith.constant 0 : index
    %155 = vector.load %arg7[%c0_23, %c0_24, %c0_25, %c0_26] : memref<1x1x8x128xf32, #tpu.memory_space<vmem>>, vector<1x1x8x128xf32>
    %156 = vector.shape_cast %155 : vector<1x1x8x128xf32> to vector<8x128xf32>
    %157 = vector.shape_cast %154 : vector<8x128xf32> to vector<1x1x8x128xf32>
    tpu.vector_store %arg7[%c0_23, %c0_24, %c0_25, %c0_26], %157 {strides = array<i32>} : memref<1x1x8x128xf32, #tpu.memory_space<vmem>>, vector<1x1x8x128xf32>,
    return
  }
  func.func @transform_0(%arg0: i32, %arg1: i32) -> (i32, i32, i32) {
    %c0_i32 = arith.constant 0 : i32
    %c0_i32_0 = arith.constant 0 : i32
    %c0_i32_1 = arith.constant 0 : i32
    return %arg0, %c0_i32, %c0_i32_0 : i32, i32, i32
  }
  func.func @transform_1(%arg0: i32, %arg1: i32) -> (i32, i32, i32) {
    %c0_i32 = arith.constant 0 : i32
    %c0_i32_0 = arith.constant 0 : i32
    %c0_i32_1 = arith.constant 0 : i32
    return %arg0, %c0_i32, %c0_i32_0 : i32, i32, i32
  }
  func.func @transform_2(%arg0: i32, %arg1: i32) -> (i32, i32, i32) {
    %c0_i32 = arith.constant 0 : i32
    %c0_i32_0 = arith.constant 0 : i32
    %c0_i32_1 = arith.constant 0 : i32
    return %arg1, %c0_i32, %c0_i32_0 : i32, i32, i32
  }
  func.func @transform_3(%arg0: i32, %arg1: i32) -> (i32, i32) {
    %c0_i32 = arith.constant 0 : i32
    %c0_i32_0 = arith.constant 0 : i32
    %c0_i32_1 = arith.constant 0 : i32
    return %c0_i32, %c0_i32_0 : i32, i32
  }
  func.func @transform_4(%arg0: i32, %arg1: i32) -> (i32, i32) {
    %c0_i32 = arith.constant 0 : i32
    %c0_i32_0 = arith.constant 0 : i32
    %c0_i32_1 = arith.constant 0 : i32
    return %c0_i32, %c0_i32_0 : i32, i32
  }
  func.func @transform_5(%arg0: i32, %arg1: i32) -> (i32, i32, i32, i32) {
    %c0_i32 = arith.constant 0 : i32
    %c0_i32_0 = arith.constant 0 : i32
    %c0_i32_1 = arith.constant 0 : i32
    return %arg0, %arg1, %c0_i32, %c0_i32_0 : i32, i32, i32, i32
  }
}

</mosaic_0001>

<bundles_post_ra>
// kernel: projection_loss.1
= control target key start
LH: loop header
LB: loop body
LE: loop exit
PB: predicated region body
PF: predicated region fallthrough
CT: control target
= control target key end

     0   :  { %s7108_s18 = smov 0   ;;  %s7110_s19 = smov 0   ;;  %s11203_s0 = inlined_call_operand.vmem [shape: f32[2,3,1024], index: 0, kind: input, shape index: {}]   ;;  %s11204_s1 = inlined_call_operand.vmem [shape: f32[2,3,1024], index: 1, kind: input, shape index: {}]   ;;  %s11205_s2 = inlined_call_operand.vmem [shape: f32[3,3,4], index: 2, kind: input, shape index: {}]   ;;  %s11206_s3 = inlined_call_operand.vmem [shape: f32[64,64], index: 3, kind: input, shape index: {}]   ;;  %s11207_s4 = inlined_call_operand.vmem [shape: f32[128,128], index: 4, kind: input, shape index: {}]   ;;  %s11208_s5 = inlined_call_operand.vmem [shape: f32[1,3,8,128], index: 5, kind: output, shape index: {}]  }
   0x1   :  { %s7112_s20 = smov 0  }
   0x2 LB: > { %s24_s21 = sadd.s32 1, %s7066_s19  ;;  %p5443_p0 = scmp.ge.s32.totalorder %s7070_s20, 1  ;;  %s7070_s20 = sphi %s7112_s20, %s15_s20   ;;  %s7066_s19 = sphi %s7110_s19, %s11444_s19   ;;  %s7062_s18 = sphi %s7108_s18, %s11443_s18  }
   0x3   : > { %p25_p1 = scmp.ge.s32.totalorder %s24_s21, 3  ;;  %p224_p2 = scmp.lt.s32.totalorder %s7070_s20, 4 }
   0x5   : > { %s11446_s21 = smov (%p25_p1, %s24_s21), 0  ;;  %p225_p3 = pnand %p5443_p0, %p224_p2 }
   0x7   : > { %228 = sbr.rel (%p225_p3) target bundleno = 1460 (0x5b4), region = 40 }
   0xe   : > { %p280_p4 = scmp.lt.s32.totalorder %s7062_s18, 2  ;;  %v7072_v0 = vmov 0   ;;  %v7073_v1 = vmov 2   ;;  %v7074_v3 = vmov 1   ;;  %v7075_v4 = vmov 3   ;;  %s7077_s14 = smov 64  }
   0xf   : > { %6958 = vset.pattern.permute.xlu0 %v7072_v0  ;;  %6960 = vset.pattern.permute.xlu1 %v7073_v1  ;;  %v315_v5 = vlaneseq  ;;  %v294_v8 = vld [vmem:[%s11203_s0] sm:$0x77]  ;;  %v295_v26 = vld [vmem:[%s11203_s0 + $0x8] sm:$0x77]  ;;  %v7210_v48 = vld [vmem:[%s11203_s0 + $0x10] sm:$0x77] }
  0x10   : > { %s11448_s18 = smov (!%p280_p4, %s7062_s18), 2  ;;  %v1095_v11 = vld [vmem:[%s11204_s1] sm:$0x77]  ;;  %v1096_v27 = vld [vmem:[%s11204_s1 + $0x8] sm:$0x77] }
  0x11   : > { %s5444_s22 = sshll.u32 %s11448_s18, 2  ;;  %v7132_v6 = vshrl.u32 %v315_v5, 7  ;;  %v7219_v53 = vld [vmem:[%s11204_s1 + $0x10] sm:$0x77] }
  0x12   : > { %s283_s25 = scalar_lea.vmem %s11205_s2, %s5444_s22 }
  0x13   : > { %v293_v2 = vld [vmem:[%s283_s25] sm:$0x7]  ;;  %v7135_v7 = vsub.s32 4, %v7132_v6  ;;  %v7141_v9 = vsub.s32 0, %v7132_v6  ;;  %v7144_v10 = vsub.s32 5, %v7132_v6  ;;  %v7150_v12 = vsub.s32 6, %v7132_v6 }
  0x14   : > { %304 = vperm.xlu0 %6958, %v293_v2   ;;  %656 = vperm.xlu1 %6960, %v293_v2   ;;  %v7154_v14 = vsub.s32 1, %v7132_v6  ;;  %v7159_v17 = vsub.s32 2, %v7132_v6  ;;  %s5445_s25 = sshll.u32 %s11448_s18, 3 }
  0x15   : > { %v322_v13 = vrot.slane %v294_v8, %v7135_v7  ;;  %v1118_v15 = vrot.slane %v1095_v11, %v7135_v7  ;;  %v486_v16 = vrot.slane %v294_v8, %v7144_v10  ;;  %v318_v18 = vrot.slane %v294_v8, %v7141_v9  ;;  %s291_s28 = scalar_lea.vmem %s11208_s5, %s5445_s25 }
  0x16   : > { %v666_v19 = vrot.slane %v294_v8, %v7150_v12  ;;  %v1278_v20 = vrot.slane %v1095_v11, %v7144_v10  ;;  %v1114_v21 = vrot.slane %v1095_v11, %v7141_v9  ;;  %v1454_v22 = vrot.slane %v1095_v11, %v7150_v12 }
  0x17   : > { %v7167_v23 = vrot.slane %v322_v13, %v7141_v9  ;;  %v7170_v24 = vrot.slane %v1118_v15, %v7141_v9  ;;  %v482_v25 = vrot.slane %v294_v8, %v7154_v14  ;;  %v7180_v28 = vrot.slane %v486_v16, %v7154_v14 }
  0x18   : > { %6959 = vset.pattern.permute.xlu0 %v7074_v3  ;;  %6961 = vset.pattern.permute.xlu1 %v7075_v4  ;;  %v7183_v29 = vrot.slane %v318_v18, %v7141_v9  ;;  %v662_v30 = vrot.slane %v294_v8, %v7159_v17  ;;  %v1274_v31 = vrot.slane %v1095_v11, %v7154_v14  ;;  %v7252_v8 = vadd.s32 8, %v7132_v6 }
  0x19   : > { %476 = vperm.xlu0 %6959, %v293_v2   ;;  %836 = vperm.xlu1 %6961, %v293_v2   ;;  %v746_v32 = vrot.slane %v666_v19, %v7159_v17  ;;  %v7189_v33 = vrot.slane %v1278_v20, %v7154_v14  ;;  %v7192_v34 = vrot.slane %v1114_v21, %v7141_v9  ;;  %v7264_v18 = vadd.s32 16, %v7132_v6 }
  0x1a   : > { %v1450_v35 = vrot.slane %v1095_v11, %v7159_v17  ;;  %v1534_v36 = vrot.slane %v1454_v22, %v7159_v17  ;;  %v330_v37 = vrot.slane %v295_v26, %v7135_v7  ;;  %v494_v38 = vrot.slane %v295_v26, %v7144_v10 }
  0x1b   : > { %v1126_v39 = vrot.slane %v1096_v27, %v7135_v7  ;;  %v562_v40 = vrot.slane %v482_v25, %v7154_v14  ;;  %v674_v41 = vrot.slane %v295_v26, %v7150_v12  ;;  %v1286_v42 = vrot.slane %v1096_v27, %v7144_v10 }
  0x1c   : > { %v326_v43 = vrot.slane %v295_v26, %v7141_v9  ;;  %v742_v44 = vrot.slane %v662_v30, %v7159_v17  ;;  %v1354_v45 = vrot.slane %v1274_v31, %v7154_v14  ;;  %v1462_v46 = vrot.slane %v1096_v27, %v7150_v12 }
  0x1d   : > { %6982 = vset.pattern.permute.xlu0 %v7075_v4  ;;  %v490_v47 = vrot.slane %v295_v26, %v7154_v14  ;;  %v1530_v49 = vrot.slane %v1450_v35, %v7159_v17  ;;  %v670_v50 = vrot.slane %v295_v26, %v7159_v17  ;;  %v1122_v51 = vrot.slane %v1096_v27, %v7141_v9 }
  0x1e   : > { %v1282_v52 = vrot.slane %v1096_v27, %v7154_v14  ;;  %v410_v54 = vrot.slane %v330_v37, %v7141_v9  ;;  %v574_v55 = vrot.slane %v494_v38, %v7154_v14  ;;  %v1206_v56 = vrot.slane %v1126_v39, %v7141_v9 }
  0x1f   : > { %v1458_v57 = vrot.slane %v1096_v27, %v7159_v17  ;;  %v754_v58 = vrot.slane %v674_v41, %v7159_v17  ;;  %v1366_v59 = vrot.slane %v1286_v42, %v7154_v14  ;;  %v7228_v60 = vrot.slane %v326_v43, %v7141_v9 }
  0x20   : > { %v338_v61 = vrot.slane %v7210_v48, %v7135_v7  ;;  %v1542_v62 = vrot.slane %v1462_v46, %v7159_v17  ;;  %v7234_v63 = vrot.slane %v490_v47, %v7154_v14  ;;  %v502_v0 = vrot.slane %v7210_v48, %v7144_v10 }
  0x21   : > { %v1134_v1 = vrot.slane %v7219_v53, %v7135_v7  ;;  %v7241_v2 = vrot.slane %v670_v50, %v7159_v17  ;;  %v7244_v3 = vrot.slane %v1122_v51, %v7141_v9  ;;  %v7247_v4 = vrot.slane %v1282_v52, %v7154_v14 }
  0x22   : > { %v334_v5 = vrot.slane %v7210_v48, %v7141_v9  ;;  %v7255_v11 = vrot.slane %v1458_v57, %v7159_v17  ;;  %v682_v13 = vrot.slane %v7210_v48, %v7150_v12  ;;  %v1294_v15 = vrot.slane %v7219_v53, %v7144_v10 }
  0x23   : > { %v7267_v19 = vadd.s32 24, %v7132_v6  ;;  %v7270_v20 = vrot.slane %v338_v61, %v7141_v9  ;;  %v7275_v22 = vadd.s32 32, %v7132_v6  ;;  %v7278_v25 = vadd.s32 40, %v7132_v6 }
  0x24   : > { %v7281_v26 = vrot.slane %v502_v0, %v7154_v14  ;;  %v7284_v27 = vrot.slane %v1134_v1, %v7141_v9  ;;  %v7287_v30 = vadd.s32 48, %v7132_v6  ;;  %v1470_v31 = vrot.slane %v7219_v53, %v7150_v12 }
  0x25   : > { %v7292_v35 = vrot.slane %v334_v5, %v7141_v9  ;;  %v1130_v37 = vrot.slane %v7219_v53, %v7141_v9  ;;  %v7299_v39 = vadd.s32 56, %v7132_v6  ;;  %v7302_v41 = vrot.slane %v682_v13, %v7159_v17 }
  0x26   : > { %11211 = vst [vmem:[#allocation2_spill] sm:$0xff] %v7287_v30  ;;  %v7305_v42 = vrot.slane %v1294_v15, %v7154_v14 }
  0x27   : > { %11212 = vst [vmem:[#allocation3_spill] sm:$0xff] %v7299_v39 }
  0x93   : > { %v7261_v16 = vpop.permute.xlu0 %304  ;;  %v7272_v21 = vpop.permute.xlu1 %656 }
  0x94   : > { %v460_v38 = vmul.f32 %v7167_v23, %v7261_v16  ;;  %v804_v43 = vmul.f32 %v746_v32, %v7272_v21  ;;  %v1256_v46 = vmul.f32 %v7170_v24, %v7261_v16  ;;  %v1592_v47 = vmul.f32 %v1534_v36, %v7272_v21 }
  0x95   : > { %v459_v50 = vmul.f32 %v7183_v29, %v7261_v16  ;;  %v803_v51 = vmul.f32 %v742_v44, %v7272_v21  ;;  %v1255_v52 = vmul.f32 %v7192_v34, %v7261_v16  ;;  %v1591_v57 = vmul.f32 %v1530_v49, %v7272_v21 }
  0x96   : > { %v462_v61 = vmul.f32 %v410_v54, %v7261_v16  ;;  %v806_v44 = vmul.f32 %v754_v58, %v7272_v21  ;;  %v1258_v34 = vmul.f32 %v1206_v56, %v7261_v16 }
  0x98   : > { %v7313_v23 = vpop.permute.xlu0 %476 }
  0x99   : > { %v624_v32 = vmul.f32 %v7180_v28, %v7313_v23  ;;  %v1416_v24 = vmul.f32 %v7189_v33, %v7313_v23  ;;  %v623_v36 = vmul.f32 %v562_v40, %v7313_v23  ;;  %v1415_v29 = vmul.f32 %v1354_v45, %v7313_v23  ;;  %v7330_v28 = vpop.permute.xlu1 %836 }
  0x9a   : > { %v626_v0 = vmul.f32 %v574_v55, %v7313_v23  ;;  %v1418_v49 = vmul.f32 %v1366_v59, %v7313_v23  ;;  %v1594_v40 = vmul.f32 %v1542_v62, %v7272_v21  ;;  %v498_v45 = vrot.slane %v7210_v48, %v7154_v14 }
  0x9b   : > { %v640_v1 = vadd.f32 %v624_v32, %v460_v38  ;;  %v1432_v54 = vadd.f32 %v1416_v24, %v1256_v46  ;;  %v639_v5 = vadd.f32 %v623_v36, %v459_v50  ;;  %v1431_v13 = vadd.f32 %v1415_v29, %v1255_v52 }
  0x9c   : > { %v642_v15 = vadd.f32 %v626_v0, %v462_v61  ;;  %v1434_v33 = vadd.f32 %v1418_v49, %v1258_v34  ;;  %v7336_v59 = vrot.slane %v1470_v31, %v7159_v17  ;;  %v678_v38 = vrot.slane %v7210_v48, %v7159_v17 }
  0x9d   : > { %v820_v55 = vadd.f32 %v804_v43, %v640_v1  ;;  %v1608_v39 = vadd.f32 %v1592_v47, %v1432_v54  ;;  %v819_v58 = vadd.f32 %v803_v51, %v639_v5  ;;  %v1607_v30 = vadd.f32 %v1591_v57, %v1431_v13 }
  0x9e   : > { %v822_v56 = vadd.f32 %v806_v44, %v642_v15  ;;  %v1290_v46 = vrot.slane %v7219_v53, %v7154_v14  ;;  %v1610_v31 = vadd.f32 %v1594_v40, %v1434_v33  ;;  %v625_v51 = vmul.f32 %v7234_v63, %v7313_v23  ;;  %v297_v63 = vld [vmem:[%s11203_s0 + $0x18] sm:$0x77] }
  0x9f   : > { %v7343_v50 = vadd.f32 %v7330_v28, %v820_v55  ;;  %v7346_v62 = vadd.f32 %v1608_v39, %v7330_v28  ;;  %v7349_v43 = vadd.f32 %v7330_v28, %v819_v58  ;;  %v7352_v47 = vadd.f32 %v1607_v30, %v7330_v28  ;;  %v1098_v44 = vld [vmem:[%s11204_s1 + $0x18] sm:$0x77] }
  0xa0   : > { %v7357_v48 = vrot.slane %v498_v45, %v7154_v14  ;;  %v7360_v52 = vrot.slane %v1130_v37, %v7141_v9  ;;  %v1417_v61 = vmul.f32 %v7247_v4, %v7313_v23  ;;  %v7376_v32 = vrot.slane %v678_v38, %v7159_v17 }
  0xa1   : > { %v862_v39 = vrot.slane %v7343_v50, %v7159_v17  ;;  %v1646_v57 = vrot.slane %v7346_v62, %v7159_v17  ;;  %v858_v30 = vrot.slane %v7349_v43, %v7159_v17  ;;  %v1642_v37 = vrot.slane %v7352_v47, %v7159_v17 }
  0xa2   : > { %v7379_v24 = vrot.slane %v1290_v46, %v7154_v14  ;;  %v1466_v36 = vrot.slane %v7219_v53, %v7159_v17  ;;  %v7384_v29 = vadd.f32 %v7330_v28, %v822_v56  ;;  %v461_v4 = vmul.f32 %v7228_v60, %v7261_v16 }
  0xa3   : > { %6983 = vrcp.f32 %v862_v39  ;;  %v1257_v0 = vmul.f32 %v7244_v3, %v7261_v16  ;;  %v7394_v34 = vadd.f32 %v1610_v31, %v7330_v28  ;;  %v805_v53 = vmul.f32 %v7241_v2, %v7272_v21 }
  0xa4   : > { %6985 = vrcp.f32 %v1646_v57  ;;  %v346_v49 = vrot.slane %v297_v63, %v7135_v7  ;;  %v641_v1 = vadd.f32 %v625_v51, %v461_v4  ;;  %v1593_v60 = vmul.f32 %v7255_v11, %v7272_v21  ;;  %v7445_v4 = vld [vmem:[%s11204_s1 + $0x20] sm:$0x77] }
  0xa5   : > { %6987 = vrcp.f32 %v858_v30  ;;  %v1433_v54 = vadd.f32 %v1417_v61, %v1257_v0  ;;  %v7402_v3 = vrot.slane %v1466_v36, %v7159_v17  ;;  %v510_v5 = vrot.slane %v297_v63, %v7144_v10  ;;  %v7431_v61 = vld [vmem:[%s11203_s0 + $0x20] sm:$0x77] }
  0xa6   : > { %6989 = vrcp.f32 %v1642_v37  ;;  %v1142_v13 = vrot.slane %v1098_v44, %v7135_v7  ;;  %v870_v15 = vrot.slane %v7384_v29, %v7159_v17  ;;  %v690_v2 = vrot.slane %v297_v63, %v7150_v12 }
  0xa7   : > { %v1302_v33 = vrot.slane %v1098_v44, %v7144_v10  ;;  %v1478_v40 = vrot.slane %v1098_v44, %v7150_v12  ;;  %v1654_v11 = vrot.slane %v7394_v34, %v7159_v17  ;;  %v342_v45 = vrot.slane %v297_v63, %v7141_v9 }
  0xa8   : > { %v506_v55 = vrot.slane %v297_v63, %v7154_v14  ;;  %v686_v58 = vrot.slane %v297_v63, %v7159_v17  ;;  %v821_v56 = vadd.f32 %v805_v53, %v641_v1  ;;  %v1609_v38 = vadd.f32 %v1593_v60, %v1433_v54 }
  0xa9   : > { %v7417_v46 = vrot.slane %v346_v49, %v7141_v9  ;;  %v1138_v31 = vrot.slane %v1098_v44, %v7141_v9  ;;  %v7421_v51 = vrot.slane %v510_v5, %v7154_v14  ;;  %v7424_v39 = vrot.slane %v1142_v13, %v7141_v9 }
  0xaa   : > { %v1298_v57 = vrot.slane %v1098_v44, %v7154_v14  ;;  %v1474_v30 = vrot.slane %v1098_v44, %v7159_v17  ;;  %6991 = vrcp.f32 %v870_v15  ;;  %v7434_v63 = vrot.slane %v690_v2, %v7159_v17 }
  0xab   : > { %v7437_v37 = vrot.slane %v1302_v33, %v7154_v14  ;;  %v7440_v36 = vrot.slane %v1478_v40, %v7159_v17  ;;  %6993 = vrcp.f32 %v1654_v11  ;;  %v7448_v0 = vrot.slane %v342_v45, %v7141_v9 }
  0xac   : > { %v7451_v44 = vrot.slane %v506_v55, %v7154_v14  ;;  %v7454_v53 = vrot.slane %v686_v58, %v7159_v17  ;;  %v7457_v1 = vadd.f32 %v7330_v28, %v821_v56  ;;  %v7460_v54 = vadd.f32 %v1609_v38, %v7330_v28 }
  0xad   : > { %v6984_v49 = vpop.eup %6983  ;;  %v7463_v60 = vrot.slane %v1138_v31, %v7141_v9  ;;  %v7469_v2 = vrot.slane %v1298_v57, %v7154_v14  ;;  %v7472_v33 = vrot.slane %v1474_v30, %v7159_v17  ;;  %v464_v55 = vmul.f32 %v7270_v20, %v7261_v16 }
  0xae   : > { %11213 = vst [vmem:[#allocation4_spill] sm:$0xff] %v7451_v44  ;;  %11214 = vst [vmem:[#allocation5_spill] sm:$0xff] %v7454_v53  ;;  %v6986_v13 = vpop.eup %6985  ;;  %v922_v15 = vmul.f32 %v6984_v49, %v7343_v50  ;;  %v808_v58 = vmul.f32 %v7302_v41, %v7272_v21  ;;  %v1260_v57 = vmul.f32 %v7284_v27, %v7261_v16 }
  0xaf   : > { %11215 = vst [vmem:[#allocation6_spill] sm:$0xff] %v7463_v60  ;;  %11216 = vst [vmem:[#allocation7_spill] sm:$0xff] %v7469_v2  ;;  %v6988_v11 = vpop.eup %6987  ;;  %v1706_v45 = vmul.f32 %v6986_v13, %v7346_v62  ;;  %v7488_v30 = vmul.f32 %v7336_v59, %v7272_v21  ;;  %v866_v41 = vrot.slane %v7457_v1, %v7159_v17 }
  0xb0   : > { %11217 = vst [vmem:[#allocation8_spill] sm:$0xff] %v7472_v33  ;;  %v6990_v56 = vpop.eup %6989  ;;  %v6833_v38 = vround.rtne.f32 %v922_v15  ;;  %v920_v31 = vmul.f32 %v6988_v11, %v7349_v43  ;;  %v1650_v49 = vrot.slane %v7460_v54, %v7159_v17  ;;  %v628_v43 = vmul.f32 %v7281_v26, %v7313_v23 }
  0xb1   : > { %v6881_v62 = vround.rtne.f32 %v1706_v45  ;;  %v1704_v20 = vmul.f32 %v6990_v56, %v7352_v47  ;;  %v1420_v59 = vmul.f32 %v7305_v42, %v7313_v23  ;;  %v7501_v5 = vmul.f32 %v7292_v35, %v7261_v16 }
  0xb2   : > { %v968_v13 = vmul.f32 64.0, %v6833_v38  ;;  %v1000_v15 = vrot.slane %v6833_v38, 1  ;;  %v6832_v50 = vround.rtne.f32 %v920_v31  ;;  %v7505_v26 = vmul.f32 %v7357_v48, %v7313_v23 }
  0xb3   : > { %v1752_v27 = vmul.f32 64.0, %v6881_v62  ;;  %v1784_v11 = vrot.slane %v6881_v62, 1  ;;  %v6880_v40 = vround.rtne.f32 %v1704_v20  ;;  %v7509_v42 = vmul.f32 %v7376_v32, %v7272_v21 }
  0xb4   : > { %v1032_v45 = vadd.f32 %v1000_v15, %v968_v13  ;;  %v967_v47 = vmul.f32 64.0, %v6832_v50  ;;  %v999_v56 = vrot.slane %v6832_v50, 1  ;;  %v6992_v33 = vpop.eup %6991  ;;  %v7513_v50 = vmul.f32 %v7360_v52, %v7261_v16 }
  0xb5   : > { %v1816_v2 = vadd.f32 %v1784_v11, %v1752_v27  ;;  %v1751_v38 = vmul.f32 64.0, %v6880_v40  ;;  %v1783_v31 = vrot.slane %v6880_v40, 1  ;;  %v6994_v62 = vpop.eup %6993  ;;  %v644_v15 = vadd.f32 %v628_v43, %v464_v55 }
  0xb6   : > { %v6850_v20 = vtrunc.f32 %v1032_v45  ;;  %v1031_v60 = vadd.f32 %v999_v56, %v967_v47  ;;  %v1436_v27 = vadd.f32 %v1420_v59, %v1260_v57  ;;  %v926_v48 = vmul.f32 %v6992_v33, %v7384_v29 }
  0xb7   : > { %v6898_v35 = vtrunc.f32 %v1816_v2  ;;  %v1815_v13 = vadd.f32 %v1783_v31, %v1751_v38  ;;  %6995 = vrcp.f32 %v866_v41  ;;  %v1710_v47 = vmul.f32 %v6994_v62, %v7394_v34 }
  0xb8   : > { %v6851_v40 = vcvt.f32.s32 %v6850_v20  ;;  %v6848_v11 = vtrunc.f32 %v1031_v60  ;;  %6997 = vrcp.f32 %v1650_v49  ;;  %v1419_v52 = vmul.f32 %v7379_v24, %v7313_v23 }
  0xb9   : > { %v6899_v53 = vcvt.f32.s32 %v6898_v35  ;;  %v6896_v45 = vtrunc.f32 %v1815_v13  ;;  %v824_v60 = vadd.f32 %v808_v58, %v644_v15  ;;  %v6835_v41 = vround.rtne.f32 %v926_v48 }
  0xba   : > { %v1080_v32 = vand.u32 63, %v6851_v40  ;;  %v1064_v56 = vshra.s32 %v6851_v40, 6  ;;  %v7517_v44 = vcvt.f32.s32 %v6848_v11  ;;  %v7076_v58 = vmov 1.0|1.0  }
  0xbb   : > { %v1864_v2 = vand.u32 63, %v6899_v53  ;;  %v1848_v55 = vshra.s32 %v6899_v53, 6  ;;  %v7521_v57 = vcvt.f32.s32 %v6896_v45  ;;  %v6883_v53 = vround.rtne.f32 %v1710_v47 }
  0xbc   : > { %v7524_v29 = vrot.slane %v1080_v32, %v7141_v9  ;;  %v7527_v33 = vrot.slane %v1064_v56, %v7141_v9  ;;  %v1079_v34 = vand.u32 63, %v7517_v44  ;;  %v970_v31 = vmul.f32 64.0, %v6835_v41 }
  0xbd   : > { %v7531_v49 = vrot.slane %v1864_v2, %v7141_v9  ;;  %v7534_v43 = vrot.slane %v1848_v55, %v7141_v9  ;;  %v1863_v24 = vand.u32 63, %v7521_v57  ;;  %v1002_v62 = vrot.slane %v6835_v41, 1 }
  0xbe   : > { %vm2177_vm0 = vcmp.eq.s32.totalorder %v7132_v6, %v7524_v29  ;;  %vm2185_vm1 = vcmp.eq.s32.totalorder %v7252_v8, %v7524_v29  ;;  %vm1921_vm2 = vcmp.eq.s32.totalorder %v7132_v6, %v7527_v33  ;;  %vm1929_vm3 = vcmp.eq.s32.totalorder %v7252_v8, %v7527_v33 }
  0xbf   : > { %vm5574_vm4 = vmpackc.low %vm2185_vm1, %vm2177_vm0  ;;  %vm2949_vm5 = vcmp.eq.s32.totalorder %v7132_v6, %v7531_v49  ;;  %vm2957_vm6 = vcmp.eq.s32.totalorder %v7252_v8, %v7531_v49  ;;  %vm2693_vm7 = vcmp.eq.s32.totalorder %v7132_v6, %v7534_v43  ;;  %vm2701_vm8 = vcmp.eq.s32.totalorder %v7252_v8, %v7534_v43 }
  0xc0   : > { %5575 = vmatprep.subr.msk.bf16.mxu0 %vm5574_vm4, %v7076_v58  ;;  %vm5590_vm9 = vmpackc.low %vm1929_vm3, %vm1921_vm2  ;;  %v7555_v59 = vrot.slane %v1079_v34, %v7141_v9  ;;  %v7558_v38 = vrot.slane %v1863_v24, %v7141_v9  ;;  %vm2193_vm11 = vcmp.eq.s32.totalorder %v7264_v18, %v7524_v29  ;;  %vm2201_vm12 = vcmp.eq.s32.totalorder %v7267_v19, %v7524_v29 }
  0xc1   : > { %5591 = vmatprep.mubr.msk.bf16.mxu0 %vm5590_vm9, %v7076_v58  ;;  %vm5830_vm10 = vmpackc.low %vm2957_vm6, %vm2949_vm5  ;;  %v1754_v20 = vmul.f32 64.0, %v6883_v53  ;;  %v1786_v35 = vrot.slane %v6883_v53, 1  ;;  %v6996_v13 = vpop.eup %6995  ;;  %vm2965_vm3 = vcmp.eq.s32.totalorder %v7264_v18, %v7531_v49  ;;  %vm2973_vm4 = vcmp.eq.s32.totalorder %v7267_v19, %v7531_v49 }
  0xc2   : > { %5831 = vmatprep.subr.msk.bf16.mxu1 %vm5830_vm10, %v7076_v58  ;;  %vm5846_vm13 = vmpackc.low %vm2701_vm8, %vm2693_vm7  ;;  %vm2176_vm14 = vcmp.eq.s32.totalorder %v7132_v6, %v7555_v59  ;;  %vm2184_vm15 = vcmp.eq.s32.totalorder %v7252_v8, %v7555_v59  ;;  %vm2948_vm0 = vcmp.eq.s32.totalorder %v7132_v6, %v7558_v38  ;;  %vm2956_vm1 = vcmp.eq.s32.totalorder %v7252_v8, %v7558_v38  ;;  %v6998_v15 = vpop.eup %6997 }
  0xc3   : > { %5847 = vmatprep.mubr.msk.bf16.mxu1 %vm5846_vm13, %v7076_v58  ;;  %vm5576_vm2 = vmpackc.low %vm2184_vm15, %vm2176_vm14  ;;  %v1612_v40 = vadd.f32 %v7488_v30, %v1436_v27  ;;  %v643_v11 = vadd.f32 %v7505_v26, %v7501_v5  ;;  %v1034_v48 = vadd.f32 %v1002_v62, %v970_v31  ;;  %v1435_v45 = vadd.f32 %v1419_v52, %v7513_v50 }
  0xc4   : > { %5577 = vmatpush1.bf16.xpose.msk.msra.mxu0 %vm5576_vm2, %v7076_v58  ;;  %vm5832_vm5 = vmpackc.low %vm2956_vm1, %vm2948_vm0  ;;  %v1595_v47 = vmul.f32 %v7402_v3, %v7272_v21  ;;  %v11218_v32 = vrot.slane %v7431_v61, %v7135_v7  ;;  %v924_v5 = vmul.f32 %v6996_v13, %v7457_v1  ;;  %v7607_v30 = vadd.f32 %v7330_v28, %v824_v60 }
  0xc5   : > { %5833 = vmatpush1.bf16.xpose.msk.msra.mxu1 %vm5832_vm5, %v7076_v58  ;;  %vm5578_vm6 = vmpackc.low %vm2201_vm12, %vm2193_vm11  ;;  %v11219_v3 = vrot.slane %v7445_v4, %v7135_v7  ;;  %v350_v50 = vrot.slane %v7431_v61, %v7141_v9  ;;  %v1818_v1 = vadd.f32 %v1786_v35, %v1754_v20  ;;  %v1708_v27 = vmul.f32 %v6998_v15, %v7460_v54 }
  0xc6   : > { %v7596_v56 = vrot.slane %v11218_v32, %v7141_v9  ;;  %5579 = vmatprep.subr.msk.bf16.mxu0 %vm5578_vm6, %v7076_v58  ;;  %vm5834_vm7 = vmpackc.low %vm2973_vm4, %vm2965_vm3  ;;  %v11220_v52 = vrot.slane %v7431_v61, %v7144_v10  ;;  %v698_v55 = vrot.slane %v7431_v61, %v7150_v12  ;;  %vm2192_vm8 = vcmp.eq.s32.totalorder %v7264_v18, %v7555_v59 }
  0xc7   : > { %v7613_v26 = vrot.slane %v11219_v3, %v7141_v9  ;;  %5835 = vmatprep.subr.msk.bf16.mxu1 %vm5834_vm7, %v7076_v58  ;;  %vm2200_vm9 = vcmp.eq.s32.totalorder %v7267_v19, %v7555_v59  ;;  %v7639_v60 = vadd.f32 %v1612_v40, %v7330_v28  ;;  %v823_v54 = vadd.f32 %v7509_v42, %v643_v11 }
  0xc8   : > { %v7629_v2 = vrot.slane %v11220_v52, %v7154_v14  ;;  %vm2964_vm10 = vcmp.eq.s32.totalorder %v7264_v18, %v7558_v38  ;;  %vm2972_vm11 = vcmp.eq.s32.totalorder %v7267_v19, %v7558_v38  ;;  %v6854_v34 = vtrunc.f32 %v1034_v48  ;;  %vm5580_vm14 = vmpackc.low %vm2200_vm9, %vm2192_vm8  ;;  %v11222_v52 = vld [vmem:[#allocation3_spill] sm:$0xff] }
  0xc9   : > { %v1611_v41 = vadd.f32 %v1595_v47, %v1435_v45  ;;  %vm2209_vm12 = vcmp.eq.s32.totalorder %v7275_v22, %v7524_v29  ;;  %vm2217_vm13 = vcmp.eq.s32.totalorder %v7278_v25, %v7524_v29  ;;  %v6834_v24 = vround.rtne.f32 %v924_v5  ;;  %vm5836_vm1 = vmpackc.low %vm2972_vm11, %vm2964_vm10 }
  0xca   : > { %v878_v53 = vrot.slane %v7607_v30, %v7159_v17  ;;  %vm2981_vm15 = vcmp.eq.s32.totalorder %v7275_v22, %v7531_v49  ;;  %vm2989_vm0 = vcmp.eq.s32.totalorder %v7278_v25, %v7531_v49  ;;  %v6902_v42 = vtrunc.f32 %v1818_v1  ;;  %vm5582_vm2 = vmpackc.low %vm2217_vm13, %vm2209_vm12 }
  0xcb   : > { %v6882_v31 = vround.rtne.f32 %v1708_v27  ;;  %v1310_v62 = vrot.slane %v7445_v4, %v7144_v10  ;;  %v1486_v20 = vrot.slane %v7445_v4, %v7150_v12  ;;  %v7661_v35 = vrot.slane %v350_v50, %v7141_v9  ;;  %vm5838_vm3 = vmpackc.low %vm2989_vm0, %vm2981_vm15 }
  0xcc   : > { %v1146_v13 = vrot.slane %v7445_v4, %v7141_v9  ;;  %5581 = vmatpush1.bf16.xpose.msk.msra.mxu0 %vm5580_vm14, %v7076_v58  ;;  %v7669_v15 = vcvt.f32.s32 %v6854_v34  ;;  %v1662_v40 = vrot.slane %v7639_v60, %v7159_v17  ;;  %v7674_v11 = vadd.f32 %v7330_v28, %v823_v54 }
  0xcd   : > { %v466_v48 = vmul.f32 %v7417_v46, %v7261_v16  ;;  %5837 = vmatpush1.bf16.xpose.msk.msra.mxu1 %vm5836_vm1, %v7076_v58  ;;  %5583 = vmatprep.subr.msk.bf16.mxu0 %vm5582_vm2, %v7076_v58  ;;  %v969_v4 = vmul.f32 64.0, %v6834_v24  ;;  %v1001_v45 = vrot.slane %v6834_v24, 1  ;;  %v1753_v47 = vmul.f32 64.0, %v6882_v31 }
  0xce   : > { %v1785_v32 = vrot.slane %v6882_v31, 1  ;;  %5839 = vmatprep.subr.msk.bf16.mxu1 %vm5838_vm3, %v7076_v58  ;;  %v7687_v5 = vcvt.f32.s32 %v6902_v42  ;;  %6999 = vrcp.f32 %v878_v53  ;;  %v7690_v46 = vadd.f32 %v1611_v41, %v7330_v28 }
  0xcf   : > { %v630_v3 = vmul.f32 %v7421_v51, %v7313_v23  ;;  %vm2208_vm4 = vcmp.eq.s32.totalorder %v7275_v22, %v7555_v59  ;;  %vm2216_vm5 = vcmp.eq.s32.totalorder %v7278_v25, %v7555_v59  ;;  %v1033_v50 = vadd.f32 %v1001_v45, %v969_v4  ;;  %v11221_v51 = vld [vmem:[#allocation2_spill] sm:$0xff] }
  0xd0   : > { %v1817_v1 = vadd.f32 %v1785_v32, %v1753_v47  ;;  %vm2980_vm6 = vcmp.eq.s32.totalorder %v7275_v22, %v7558_v38  ;;  %vm2988_vm7 = vcmp.eq.s32.totalorder %v7278_v25, %v7558_v38  ;;  %7001 = vrcp.f32 %v1662_v40  ;;  %vm5584_vm10 = vmpackc.low %vm2216_vm5, %vm2208_vm4 }
  0xd1   : > { %v874_v27 = vrot.slane %v7674_v11, %v7159_v17  ;;  %vm2225_vm8 = vcmp.eq.s32.totalorder %v11221_v51, %v7524_v29  ;;  %vm2233_vm9 = vcmp.eq.s32.totalorder %v11222_v52, %v7524_v29  ;;  %v1082_v54 = vand.u32 63, %v7669_v15  ;;  %vm5840_vm13 = vmpackc.low %vm2988_vm7, %vm2980_vm6 }
  0xd2   : > { %v6852_v34 = vtrunc.f32 %v1033_v50  ;;  %vm2997_vm11 = vcmp.eq.s32.totalorder %v11221_v51, %v7531_v49  ;;  %vm3005_vm12 = vcmp.eq.s32.totalorder %v11222_v52, %v7531_v49  ;;  %v1866_v41 = vand.u32 63, %v7687_v5  ;;  %vm5586_vm14 = vmpackc.low %vm2233_vm9, %vm2225_vm8 }
  0xd3   : > { %v6900_v24 = vtrunc.f32 %v1817_v1  ;;  %v1658_v53 = vrot.slane %v7690_v46, %v7159_v17  ;;  %v646_v42 = vadd.f32 %v630_v3, %v466_v48  ;;  %v810_v31 = vmul.f32 %v7434_v63, %v7272_v21  ;;  %vm5842_vm15 = vmpackc.low %vm3005_vm12, %vm2997_vm11 }
  0xd4   : > { %v7722_v40 = vrot.slane %v698_v55, %v7159_v17  ;;  %5585 = vmatpush1.bf16.xpose.msk.msra.mxu0 %vm5584_vm10, %v7076_v58  ;;  %v1063_v4 = vshra.s32 %v7517_v44, 6  ;;  %v1847_v45 = vshra.s32 %v7521_v57, 6  ;;  %v7731_v48 = vrot.slane %v1310_v62, %v7154_v14 }
  0xd5   : > { %v7734_v63 = vrot.slane %v1486_v20, %v7159_v17  ;;  %5841 = vmatpush1.bf16.xpose.msk.msra.mxu1 %vm5840_vm13, %v7076_v58  ;;  %5587 = vmatprep.subr.msk.bf16.mxu0 %vm5586_vm14, %v7076_v58  ;;  %v7745_v44 = vrot.slane %v1082_v54, %v7141_v9  ;;  %v7747_v57 = vcvt.f32.s32 %v6852_v34  ;;  %v514_v29 = vrot.slane %v7431_v61, %v7154_v14  ;;  %v11223_v34 = vld [vmem:[#allocation4_spill] sm:$0xff] }
  0xd6   : > { %v7752_v55 = vrot.slane %v1146_v13, %v7141_v9  ;;  %5843 = vmatprep.subr.msk.bf16.mxu1 %vm5842_vm15, %v7076_v58  ;;  %v7756_v62 = vrot.slane %v1866_v41, %v7141_v9  ;;  %v7758_v20 = vcvt.f32.s32 %v6900_v24  ;;  %7003 = vrcp.f32 %v874_v27 }
  0xd7   : > { %v1422_v49 = vmul.f32 %v7437_v37, %v7313_v23  ;;  %vm2224_vm0 = vcmp.eq.s32.totalorder %v11221_v51, %v7555_v59  ;;  %vm2232_vm1 = vcmp.eq.s32.totalorder %v11222_v52, %v7555_v59  ;;  %7005 = vrcp.f32 %v1658_v53 }
  0xd8   : > { %v826_v13 = vadd.f32 %v810_v31, %v646_v42  ;;  %v7000_v47 = vpop.eup %6999  ;;  %vm2996_vm2 = vcmp.eq.s32.totalorder %v11221_v51, %v7558_v38  ;;  %vm3004_vm3 = vcmp.eq.s32.totalorder %v11222_v52, %v7558_v38  ;;  %v7771_v32 = vrot.slane %v1063_v4, %v7141_v9  ;;  %vm5588_vm6 = vmpackc.low %vm2232_vm1, %vm2224_vm0  ;;  %v11226_v4 = vld [vmem:[#allocation5_spill] sm:$0xff] }
  0xd9   : > { %v7774_v37 = vrot.slane %v1847_v45, %v7141_v9  ;;  %vm2179_vm4 = vcmp.eq.s32.totalorder %v7132_v6, %v7745_v44  ;;  %vm2187_vm5 = vcmp.eq.s32.totalorder %v7252_v8, %v7745_v44  ;;  %v1081_v59 = vand.u32 63, %v7747_v57  ;;  %vm5844_vm9 = vmpackc.low %vm3004_vm3, %vm2996_vm2 }
  0xda   : > { %v1262_v3 = vmul.f32 %v7424_v39, %v7261_v16  ;;  %v7002_v50 = vpop.eup %7001  ;;  %vm2951_vm7 = vcmp.eq.s32.totalorder %v7132_v6, %v7756_v62  ;;  %vm2959_vm8 = vcmp.eq.s32.totalorder %v7252_v8, %v7756_v62  ;;  %v1865_v38 = vand.u32 63, %v7758_v20  ;;  %vm5606_vm10 = vmpackc.low %vm2187_vm5, %vm2179_vm4 }
  0xdb   : > { %v694_v1 = vrot.slane %v7431_v61, %v7159_v17  ;;  %v1598_v54 = vmul.f32 %v7440_v36, %v7272_v21  ;;  %v465_v39 = vmul.f32 %v7448_v0, %v7261_v16  ;;  %v629_v41 = vmul.f32 %v11223_v34, %v7313_v23  ;;  %vm5862_vm14 = vmpackc.low %vm2959_vm8, %vm2951_vm7 }
  0xdc   : > { %v1438_v27 = vadd.f32 %v1422_v49, %v1262_v3  ;;  %5589 = vmatpush1.bf16.xpose.msk.msra.mxu0 %vm5588_vm6, %v7076_v58  ;;  %vm1920_vm11 = vcmp.eq.s32.totalorder %v7132_v6, %v7771_v32  ;;  %vm1928_vm12 = vcmp.eq.s32.totalorder %v7252_v8, %v7771_v32  ;;  %vm2692_vm13 = vcmp.eq.s32.totalorder %v7132_v6, %v7774_v37 }
  0xdd   : > { %v7810_v36 = vadd.f32 %v7330_v28, %v826_v13  ;;  %5845 = vmatpush1.bf16.xpose.msk.msra.mxu1 %vm5844_vm9, %v7076_v58  ;;  %5607 = vmatprep.subr.msk.bf16.mxu0 %vm5606_vm10, %v7076_v58  ;;  %vm2700_vm15 = vcmp.eq.s32.totalorder %v7252_v8, %v7774_v37  ;;  %v7823_v0 = vrot.slane %v1081_v59, %v7141_v9  ;;  %vm7838_vm2 = vmpackc.low %vm1928_vm12, %vm1920_vm11 }
  0xde   : > { %v930_v24 = vmul.f32 %v7000_v47, %v7607_v30  ;;  %5863 = vmatprep.subr.msk.bf16.mxu1 %vm5862_vm14, %v7076_v58  ;;  %vm1937_vm0 = vcmp.eq.s32.totalorder %v7264_v18, %v7527_v33  ;;  %vm1945_vm1 = vcmp.eq.s32.totalorder %v7267_v19, %v7527_v33  ;;  %v7832_v53 = vrot.slane %v1865_v38, %v7141_v9  ;;  %vm7851_vm5 = vmpackc.low %vm2700_vm15, %vm2692_vm13 }
  0xdf   : > { %v1714_v42 = vmul.f32 %v7002_v50, %v7639_v60  ;;  %vm2709_vm3 = vcmp.eq.s32.totalorder %v7264_v18, %v7534_v43  ;;  %vm2717_vm4 = vcmp.eq.s32.totalorder %v7267_v19, %v7534_v43  ;;  %v809_v45 = vmul.f32 %v11226_v4, %v7272_v21  ;;  %vm7865_vm8 = vmpackc.low %vm1945_vm1, %vm1937_vm0  ;;  %v11260_v4 = vld [vmem:[#allocation7_spill] sm:$0xff] }
  0xe0   : > { %v6837_v30 = vround.rtne.f32 %v930_v24  ;;  %v7004_v49 = vpop.eup %7003  ;;  %vm2195_vm6 = vcmp.eq.s32.totalorder %v7264_v18, %v7745_v44  ;;  %vm2203_vm7 = vcmp.eq.s32.totalorder %v7267_v19, %v7745_v44  ;;  %v1614_v47 = vadd.f32 %v1598_v54, %v1438_v27  ;;  %vm7881_vm12 = vmpackc.low %vm2717_vm4, %vm2709_vm3 }
  0xe1   : > { %v6885_v13 = vround.rtne.f32 %v1714_v42  ;;  %v7006_v59 = vpop.eup %7005  ;;  %vm2178_vm9 = vcmp.eq.s32.totalorder %v7132_v6, %v7823_v0  ;;  %vm2186_vm10 = vcmp.eq.s32.totalorder %v7252_v8, %v7823_v0  ;;  %vm2967_vm11 = vcmp.eq.s32.totalorder %v7264_v18, %v7756_v62  ;;  %vm7898_vm15 = vmpackc.low %vm2203_vm7, %vm2195_vm6 }
  0xe2   : > { %v645_v50 = vadd.f32 %v629_v41, %v465_v39  ;;  %vm2950_vm13 = vcmp.eq.s32.totalorder %v7132_v6, %v7832_v53  ;;  %vm2958_vm14 = vcmp.eq.s32.totalorder %v7252_v8, %v7832_v53  ;;  %v972_v27 = vmul.f32 64.0, %v6837_v30  ;;  %vm5608_vm1 = vmpackc.low %vm2186_vm10, %vm2178_vm9 }
  0xe3   : > { %v1004_v54 = vrot.slane %v6837_v30, 1  ;;  %5593 = vmatmul.mubr.msk.bf16.vlgmr.msra.gmra.mrb[0].mxu0 %vm7838_vm2, %v7076_v58  ;;  %vm2975_vm0 = vcmp.eq.s32.totalorder %v7267_v19, %v7756_v62  ;;  %v1756_v34 = vmul.f32 64.0, %v6885_v13  ;;  %v1788_v41 = vrot.slane %v6885_v13, 1  ;;  %vm5864_vm4 = vmpackc.low %vm2958_vm14, %vm2950_vm13 }
  0xe4   : > { %v928_v24 = vmul.f32 %v7004_v49, %v7674_v11  ;;  %5849 = vmatmul.mubr.msk.bf16.vlgmr.msra.gmra.mrb[0].mxu1 %vm7851_vm5, %v7076_v58  ;;  %5595 = vmatprep.mubr.msk.bf16.mxu0 %vm7865_vm8, %v7076_v58  ;;  %vm1936_vm2 = vcmp.eq.s32.totalorder %v7264_v18, %v7771_v32  ;;  %vm1944_vm3 = vcmp.eq.s32.totalorder %v7267_v19, %v7771_v32  ;;  %vm5866_vm7 = vmpackc.low %vm2975_vm0, %vm2967_vm11 }
  0xe5   : > { %v1712_v11 = vmul.f32 %v7006_v59, %v7690_v46  ;;  %5609 = vmatpush1.bf16.xpose.msk.msra.mxu0 %vm5608_vm1, %v7076_v58  ;;  %5851 = vmatprep.mubr.msk.bf16.mxu1 %vm7881_vm12, %v7076_v58  ;;  %vm2708_vm5 = vcmp.eq.s32.totalorder %v7264_v18, %v7774_v37  ;;  %vm2716_vm6 = vcmp.eq.s32.totalorder %v7267_v19, %v7774_v37  ;;  %vm7959_vm10 = vmpackc.low %vm1944_vm3, %vm1936_vm2 }
  0xe6   : > { %v6836_v46 = vround.rtne.f32 %v928_v24  ;;  %v886_v42 = vrot.slane %v7810_v36, %v7159_v17  ;;  %5865 = vmatpush1.bf16.xpose.msk.msra.mxu1 %vm5864_vm4, %v7076_v58  ;;  %5611 = vmatprep.subr.msk.bf16.mxu0 %vm7898_vm15, %v7076_v58  ;;  %vm1953_vm8 = vcmp.eq.s32.totalorder %v7275_v22, %v7527_v33  ;;  %vm1961_vm9 = vcmp.eq.s32.totalorder %v7278_v25, %v7527_v33  ;;  %vm7976_vm13 = vmpackc.low %vm2716_vm6, %vm2708_vm5 }
  0xe7   : > { %v1036_v31 = vadd.f32 %v1004_v54, %v972_v27  ;;  %v6884_v30 = vround.rtne.f32 %v1712_v11  ;;  %5867 = vmatprep.subr.msk.bf16.mxu1 %vm5866_vm7, %v7076_v58  ;;  %vm2194_vm11 = vcmp.eq.s32.totalorder %v7264_v18, %v7823_v0  ;;  %vm2202_vm12 = vcmp.eq.s32.totalorder %v7267_v19, %v7823_v0  ;;  %vm7987_vm0 = vmpackc.low %vm1961_vm9, %vm1953_vm8 }
  0xe8   : > { %v1820_v49 = vadd.f32 %v1788_v41, %v1756_v34  ;;  %v7968_v60 = vadd.f32 %v1614_v47, %v7330_v28  ;;  %vm2725_vm14 = vcmp.eq.s32.totalorder %v7275_v22, %v7534_v43  ;;  %vm2733_vm15 = vcmp.eq.s32.totalorder %v7278_v25, %v7534_v43  ;;  %vm7999_vm4 = vmpackc.low %vm2202_vm12, %vm2194_vm11 }
  0xe9   : > { %v971_v59 = vmul.f32 64.0, %v6836_v46  ;;  %v1003_v3 = vrot.slane %v6836_v46, 1  ;;  %vm2966_vm1 = vcmp.eq.s32.totalorder %v7264_v18, %v7832_v53  ;;  %vm2974_vm2 = vcmp.eq.s32.totalorder %v7267_v19, %v7832_v53  ;;  %vm5854_vm6 = vmpackc.low %vm2733_vm15, %vm2725_vm14 }
  0xea   : > { %vm2211_vm3 = vcmp.eq.s32.totalorder %v7275_v22, %v7745_v44  ;;  %v7997_v38 = vadd.f32 %v809_v45, %v645_v50  ;;  %vm2219_vm5 = vcmp.eq.s32.totalorder %v7278_v25, %v7745_v44  ;;  %v6858_v54 = vtrunc.f32 %v1036_v31 }
  0xeb   : > { %v1755_v39 = vmul.f32 64.0, %v6884_v30  ;;  %v1787_v34 = vrot.slane %v6884_v30, 1  ;;  %5597 = vmatmul.mubr.msk.bf16.gmra.mrb[4].mxu0 %vm7959_vm10, %v7076_v58  ;;  %vm2983_vm7 = vcmp.eq.s32.totalorder %v7275_v22, %v7756_v62  ;;  %vm2991_vm8 = vcmp.eq.s32.totalorder %v7278_v25, %v7756_v62  ;;  %vm5868_vm10 = vmpackc.low %vm2974_vm2, %vm2966_vm1 }
  0xec   : > { %vm1952_vm9 = vcmp.eq.s32.totalorder %v7275_v22, %v7771_v32  ;;  %v6906_v45 = vtrunc.f32 %v1820_v49  ;;  %5853 = vmatmul.mubr.msk.bf16.gmra.mrb[4].mxu1 %vm7976_vm13, %v7076_v58  ;;  %5599 = vmatprep.mubr.msk.bf16.mxu0 %vm7987_vm0, %v7076_v58  ;;  %vm1960_vm11 = vcmp.eq.s32.totalorder %v7278_v25, %v7771_v32  ;;  %vm2724_vm12 = vcmp.eq.s32.totalorder %v7275_v22, %v7774_v37  ;;  %vm5614_vm13 = vmpackc.low %vm2219_vm5, %vm2211_vm3 }
  0xed   : > { %v1035_v50 = vadd.f32 %v1003_v3, %v971_v59  ;;  %5613 = vmatpush1.bf16.xpose.msk.msra.mxu0 %vm7999_vm4, %v7076_v58  ;;  %5855 = vmatprep.mubr.msk.bf16.mxu1 %vm5854_vm6, %v7076_v58  ;;  %vm2732_vm14 = vcmp.eq.s32.totalorder %v7278_v25, %v7774_v37  ;;  %vm1969_vm15 = vcmp.eq.s32.totalorder %v11221_v51, %v7527_v33  ;;  %vm5870_vm1 = vmpackc.low %vm2991_vm8, %vm2983_vm7  ;;  %v8059_v41 = vcvt.f32.s32 %v6858_v54 }
  0xee   : > { %vm1977_vm0 = vcmp.eq.s32.totalorder %v11222_v52, %v7527_v33  ;;  %5869 = vmatpush1.bf16.xpose.msk.msra.mxu1 %vm5868_vm10, %v7076_v58  ;;  %5615 = vmatprep.subr.msk.bf16.mxu0 %vm5614_vm13, %v7076_v58  ;;  %vm2741_vm2 = vcmp.eq.s32.totalorder %v11221_v51, %v7534_v43  ;;  %v1819_v24 = vadd.f32 %v1787_v34, %v1755_v39  ;;  %7007 = vrcp.f32 %v886_v42  ;;  %vm8068_vm3 = vmpackc.low %vm1960_vm11, %vm1952_vm9 }
  0xef   : > { %5871 = vmatprep.subr.msk.bf16.mxu1 %vm5870_vm1, %v7076_v58  ;;  %vm2210_vm4 = vcmp.eq.s32.totalorder %v7275_v22, %v7823_v0  ;;  %vm2218_vm5 = vcmp.eq.s32.totalorder %v7278_v25, %v7823_v0  ;;  %v1066_v46 = vshra.s32 %v7669_v15, 6  ;;  %v8077_v42 = vcvt.f32.s32 %v6906_v45  ;;  %vm8085_vm6 = vmpackc.low %vm2732_vm14, %vm2724_vm12 }
  0xf0   : > { %vm2749_vm7 = vcmp.eq.s32.totalorder %v11222_v52, %v7534_v43  ;;  %vm2227_vm8 = vcmp.eq.s32.totalorder %v11221_v51, %v7745_v44  ;;  %v1850_v15 = vshra.s32 %v7687_v5, 6  ;;  %v6856_v30 = vtrunc.f32 %v1035_v50  ;;  %vm8100_vm9 = vmpackc.low %vm1977_vm0, %vm1969_vm15 }
  0xf1   : > { %vm2982_vm10 = vcmp.eq.s32.totalorder %v7275_v22, %v7832_v53  ;;  %vm2990_vm11 = vcmp.eq.s32.totalorder %v7278_v25, %v7832_v53  ;;  %vm2235_vm12 = vcmp.eq.s32.totalorder %v11222_v52, %v7745_v44  ;;  %v1065_v5 = vshra.s32 %v7747_v57, 6  ;;  %vm8111_vm13 = vmpackc.low %vm2218_vm5, %vm2210_vm4 }
  0xf2   : > { %vm2999_vm14 = vcmp.eq.s32.totalorder %v11221_v51, %v7756_v62  ;;  %vm3007_vm15 = vcmp.eq.s32.totalorder %v11222_v52, %v7756_v62  ;;  %v1084_v33 = vand.u32 63, %v8059_v41  ;;  %v6904_v13 = vtrunc.f32 %v1819_v24  ;;  %vm5858_vm0 = vmpackc.low %vm2749_vm7, %vm2741_vm2 }
  0xf3   : > { %5601 = vmatmul.mubr.msk.bf16.gmra.mrb[8].mxu0 %vm8068_vm3, %v7076_v58  ;;  %vm1968_vm1 = vcmp.eq.s32.totalorder %v11221_v51, %v7771_v32  ;;  %vm1976_vm4 = vcmp.eq.s32.totalorder %v11222_v52, %v7771_v32  ;;  %v8134_v57 = vrot.slane %v1066_v46, %v7141_v9  ;;  %v1868_v59 = vand.u32 63, %v8077_v42  ;;  %vm5872_vm2 = vmpackc.low %vm2990_vm11, %vm2982_vm10 }
  0xf4   : > { %5857 = vmatmul.mubr.msk.bf16.gmra.mrb[8].mxu1 %vm8085_vm6, %v7076_v58  ;;  %5603 = vmatprep.mubr.msk.bf16.mxu0 %vm8100_vm9, %v7076_v58  ;;  %vm2740_vm3 = vcmp.eq.s32.totalorder %v11221_v51, %v7774_v37  ;;  %v8152_v43 = vrot.slane %v1850_v15, %v7141_v9  ;;  %v1849_v3 = vshra.s32 %v7758_v20, 6  ;;  %v8155_v47 = vcvt.f32.s32 %v6856_v30  ;;  %vm5618_vm5 = vmpackc.low %vm2235_vm12, %vm2227_vm8  ;;  %v11259_v15 = vld [vmem:[#allocation6_spill] sm:$0xff] }
  0xf5   : > { %5617 = vmatpush1.bf16.xpose.msk.msra.mxu0 %vm8111_vm13, %v7076_v58  ;;  %5859 = vmatprep.mubr.msk.bf16.mxu1 %vm5858_vm0, %v7076_v58  ;;  %vm2748_vm6 = vcmp.eq.s32.totalorder %v11222_v52, %v7774_v37  ;;  %vm2226_vm7 = vcmp.eq.s32.totalorder %v11221_v51, %v7823_v0  ;;  %v8172_v20 = vrot.slane %v1065_v5, %v7141_v9  ;;  %vm5874_vm8 = vmpackc.low %vm3007_vm15, %vm2999_vm14  ;;  %v8189_v27 = vcvt.f32.s32 %v6904_v13 }
  0xf6   : > { %5873 = vmatpush1.bf16.xpose.msk.msra.mxu1 %vm5872_vm2, %v7076_v58  ;;  %5619 = vmatprep.subr.msk.bf16.mxu0 %vm5618_vm5, %v7076_v58  ;;  %vm2234_vm9 = vcmp.eq.s32.totalorder %v11222_v52, %v7823_v0  ;;  %vm2998_vm10 = vcmp.eq.s32.totalorder %v11221_v51, %v7832_v53  ;;  %v8187_v44 = vrot.slane %v1084_v33, %v7141_v9  ;;  %vm8198_vm11 = vmpackc.low %vm1976_vm4, %vm1968_vm1  ;;  %v1083_v45 = vand.u32 63, %v8155_v47  ;;  %v11263_v33 = vld [vmem:[#allocation8_spill] sm:$0xff] }
  0xf7   : > { %5875 = vmatprep.subr.msk.bf16.mxu1 %vm5874_vm8, %v7076_v58  ;;  %vm1923_vm12 = vcmp.eq.s32.totalorder %v7132_v6, %v8134_v57  ;;  %vm1931_vm13 = vcmp.eq.s32.totalorder %v7252_v8, %v8134_v57  ;;  %vm3006_vm14 = vcmp.eq.s32.totalorder %v11222_v52, %v7832_v53  ;;  %v8209_v54 = vrot.slane %v1868_v59, %v7141_v9  ;;  %vm8217_vm15 = vmpackc.low %vm2748_vm6, %vm2740_vm3 }
  0xf8   : > { %v7008_v39 = vpop.eup %7007  ;;  %vm2695_vm0 = vcmp.eq.s32.totalorder %v7132_v6, %v8152_v43  ;;  %vm2703_vm1 = vcmp.eq.s32.totalorder %v7252_v8, %v8152_v43  ;;  %v8226_v34 = vrot.slane %v1849_v3, %v7141_v9  ;;  %vm8235_vm4 = vmpackc.low %vm2234_vm9, %vm2226_vm7  ;;  %vm1922_vm2 = vcmp.eq.s32.totalorder %v7132_v6, %v8172_v20 }
  0xf9   : > { %vm1939_vm3 = vcmp.eq.s32.totalorder %v7264_v18, %v8134_v57  ;;  %v1670_v50 = vrot.slane %v7968_v60, %v7159_v17  ;;  %vm5622_vm6 = vmpackc.low %vm1931_vm13, %vm1923_vm12  ;;  %vm2181_vm7 = vcmp.eq.s32.totalorder %v7132_v6, %v8187_v44  ;;  %vm2189_vm8 = vcmp.eq.s32.totalorder %v7252_v8, %v8187_v44 }
  0xfa   : > { %vm1930_vm9 = vcmp.eq.s32.totalorder %v7252_v8, %v8172_v20  ;;  %v1867_v0 = vand.u32 63, %v8189_v27  ;;  %vm8266_vm12 = vmpackc.low %vm3006_vm14, %vm2998_vm10  ;;  %vm2953_vm13 = vcmp.eq.s32.totalorder %v7132_v6, %v8209_v54  ;;  %vm2961_vm5 = vcmp.eq.s32.totalorder %v7252_v8, %v8209_v54 }
  0xfb   : > { %5605 = vmatmul.mubr.msk.bf16.gmra.mrb[12].mxu0 %vm8198_vm11, %v7076_v58  ;;  %v934_v11 = vmul.f32 %v7008_v39, %v7810_v36  ;;  %7009 = vrcp.f32 %v1670_v50  ;;  %vm5878_vm10 = vmpackc.low %vm2703_vm1, %vm2695_vm0  ;;  %vm2694_vm11 = vcmp.eq.s32.totalorder %v7132_v6, %v8226_v34  ;;  %vm2702_vm14 = vcmp.eq.s32.totalorder %v7252_v8, %v8226_v34 }
  0xfc   : > { %5861 = vmatmul.mubr.msk.bf16.gmra.mrb[12].mxu1 %vm8217_vm15, %v7076_v58  ;;  %5623 = vmatprep.mubr.msk.bf16.mxu0 %vm5622_vm6, %v7076_v58  ;;  %v8290_v36 = vrot.slane %v1083_v45, %v7141_v9  ;;  %vm5638_vm15 = vmpackc.low %vm2189_vm8, %vm2181_vm7  ;;  %vm2711_vm0 = vcmp.eq.s32.totalorder %v7264_v18, %v8152_v43  ;;  %vm2719_vm1 = vcmp.eq.s32.totalorder %v7267_v19, %v8152_v43 }
  0xfd   : > { %5621 = vmatpush1.bf16.xpose.msk.msra.mxu0 %vm8235_vm4, %v7076_v58  ;;  %5879 = vmatprep.mubr.msk.bf16.mxu1 %vm5878_vm10, %v7076_v58  ;;  %v8308_v53 = vadd.f32 %v7330_v28, %v7997_v38  ;;  %vm5894_vm4 = vmpackc.low %vm2961_vm5, %vm2953_vm13  ;;  %v8321_v46 = vrot.slane %v1867_v0, %v7141_v9  ;;  %vm1938_vm6 = vcmp.eq.s32.totalorder %v7264_v18, %v8172_v20  ;;  %v6839_v38 = vround.rtne.f32 %v934_v11 }
  0xfe   : > { %5877 = vmatpush1.bf16.xpose.msk.msra.mxu1 %vm8266_vm12, %v7076_v58  ;;  %5639 = vmatprep.subr.msk.bf16.mxu0 %vm5638_vm15, %v7076_v58  ;;  %v1261_v30 = vmul.f32 %v11259_v15, %v7261_v16  ;;  %v1421_v5 = vmul.f32 %v11260_v4, %v7313_v23  ;;  %vm8340_vm5 = vmpackc.low %vm1930_vm9, %vm1922_vm2  ;;  %vm2180_vm8 = vcmp.eq.s32.totalorder %v7132_v6, %v8290_v36 }
  0xff   : > { %5895 = vmatprep.subr.msk.bf16.mxu1 %vm5894_vm4, %v7076_v58  ;;  %v882_v31 = vrot.slane %v8308_v53, %v7159_v17  ;;  %vm2188_vm12 = vcmp.eq.s32.totalorder %v7252_v8, %v8290_v36  ;;  %v1597_v13 = vmul.f32 %v11263_v33, %v7272_v21  ;;  %vm8358_vm2 = vmpackc.low %vm2702_vm14, %vm2694_vm11  ;;  %vm11266_vm15 = vcmp.eq.s32.totalorder %v7267_v19, %v8134_v57 }
 0x100   : > { %v1437_v3 = vadd.f32 %v1421_v5, %v1261_v30  ;;  %vm8372_vm4 = vmpackc.low %vm11266_vm15, %vm1939_vm3  ;;  %vm2952_vm11 = vcmp.eq.s32.totalorder %v7132_v6, %v8321_v46  ;;  %vm2960_vm14 = vcmp.eq.s32.totalorder %v7252_v8, %v8321_v46  ;;  %vm2197_vm10 = vcmp.eq.s32.totalorder %v7264_v18, %v8187_v44 }
 0x101   : > { %7011 = vrcp.f32 %v882_v31  ;;  %vm8384_vm13 = vmpackc.low %vm2188_vm12, %vm2180_vm8  ;;  %vm2205_vm3 = vcmp.eq.s32.totalorder %v7267_v19, %v8187_v44  ;;  %v974_v32 = vmul.f32 64.0, %v6839_v38  ;;  %v1006_v45 = vrot.slane %v6839_v38, 1 }
 0x102   : > { %v1613_v37 = vadd.f32 %v1597_v13, %v1437_v3  ;;  %vm5882_vm8 = vmpackc.low %vm2719_vm1, %vm2711_vm0  ;;  %vm2969_vm12 = vcmp.eq.s32.totalorder %v7264_v18, %v8209_v54  ;;  %vm2977_vm15 = vcmp.eq.s32.totalorder %v7267_v19, %v8209_v54  ;;  %vm2727_vm9 = vcmp.eq.s32.totalorder %v7275_v22, %v8152_v43 }
 0x103   : > { %vm2735_vm7 = vcmp.eq.s32.totalorder %v7278_v25, %v8152_v43  ;;  %vm5896_vm0 = vmpackc.low %vm2960_vm14, %vm2952_vm11  ;;  %vm2221_vm11 = vcmp.eq.s32.totalorder %v7278_v25, %v8187_v44  ;;  %vm2976_vm14 = vcmp.eq.s32.totalorder %v7267_v19, %v8321_v46  ;;  %v1068_v30 = vshra.s32 %v8059_v41, 6 }
 0x104   : > { %5625 = vmatmul.mubr.msk.bf16.vlgmr.msra.gmra.mrb[0].mxu0 %vm8340_vm5, %v7076_v58  ;;  %v8424_v0 = vadd.f32 %v1613_v37, %v7330_v28  ;;  %vm2229_vm5 = vcmp.eq.s32.totalorder %v11221_v51, %v8187_v44  ;;  %v1852_v13 = vshra.s32 %v8077_v42, 6  ;;  %v468_v39 = vmul.f32 %v7596_v56, %v7261_v16 }
 0x105   : > { %v7010_v50 = vpop.eup %7009  ;;  %5881 = vmatmul.mubr.msk.bf16.vlgmr.msra.gmra.mrb[0].mxu1 %vm8358_vm2, %v7076_v58  ;;  %5627 = vmatprep.mubr.msk.bf16.mxu0 %vm8372_vm4, %v7076_v58  ;;  %vm5642_vm2 = vmpackc.low %vm2205_vm3, %vm2197_vm10  ;;  %vm2213_vm4 = vcmp.eq.s32.totalorder %v7275_v22, %v8187_v44  ;;  %vm3009_vm3 = vcmp.eq.s32.totalorder %v11222_v52, %v8209_v54  ;;  %v1067_v56 = vshra.s32 %v8155_v47, 6  ;;  %v1424_v37 = vmul.f32 %v7731_v48, %v7313_v23 }
 0x106   : > { %5641 = vmatpush1.bf16.xpose.msk.msra.mxu0 %vm8384_vm13, %v7076_v58  ;;  %5883 = vmatprep.mubr.msk.bf16.mxu1 %vm5882_vm8, %v7076_v58  ;;  %v1718_v24 = vmul.f32 %v7010_v50, %v7968_v60  ;;  %vm5898_vm10 = vmpackc.low %vm2977_vm15, %vm2969_vm12  ;;  %v1038_v60 = vadd.f32 %v1006_v45, %v974_v32  ;;  %v1666_v11 = vrot.slane %v8424_v0, %v7159_v17 }
 0x107   : > { %5897 = vmatpush1.bf16.xpose.msk.msra.mxu1 %vm5896_vm0, %v7076_v58  ;;  %5643 = vmatprep.subr.msk.bf16.mxu0 %vm5642_vm2, %v7076_v58  ;;  %vm11271_vm12 = vcmp.eq.s32.totalorder %v7267_v19, %v8172_v20  ;;  %vm2196_vm0 = vcmp.eq.s32.totalorder %v7264_v18, %v8290_v36  ;;  %vm2204_vm2 = vcmp.eq.s32.totalorder %v7267_v19, %v8290_v36 }
 0x108   : > { %5899 = vmatprep.subr.msk.bf16.mxu1 %vm5898_vm10, %v7076_v58  ;;  %vm8468_vm15 = vmpackc.low %vm11271_vm12, %vm1938_vm6  ;;  %v6887_v31 = vround.rtne.f32 %v1718_v24  ;;  %vm11274_vm10 = vcmp.eq.s32.totalorder %v7264_v18, %v8226_v34  ;;  %vm11275_vm8 = vcmp.eq.s32.totalorder %v7267_v19, %v8226_v34  ;;  %vm2968_vm12 = vcmp.eq.s32.totalorder %v7264_v18, %v8321_v46  ;;  %v7047_v24 = vld [vmem:[%s11204_s1 + $0x20] sm:$0x77] }
 0x109   : > { %vm8484_vm6 = vmpackc.low %vm11275_vm8, %vm11274_vm10  ;;  %7013 = vrcp.f32 %v1666_v11  ;;  %vm11278_vm8 = vcmp.eq.s32.totalorder %v7275_v22, %v8134_v57  ;;  %vm11279_vm10 = vcmp.eq.s32.totalorder %v7278_v25, %v8134_v57  ;;  %v6862_v59 = vtrunc.f32 %v1038_v60 }
 0x10a   : > { %vm8503_vm13 = vmpackc.low %vm11279_vm10, %vm11278_vm8  ;;  %v1758_v5 = vmul.f32 64.0, %v6887_v31  ;;  %v1790_v49 = vrot.slane %v6887_v31, 1  ;;  %vm2984_vm8 = vcmp.eq.s32.totalorder %v7275_v22, %v8321_v46  ;;  %vm2992_vm10 = vcmp.eq.s32.totalorder %v7278_v25, %v8321_v46 }
 0x10b   : > { %v7012_v41 = vpop.eup %7011  ;;  %vm8517_vm1 = vmpackc.low %vm2204_vm2, %vm2196_vm0  ;;  %vm3001_vm2 = vcmp.eq.s32.totalorder %v11221_v51, %v8209_v54  ;;  %v632_v32 = vmul.f32 %v7629_v2, %v7313_v23  ;;  %v812_v2 = vmul.f32 %v7722_v40, %v7272_v21  ;;  %v1264_v45 = vmul.f32 %v7613_v26, %v7261_v16 }
 0x10c   : > { %5629 = vmatmul.mubr.msk.bf16.gmra.mrb[4].mxu0 %vm8468_vm15, %v7076_v58  ;;  %vm8539_vm0 = vmpackc.low %vm2735_vm7, %vm2727_vm9  ;;  %v1822_v42 = vadd.f32 %v1790_v49, %v1758_v5  ;;  %v932_v62 = vmul.f32 %v7012_v41, %v8308_v53  ;;  %vm1970_vm9 = vcmp.eq.s32.totalorder %v11221_v51, %v8172_v20  ;;  %vm1978_vm15 = vcmp.eq.s32.totalorder %v11222_v52, %v8172_v20 }
 0x10d   : > { %5885 = vmatmul.mubr.msk.bf16.gmra.mrb[4].mxu1 %vm8484_vm6, %v7076_v58  ;;  %5631 = vmatprep.mubr.msk.bf16.mxu0 %vm8503_vm13, %v7076_v58  ;;  %vm8564_vm7 = vmpackc.low %vm2976_vm14, %vm2968_vm12  ;;  %vm2742_vm13 = vcmp.eq.s32.totalorder %v11221_v51, %v8226_v34  ;;  %v648_v48 = vadd.f32 %v632_v32, %v468_v39  ;;  %v1600_v47 = vmul.f32 %v7734_v63, %v7272_v21  ;;  %v8611_v63 = vcvt.f32.s32 %v6862_v59 }
 0x10e   : > { %5645 = vmatpush1.bf16.xpose.msk.msra.mxu0 %vm8517_vm1, %v7076_v58  ;;  %5887 = vmatprep.mubr.msk.bf16.mxu1 %vm8539_vm0, %v7076_v58  ;;  %vm5646_vm14 = vmpackc.low %vm2221_vm11, %vm2213_vm4  ;;  %v6910_v26 = vtrunc.f32 %v1822_v42  ;;  %v6838_v40 = vround.rtne.f32 %v932_v62  ;;  %vm11288_vm1 = vcmp.eq.s32.totalorder %v7275_v22, %v8209_v54  ;;  %vm11289_vm4 = vcmp.eq.s32.totalorder %v7278_v25, %v8209_v54 }
 0x10f   : > { %5901 = vmatpush1.bf16.xpose.msk.msra.mxu1 %vm8564_vm7, %v7076_v58  ;;  %5647 = vmatprep.subr.msk.bf16.mxu0 %vm5646_vm14, %v7076_v58  ;;  %vm5902_vm11 = vmpackc.low %vm11289_vm4, %vm11288_vm1  ;;  %vm2228_vm12 = vcmp.eq.s32.totalorder %v11221_v51, %v8290_v36  ;;  %v1440_v50 = vadd.f32 %v1424_v37, %v1264_v45  ;;  %vm11290_vm7 = vcmp.eq.s32.totalorder %v7275_v22, %v8172_v20  ;;  %v1086_v3 = vand.u32 63, %v8611_v63 }
 0x110   : > { %5903 = vmatprep.subr.msk.bf16.mxu1 %vm5902_vm11, %v7076_v58  ;;  %vm11291_vm14 = vcmp.eq.s32.totalorder %v7278_v25, %v8172_v20  ;;  %v8624_v60 = vcvt.f32.s32 %v6910_v26  ;;  %v973_v11 = vmul.f32 64.0, %v6838_v40  ;;  %v1005_v38 = vrot.slane %v6838_v40, 1 }
 0x111   : > { %vm8620_vm6 = vmpackc.low %vm11291_vm14, %vm11290_vm7  ;;  %v828_v31 = vadd.f32 %v812_v2, %v648_v48  ;;  %vm11294_vm1 = vcmp.eq.s32.totalorder %v7275_v22, %v8226_v34  ;;  %vm11295_vm4 = vcmp.eq.s32.totalorder %v7278_v25, %v8226_v34  ;;  %v8637_v4 = vrot.slane %v1068_v30, %v7141_v9 }
 0x112   : > { %vm8632_vm11 = vmpackc.low %vm11295_vm4, %vm11294_vm1  ;;  %v1616_v5 = vadd.f32 %v1600_v47, %v1440_v50  ;;  %v594_v49 = vrot.slane %v514_v29, %v7154_v14  ;;  %vm11298_vm14 = vcmp.eq.s32.totalorder %v11221_v51, %v8134_v57  ;;  %vm11299_vm1 = vcmp.eq.s32.totalorder %v11222_v52, %v8134_v57 }
 0x113   : > { %vm8651_vm4 = vmpackc.low %vm11299_vm1, %vm11298_vm14  ;;  %v8658_v30 = vrot.slane %v1852_v13, %v7141_v9  ;;  %v1037_v33 = vadd.f32 %v1005_v38, %v973_v11  ;;  %v8661_v59 = vadd.f32 %v7330_v28, %v828_v31  ;;  %v7014_v29 = vpop.eup %7013  ;;  %vm11302_vm7 = vcmp.eq.s32.totalorder %v7275_v22, %v8290_v36 }
 0x114   : > { %vm11303_vm14 = vcmp.eq.s32.totalorder %v7278_v25, %v8290_v36  ;;  %v8675_v13 = vadd.f32 %v1616_v5, %v7330_v28  ;;  %v631_v42 = vmul.f32 %v594_v49, %v7313_v23  ;;  %v774_v62 = vrot.slane %v694_v1, %v7159_v17  ;;  %5633 = vmatmul.mubr.msk.bf16.gmra.mrb[8].mxu0 %vm8620_vm6, %v7076_v58  ;;  %vm5904_vm6 = vmpackc.low %vm2992_vm10, %vm2984_vm8 }
 0x115   : > { %vm8669_vm1 = vmpackc.low %vm11303_vm14, %vm11302_vm7  ;;  %vm11306_vm7 = vcmp.eq.s32.totalorder %v11221_v51, %v8152_v43  ;;  %vm11307_vm14 = vcmp.eq.s32.totalorder %v11222_v52, %v8152_v43  ;;  %v1870_v39 = vand.u32 63, %v8624_v60  ;;  %v8693_v32 = vrot.slane %v1067_v56, %v7141_v9  ;;  %5889 = vmatmul.mubr.msk.bf16.gmra.mrb[8].mxu1 %vm8632_vm11, %v7076_v58  ;;  %5635 = vmatprep.mubr.msk.bf16.mxu0 %vm8651_vm4, %v7076_v58 }
 0x116   : > { %vm5890_vm0 = vmpackc.low %vm11307_vm14, %vm11306_vm7  ;;  %v6860_v53 = vtrunc.f32 %v1037_v33  ;;  %v1716_v61 = vmul.f32 %v7014_v29, %v8424_v0  ;;  %vm1925_vm7 = vcmp.eq.s32.totalorder %v7132_v6, %v8637_v4  ;;  %v1851_v1 = vshra.s32 %v8189_v27, 6  ;;  %5649 = vmatpush1.bf16.xpose.msk.msra.mxu0 %vm8669_vm1, %v7076_v58 }
 0x117   : > { %v894_v43 = vrot.slane %v8661_v59, %v7159_v17  ;;  %v467_v0 = vmul.f32 %v7661_v35, %v7261_v16  ;;  %5891 = vmatprep.mubr.msk.bf16.mxu1 %vm5890_vm0, %v7076_v58  ;;  %vm11308_vm8 = vcmp.eq.s32.totalorder %v11222_v52, %v8187_v44  ;;  %vm1933_vm11 = vcmp.eq.s32.totalorder %v7252_v8, %v8637_v4  ;;  %vm8750_vm0 = vmpackc.low %vm1978_vm15, %vm1970_vm9 }
 0x118   : > { %vm5650_vm10 = vmpackc.low %vm11308_vm8, %vm2229_vm5  ;;  %v8727_v27 = vcvt.f32.s32 %v6860_v53  ;;  %v6886_v56 = vround.rtne.f32 %v1716_v61  ;;  %v1678_v35 = vrot.slane %v8675_v13, %v7159_v17  ;;  %5905 = vmatpush1.bf16.xpose.msk.msra.mxu1 %vm5904_vm6, %v7076_v58  ;;  %v8740_v44 = vrot.slane %v1086_v3, %v7141_v9 }
 0x119   : > { %5651 = vmatprep.subr.msk.bf16.mxu0 %vm5650_vm10, %v7076_v58  ;;  %vm5906_vm5 = vmpackc.low %vm3009_vm3, %vm3001_vm2  ;;  %7015 = vrcp.f32 %v894_v43  ;;  %v647_v2 = vadd.f32 %v631_v42, %v467_v0  ;;  %v811_v45 = vmul.f32 %v774_v62, %v7272_v21  ;;  %vm2697_vm3 = vcmp.eq.s32.totalorder %v7132_v6, %v8658_v30 }
 0x11a   : > { %5907 = vmatprep.subr.msk.bf16.mxu1 %vm5906_vm5, %v7076_v58  ;;  %v8757_v54 = vrot.slane %v1870_v39, %v7141_v9  ;;  %v1757_v26 = vmul.f32 64.0, %v6886_v56  ;;  %v1789_v40 = vrot.slane %v6886_v56, 1  ;;  %vm11311_vm2 = vcmp.eq.s32.totalorder %v11222_v52, %v8226_v34  ;;  %vm5654_vm8 = vmpackc.low %vm1933_vm11, %vm1925_vm7 }
 0x11b   : > { %vm8765_vm4 = vmpackc.low %vm11311_vm2, %vm2742_vm13  ;;  %vm2705_vm9 = vcmp.eq.s32.totalorder %v7252_v8, %v8658_v30  ;;  %vm1924_vm15 = vcmp.eq.s32.totalorder %v7132_v6, %v8693_v32  ;;  %vm1932_vm1 = vcmp.eq.s32.totalorder %v7252_v8, %v8693_v32  ;;  %v8776_v48 = vrot.slane %v1851_v1, %v7141_v9 }
 0x11c   : > { %vm11314_vm13 = vcmp.eq.s32.totalorder %v11222_v52, %v8290_v36  ;;  %v1085_v47 = vand.u32 63, %v8727_v27  ;;  %v1821_v50 = vadd.f32 %v1789_v40, %v1757_v26  ;;  %7017 = vrcp.f32 %v1678_v35  ;;  %5637 = vmatmul.mubr.msk.bf16.gmra.mrb[12].mxu0 %vm8750_vm0, %v7076_v58  ;;  %vm5910_vm0 = vmpackc.low %vm2705_vm9, %vm2697_vm3 }
 0x11d   : > { %vm8784_vm14 = vmpackc.low %vm11314_vm13, %vm2228_vm12  ;;  %vm2183_vm12 = vcmp.eq.s32.totalorder %v7132_v6, %v8740_v44  ;;  %vm2191_vm10 = vcmp.eq.s32.totalorder %v7252_v8, %v8740_v44  ;;  %v827_v36 = vadd.f32 %v811_v45, %v647_v2  ;;  %v1306_v11 = vrot.slane %v7047_v24, %v7154_v14  ;;  %5893 = vmatmul.mubr.msk.bf16.gmra.mrb[12].mxu1 %vm8765_vm4, %v7076_v58 }
 0x11e   : > { %vm11317_vm7 = vcmp.eq.s32.totalorder %v11221_v51, %v8321_v46  ;;  %vm11318_vm11 = vcmp.eq.s32.totalorder %v11222_v52, %v8321_v46  ;;  %vm2955_vm2 = vcmp.eq.s32.totalorder %v7132_v6, %v8757_v54  ;;  %vm2963_vm13 = vcmp.eq.s32.totalorder %v7252_v8, %v8757_v54  ;;  %5655 = vmatprep.mubr.msk.bf16.mxu0 %vm5654_vm8, %v7076_v58  ;;  %vm5670_vm3 = vmpackc.low %vm2191_vm10, %vm2183_vm12 }
 0x11f   : > { %vm8814_vm5 = vmpackc.low %vm11318_vm11, %vm11317_vm7  ;;  %v6908_v31 = vtrunc.f32 %v1821_v50  ;;  %vm2696_vm7 = vcmp.eq.s32.totalorder %v7132_v6, %v8776_v48  ;;  %vm2704_vm11 = vcmp.eq.s32.totalorder %v7252_v8, %v8776_v48  ;;  %vm2713_vm6 = vcmp.eq.s32.totalorder %v7264_v18, %v8658_v30  ;;  %5653 = vmatpush1.bf16.xpose.msk.msra.mxu0 %vm8784_vm14, %v7076_v58  ;;  %5911 = vmatprep.mubr.msk.bf16.mxu1 %vm5910_vm0, %v7076_v58 }
 0x120   : > { %v8851_v46 = vrot.slane %v1085_v47, %v7141_v9  ;;  %vm2721_vm4 = vcmp.eq.s32.totalorder %v7267_v19, %v8658_v30  ;;  %vm1940_vm9 = vcmp.eq.s32.totalorder %v7264_v18, %v8693_v32  ;;  %5909 = vmatpush1.bf16.xpose.msk.msra.mxu1 %vm8814_vm5, %v7076_v58  ;;  %5671 = vmatprep.subr.msk.bf16.mxu0 %vm5670_vm3, %v7076_v58  ;;  %vm5926_vm14 = vmpackc.low %vm2963_vm13, %vm2955_vm2  ;;  %v1854_v57 = vshra.s32 %v8624_v60, 6 }
 0x121   : > { %v8855_v15 = vcvt.f32.s32 %v6908_v31  ;;  %v8870_v5 = vadd.f32 %v7330_v28, %v827_v36  ;;  %v1386_v49 = vrot.slane %v1306_v11, %v7154_v14  ;;  %v1482_v41 = vrot.slane %v7047_v24, %v7159_v17  ;;  %5927 = vmatprep.subr.msk.bf16.mxu1 %vm5926_vm14, %v7076_v58  ;;  %vm8888_vm5 = vmpackc.low %vm1932_vm1, %vm1924_vm15 }
 0x122   : > { %vm2199_vm8 = vcmp.eq.s32.totalorder %v7264_v18, %v8740_v44  ;;  %v1263_v42 = vmul.f32 %v7752_v55, %v7261_v16  ;;  %vm8904_vm15 = vmpackc.low %vm2704_vm11, %vm2696_vm7  ;;  %vm2182_vm1 = vcmp.eq.s32.totalorder %v7132_v6, %v8851_v46  ;;  %vm2207_vm2 = vcmp.eq.s32.totalorder %v7267_v19, %v8740_v44 }
 0x123   : > { %v1869_v33 = vand.u32 63, %v8855_v15  ;;  %v7016_v29 = vpop.eup %7015  ;;  %v890_v3 = vrot.slane %v8870_v5, %v7159_v17  ;;  %v1423_v62 = vmul.f32 %v1386_v49, %v7313_v23  ;;  %v1562_v39 = vrot.slane %v1482_v41, %v7159_v17  ;;  %vm8935_vm3 = vmpackc.low %vm2721_vm4, %vm2713_vm6 }
 0x124   : > { %v938_v55 = vmul.f32 %v7016_v29, %v8661_v59  ;;  %vm11325_vm13 = vcmp.eq.s32.totalorder %v7264_v18, %v8637_v4  ;;  %vm11326_vm0 = vcmp.eq.s32.totalorder %v7267_v19, %v8637_v4  ;;  %vm2190_vm11 = vcmp.eq.s32.totalorder %v7252_v8, %v8851_v46  ;;  %vm8953_vm6 = vmpackc.low %vm2207_vm2, %vm2199_vm8 }
 0x125   : > { %v8911_v61 = vrot.slane %v1869_v33, %v7141_v9  ;;  %vm8922_vm7 = vmpackc.low %vm11326_vm0, %vm11325_vm13  ;;  %7019 = vrcp.f32 %v890_v3  ;;  %v1439_v43 = vadd.f32 %v1423_v62, %v1263_v42  ;;  %v1599_v0 = vmul.f32 %v1562_v39, %v7272_v21 }
 0x126   : > { %v7018_v56 = vpop.eup %7017  ;;  %5657 = vmatmul.mubr.msk.bf16.vlgmr.msra.gmra.mrb[0].mxu0 %vm8888_vm5, %v7076_v58  ;;  %vm2971_vm4 = vcmp.eq.s32.totalorder %v7264_v18, %v8757_v54  ;;  %vm2979_vm0 = vcmp.eq.s32.totalorder %v7267_v19, %v8757_v54  ;;  %vm1965_vm10 = vcmp.eq.s32.totalorder %v7278_v25, %v8637_v4  ;;  %vm2729_vm12 = vcmp.eq.s32.totalorder %v7275_v22, %v8658_v30  ;;  %vm5672_vm8 = vmpackc.low %vm2190_vm11, %vm2182_vm1 }
 0x127   : > { %vm2954_vm14 = vcmp.eq.s32.totalorder %v7132_v6, %v8911_v61  ;;  %vm2962_vm13 = vcmp.eq.s32.totalorder %v7252_v8, %v8911_v61  ;;  %5913 = vmatmul.mubr.msk.bf16.vlgmr.msra.gmra.mrb[0].mxu1 %vm8904_vm15, %v7076_v58  ;;  %5659 = vmatprep.mubr.msk.bf16.mxu0 %vm8922_vm7, %v7076_v58  ;;  %vm2737_vm5 = vcmp.eq.s32.totalorder %v7278_v25, %v8658_v30  ;;  %v6841_v2 = vround.rtne.f32 %v938_v55  ;;  %vm5930_vm11 = vmpackc.low %vm2979_vm0, %vm2971_vm4 }
 0x128   : > { %vm1956_vm2 = vcmp.eq.s32.totalorder %v7275_v22, %v8693_v32  ;;  %v1722_v45 = vmul.f32 %v7018_v56, %v8675_v13  ;;  %5673 = vmatpush1.bf16.xpose.msk.msra.mxu0 %vm5672_vm8, %v7076_v58  ;;  %5915 = vmatprep.mubr.msk.bf16.mxu1 %vm8935_vm3, %v7076_v58  ;;  %vm5928_vm15 = vmpackc.low %vm2962_vm13, %vm2954_vm14  ;;  %vm1964_vm1 = vcmp.eq.s32.totalorder %v7278_v25, %v8693_v32  ;;  %v1070_v13 = vshra.s32 %v8611_v63, 6 }
 0x129   : > { %vm2728_vm7 = vcmp.eq.s32.totalorder %v7275_v22, %v8776_v48  ;;  %v1615_v37 = vadd.f32 %v1599_v0, %v1439_v43  ;;  %5929 = vmatpush1.bf16.xpose.msk.msra.mxu1 %vm5928_vm15, %v7076_v58  ;;  %5675 = vmatprep.subr.msk.bf16.mxu0 %vm8953_vm6, %v7076_v58  ;;  %v976_v26 = vmul.f32 64.0, %v6841_v2  ;;  %v1008_v40 = vrot.slane %v6841_v2, 1 }
 0x12a   : > { %v6889_v63 = vround.rtne.f32 %v1722_v45  ;;  %5931 = vmatprep.subr.msk.bf16.mxu1 %vm5930_vm11, %v7076_v58  ;;  %vm11333_vm14 = vcmp.eq.s32.totalorder %v7267_v19, %v8693_v32  ;;  %vm2198_vm0 = vcmp.eq.s32.totalorder %v7264_v18, %v8851_v46  ;;  %vm11336_vm8 = vcmp.eq.s32.totalorder %v7264_v18, %v8776_v48 }
 0x12b   : > { %vm9016_vm13 = vmpackc.low %vm11333_vm14, %vm1940_vm9  ;;  %v9027_v34 = vadd.f32 %v1615_v37, %v7330_v28  ;;  %vm11337_vm9 = vcmp.eq.s32.totalorder %v7267_v19, %v8776_v48  ;;  %vm2206_vm11 = vcmp.eq.s32.totalorder %v7267_v19, %v8851_v46  ;;  %v1040_v50 = vadd.f32 %v1008_v40, %v976_v26 }
 0x12c   : > { %vm9035_vm15 = vmpackc.low %vm11337_vm9, %vm11336_vm8  ;;  %v1760_v36 = vmul.f32 64.0, %v6889_v63  ;;  %v1792_v24 = vrot.slane %v6889_v63, 1  ;;  %vm11340_vm6 = vcmp.eq.s32.totalorder %v7275_v22, %v8637_v4  ;;  %vm2215_vm9 = vcmp.eq.s32.totalorder %v7275_v22, %v8740_v44  ;;  %v9241_v63 = vld [vmem:[%s11204_s1 + $0x28] sm:$0x77] }
 0x12d   : > { %vm9051_vm8 = vmpackc.low %vm1965_vm10, %vm11340_vm6  ;;  %vm2223_vm14 = vcmp.eq.s32.totalorder %v7278_v25, %v8740_v44  ;;  %v9060_v38 = vrot.slane %v1070_v13, %v7141_v9  ;;  %v1674_v31 = vrot.slane %v9027_v34, %v7159_v17  ;;  %vm2970_vm6 = vcmp.eq.s32.totalorder %v7264_v18, %v8911_v61 }
 0x12e   : > { %vm9070_vm10 = vmpackc.low %vm2737_vm5, %vm2729_vm12  ;;  %vm2978_vm4 = vcmp.eq.s32.totalorder %v7267_v19, %v8911_v61  ;;  %v6866_v41 = vtrunc.f32 %v1040_v50  ;;  %v1824_v33 = vadd.f32 %v1792_v24, %v1760_v36  ;;  %5661 = vmatmul.mubr.msk.bf16.gmra.mrb[4].mxu0 %vm9016_vm13, %v7076_v58  ;;  %vm2987_vm5 = vcmp.eq.s32.totalorder %v7275_v22, %v8757_v54 }
 0x12f   : > { %v7020_v29 = vpop.eup %7019  ;;  %vm5676_vm12 = vmpackc.low %vm2206_vm11, %vm2198_vm0  ;;  %vm2995_vm3 = vcmp.eq.s32.totalorder %v7278_v25, %v8757_v54  ;;  %7021 = vrcp.f32 %v1674_v31  ;;  %5917 = vmatmul.mubr.msk.bf16.gmra.mrb[4].mxu1 %vm9035_vm15, %v7076_v58  ;;  %5663 = vmatprep.mubr.msk.bf16.mxu0 %vm9051_vm8, %v7076_v58  ;;  %vm1972_vm0 = vcmp.eq.s32.totalorder %v11221_v51, %v8693_v32  ;;  %v9164_v1 = vrot.slane %v1854_v57, %v7141_v9 }
 0x130   : > { %vm5678_vm13 = vmpackc.low %vm2223_vm14, %vm2215_vm9  ;;  %v9108_v60 = vcvt.f32.s32 %v6866_v41  ;;  %v6914_v3 = vtrunc.f32 %v1824_v33  ;;  %v936_v42 = vmul.f32 %v7020_v29, %v8870_v5  ;;  %5677 = vmatpush1.bf16.xpose.msk.msra.mxu0 %vm5676_vm12, %v7076_v58  ;;  %5919 = vmatprep.mubr.msk.bf16.mxu1 %vm9070_vm10, %v7076_v58  ;;  %vm2231_vm14 = vcmp.eq.s32.totalorder %v11221_v51, %v8740_v44  ;;  %v9130_v5 = vld [vmem:[%s11203_s0 + $0x28] sm:$0x77] }
 0x131   : > { %vm5932_vm15 = vmpackc.low %vm2978_vm4, %vm2970_vm6  ;;  %5679 = vmatprep.subr.msk.bf16.mxu0 %vm5678_vm13, %v7076_v58  ;;  %vm2239_vm10 = vcmp.eq.s32.totalorder %v11222_v52, %v8740_v44  ;;  %v526_v53 = vrot.slane %v9130_v5, %v7144_v10  ;;  %vm2222_vm12 = vcmp.eq.s32.totalorder %v7278_v25, %v8851_v46  ;;  %v362_v35 = vrot.slane %v9130_v5, %v7135_v7 }
 0x132   : > { %5933 = vmatpush1.bf16.xpose.msk.msra.mxu1 %vm5932_vm15, %v7076_v58  ;;  %vm5934_vm4 = vmpackc.low %vm2995_vm3, %vm2987_vm5  ;;  %v9142_v62 = vcvt.f32.s32 %v6914_v3  ;;  %v6840_v39 = vround.rtne.f32 %v936_v42  ;;  %vm2214_vm3 = vcmp.eq.s32.totalorder %v7275_v22, %v8851_v46  ;;  %v1088_v0 = vand.u32 63, %v9108_v60 }
 0x133   : > { %5935 = vmatprep.subr.msk.bf16.mxu1 %vm5934_vm4, %v7076_v58  ;;  %vm9153_vm6 = vmpackc.low %vm1964_vm1, %vm1956_vm2  ;;  %vm11347_vm2 = vcmp.eq.s32.totalorder %v7278_v25, %v8776_v48  ;;  %vm11350_vm13 = vcmp.eq.s32.totalorder %v11221_v51, %v8637_v4  ;;  %vm11351_vm15 = vcmp.eq.s32.totalorder %v11222_v52, %v8637_v4  ;;  %v1069_v4 = vshra.s32 %v8727_v27, 6 }
 0x134   : > { %vm9172_vm1 = vmpackc.low %vm11347_vm2, %vm2728_vm7  ;;  %v975_v56 = vmul.f32 64.0, %v6840_v39  ;;  %v1007_v59 = vrot.slane %v6840_v39, 1  ;;  %vm2986_vm7 = vcmp.eq.s32.totalorder %v7275_v22, %v8911_v61  ;;  %vm2994_vm2 = vcmp.eq.s32.totalorder %v7278_v25, %v8911_v61 }
 0x135   : > { %vm9185_vm4 = vmpackc.low %vm11351_vm15, %vm11350_vm13  ;;  %v1872_v45 = vand.u32 63, %v9142_v62  ;;  %vm3003_vm13 = vcmp.eq.s32.totalorder %v11221_v51, %v8757_v54  ;;  %v606_v26 = vrot.slane %v526_v53, %v7154_v14  ;;  %vm11356_vm15 = vcmp.eq.s32.totalorder %v11221_v51, %v8658_v30 }
 0x136   : > { %vm9196_vm9 = vmpackc.low %vm2222_vm12, %vm2214_vm3  ;;  %v1039_v37 = vadd.f32 %v1007_v59, %v975_v56  ;;  %5665 = vmatmul.mubr.msk.bf16.gmra.mrb[8].mxu0 %vm9153_vm6, %v7076_v58  ;;  %vm11357_vm3 = vcmp.eq.s32.totalorder %v11222_v52, %v8658_v30  ;;  %vm3011_vm5 = vcmp.eq.s32.totalorder %v11222_v52, %v8757_v54  ;;  %vm2699_vm8 = vcmp.eq.s32.totalorder %v7132_v6, %v9164_v1 }
 0x137   : > { %vm5922_vm12 = vmpackc.low %vm11357_vm3, %vm11356_vm15  ;;  %vm2707_vm11 = vcmp.eq.s32.totalorder %v7252_v8, %v9164_v1  ;;  %v1853_v27 = vshra.s32 %v8855_v15, 6  ;;  %5921 = vmatmul.mubr.msk.bf16.gmra.mrb[8].mxu1 %vm9172_vm1, %v7076_v58  ;;  %5667 = vmatprep.mubr.msk.bf16.mxu0 %vm9185_vm4, %v7076_v58  ;;  %vm2230_vm15 = vcmp.eq.s32.totalorder %v11221_v51, %v8851_v46  ;;  %v9235_v30 = vrot.slane %v1088_v0, %v7141_v9 }
 0x138   : > { %vm5936_vm6 = vmpackc.low %vm2994_vm2, %vm2986_vm7  ;;  %v6864_v15 = vtrunc.f32 %v1039_v37  ;;  %v442_v40 = vrot.slane %v362_v35, %v7141_v9  ;;  %5681 = vmatpush1.bf16.xpose.msk.msra.mxu0 %vm9196_vm9, %v7076_v58  ;;  %5923 = vmatprep.mubr.msk.bf16.mxu1 %vm5922_vm12, %v7076_v58  ;;  %vm2238_vm4 = vcmp.eq.s32.totalorder %v11222_v52, %v8851_v46  ;;  %v9256_v47 = vrot.slane %v1872_v45, %v7141_v9 }
 0x139   : > { %v7022_v20 = vpop.eup %7021  ;;  %vm5682_vm1 = vmpackc.low %vm2239_vm10, %vm2231_vm14  ;;  %v706_v50 = vrot.slane %v9130_v5, %v7150_v12  ;;  %v9269_v44 = vrot.slane %v1069_v4, %v7141_v9  ;;  %v634_v11 = vmul.f32 %v606_v26, %v7313_v23  ;;  %vm11358_vm9 = vcmp.eq.s32.totalorder %v11222_v52, %v8693_v32 }
 0x13a   : > { %5937 = vmatpush1.bf16.xpose.msk.msra.mxu1 %vm5936_vm6, %v7076_v58  ;;  %5683 = vmatprep.subr.msk.bf16.mxu0 %vm5682_vm1, %v7076_v58  ;;  %vm5938_vm14 = vmpackc.low %vm3011_vm5, %vm3003_vm13  ;;  %v9271_v36 = vcvt.f32.s32 %v6864_v15  ;;  %v1720_v24 = vmul.f32 %v7022_v20, %v9027_v34  ;;  %vm3002_vm5 = vcmp.eq.s32.totalorder %v11221_v51, %v8911_v61  ;;  %vm3010_vm7 = vcmp.eq.s32.totalorder %v11222_v52, %v8911_v61 }
 0x13b   : > { %5939 = vmatprep.subr.msk.bf16.mxu1 %vm5938_vm14, %v7076_v58  ;;  %vm9282_vm10 = vmpackc.low %vm11358_vm9, %vm1972_vm0  ;;  %v9291_v34 = vrot.slane %v1853_v27, %v7141_v9  ;;  %v1158_v31 = vrot.slane %v9241_v63, %v7135_v7  ;;  %vm11361_vm2 = vcmp.eq.s32.totalorder %v11221_v51, %v8776_v48  ;;  %vm11362_vm0 = vcmp.eq.s32.totalorder %v11222_v52, %v8776_v48 }
 0x13c   : > { %vm9301_vm13 = vmpackc.low %vm11362_vm0, %vm11361_vm2  ;;  %vm3729_vm3 = vcmp.eq.s32.totalorder %v7132_v6, %v9235_v30  ;;  %vm3737_vm12 = vcmp.eq.s32.totalorder %v7252_v8, %v9235_v30  ;;  %vm1943_vm6 = vcmp.eq.s32.totalorder %v7264_v18, %v9060_v38  ;;  %v6888_v49 = vround.rtne.f32 %v1720_v24 }
 0x13d   : > { %v470_v41 = vmul.f32 %v442_v40, %v7261_v16  ;;  %vm9318_vm1 = vmpackc.low %vm2238_vm4, %vm2230_vm15  ;;  %vm4501_vm14 = vcmp.eq.s32.totalorder %v7132_v6, %v9256_v47  ;;  %vm4509_vm9 = vcmp.eq.s32.totalorder %v7252_v8, %v9256_v47  ;;  %v786_v33 = vrot.slane %v706_v50, %v7159_v17 }
 0x13e   : > { %v1318_v29 = vrot.slane %v9241_v63, %v7144_v10  ;;  %vm11367_vm2 = vcmp.eq.s32.totalorder %v7132_v6, %v9060_v38  ;;  %vm11368_vm15 = vcmp.eq.s32.totalorder %v7252_v8, %v9060_v38  ;;  %v1087_v46 = vand.u32 63, %v9271_v36  ;;  %5669 = vmatmul.mubr.msk.bf16.gmra.mrb[12].mxu0 %vm9282_vm10, %v7076_v58  ;;  %vm9345_vm0 = vmpackc.low %vm3010_vm7, %vm3002_vm5 }
 0x13f   : > { %vm5686_vm4 = vmpackc.low %vm11368_vm15, %vm11367_vm2  ;;  %v1759_v57 = vmul.f32 64.0, %v6888_v49  ;;  %v1791_v3 = vrot.slane %v6888_v49, 1  ;;  %v650_v42 = vadd.f32 %v634_v11, %v470_v41  ;;  %v814_v53 = vmul.f32 %v786_v33, %v7272_v21  ;;  %5925 = vmatmul.mubr.msk.bf16.gmra.mrb[12].mxu1 %vm9301_vm13, %v7076_v58 }
 0x140   : > { %v1238_v55 = vrot.slane %v1158_v31, %v7141_v9  ;;  %v1398_v43 = vrot.slane %v1318_v29, %v7154_v14  ;;  %v1494_v0 = vrot.slane %v9241_v63, %v7150_v12  ;;  %5687 = vmatprep.mubr.msk.bf16.mxu0 %vm5686_vm4, %v7076_v58  ;;  %vm5942_vm10 = vmpackc.low %vm2707_vm11, %vm2699_vm8  ;;  %vm1951_vm5 = vcmp.eq.s32.totalorder %v7267_v19, %v9060_v38 }
 0x141   : > { %vm2715_vm7 = vcmp.eq.s32.totalorder %v7264_v18, %v9164_v1  ;;  %v1823_v61 = vadd.f32 %v1791_v3, %v1759_v57  ;;  %5685 = vmatpush1.bf16.xpose.msk.msra.mxu0 %vm9318_vm1, %v7076_v58  ;;  %5943 = vmatprep.mubr.msk.bf16.mxu1 %vm5942_vm10, %v7076_v58  ;;  %vm6086_vm11 = vmpackc.low %vm3737_vm12, %vm3729_vm3  ;;  %vm1926_vm8 = vcmp.eq.s32.totalorder %v7132_v6, %v9269_v44  ;;  %v1072_v37 = vshra.s32 %v9108_v60, 6 }
 0x142   : > { %vm1934_vm13 = vcmp.eq.s32.totalorder %v7252_v8, %v9269_v44  ;;  %vm2723_vm2 = vcmp.eq.s32.totalorder %v7267_v19, %v9164_v1  ;;  %5941 = vmatpush1.bf16.xpose.msk.msra.mxu1 %vm9345_vm0, %v7076_v58  ;;  %6087 = vmatprep.subr.msk.bf16.mxu0 %vm6086_vm11, %v7076_v58  ;;  %vm6342_vm3 = vmpackc.low %vm4509_vm9, %vm4501_vm14  ;;  %vm2698_vm12 = vcmp.eq.s32.totalorder %v7132_v6, %v9291_v34  ;;  %v1856_v29 = vshra.s32 %v9142_v62, 6 }
 0x143   : > { %vm2706_vm1 = vcmp.eq.s32.totalorder %v7252_v8, %v9291_v34  ;;  %v9399_v56 = vrot.slane %v1087_v46, %v7141_v9  ;;  %v6912_v59 = vtrunc.f32 %v1823_v61  ;;  %vm1942_vm15 = vcmp.eq.s32.totalorder %v7264_v18, %v9269_v44  ;;  %6343 = vmatprep.subr.msk.bf16.mxu1 %vm6342_vm3, %v7076_v58  ;;  %vm9428_vm11 = vmpackc.low %vm1934_vm13, %vm1926_vm8 }
 0x144   : > { %vm1950_vm4 = vcmp.eq.s32.totalorder %v7267_v19, %v9269_v44  ;;  %vm2714_vm14 = vcmp.eq.s32.totalorder %v7264_v18, %v9291_v34  ;;  %vm2722_vm9 = vcmp.eq.s32.totalorder %v7267_v19, %v9291_v34  ;;  %v830_v35 = vadd.f32 %v814_v53, %v650_v42  ;;  %vm9448_vm8 = vmpackc.low %vm2706_vm1, %vm2698_vm12 }
 0x145   : > { %v1266_v2 = vmul.f32 %v1238_v55, %v7261_v16  ;;  %v1426_v45 = vmul.f32 %v1398_v43, %v7313_v23  ;;  %v1574_v13 = vrot.slane %v1494_v0, %v7159_v17  ;;  %v9413_v4 = vcvt.f32.s32 %v6912_v59  ;;  %vm5690_vm12 = vmpackc.low %vm1951_vm5, %vm1943_vm6 }
 0x146   : > { %v358_v26 = vrot.slane %v9130_v5, %v7141_v9  ;;  %vm3745_vm3 = vcmp.eq.s32.totalorder %v7264_v18, %v9235_v30  ;;  %v9439_v60 = vadd.f32 %v7330_v28, %v830_v35  ;;  %vm3728_vm13 = vcmp.eq.s32.totalorder %v7132_v6, %v9399_v56  ;;  %vm5946_vm6 = vmpackc.low %vm2723_vm2, %vm2715_vm7 }
 0x147   : > { %v1442_v15 = vadd.f32 %v1426_v45, %v1266_v2  ;;  %v1602_v40 = vmul.f32 %v1574_v13, %v7272_v21  ;;  %vm3736_vm0 = vcmp.eq.s32.totalorder %v7252_v8, %v9399_v56  ;;  %v1871_v50 = vand.u32 63, %v9413_v4 }
 0x148   : > { %vm3753_vm10 = vcmp.eq.s32.totalorder %v7267_v19, %v9235_v30  ;;  %v902_v24 = vrot.slane %v9439_v60, %v7159_v17  ;;  %v522_v54 = vrot.slane %v9130_v5, %v7154_v14  ;;  %v702_v31 = vrot.slane %v9130_v5, %v7159_v17  ;;  %5689 = vmatmul.mubr.msk.bf16.vlgmr.msra.gmra.mrb[0].mxu0 %vm9428_vm11, %v7076_v58  ;;  %vm6088_vm7 = vmpackc.low %vm3736_vm0, %vm3728_vm13 }
 0x149   : > { %v1618_v11 = vadd.f32 %v1602_v40, %v1442_v15  ;;  %v9481_v32 = vrot.slane %v1871_v50, %v7141_v9  ;;  %vm4517_vm5 = vcmp.eq.s32.totalorder %v7264_v18, %v9256_v47  ;;  %vm4525_vm1 = vcmp.eq.s32.totalorder %v7267_v19, %v9256_v47  ;;  %5945 = vmatmul.mubr.msk.bf16.vlgmr.msra.gmra.mrb[0].mxu1 %vm9448_vm8, %v7076_v58  ;;  %vm6090_vm0 = vmpackc.low %vm3753_vm10, %vm3745_vm3  ;;  %v9692_v50 = vld [vmem:[%s11203_s0 + $0x30] sm:$0x77] }
 0x14a   : > { %v438_v5 = vrot.slane %v358_v26, %v7141_v9  ;;  %5691 = vmatprep.mubr.msk.bf16.mxu0 %vm5690_vm12, %v7076_v58  ;;  %7023 = vrcp.f32 %v902_v24  ;;  %v602_v41 = vrot.slane %v522_v54, %v7154_v14  ;;  %v782_v48 = vrot.slane %v702_v31, %v7159_v17  ;;  %5947 = vmatprep.mubr.msk.bf16.mxu1 %vm5946_vm6, %v7076_v58  ;;  %vm6346_vm10 = vmpackc.low %vm4525_vm1, %vm4517_vm5 }
 0x14b   : > { %v9499_v49 = vadd.f32 %v1618_v11, %v7330_v28  ;;  %6089 = vmatpush1.bf16.xpose.msk.msra.mxu0 %vm6088_vm7, %v7076_v58  ;;  %vm4500_vm2 = vcmp.eq.s32.totalorder %v7132_v6, %v9481_v32  ;;  %vm4508_vm11 = vcmp.eq.s32.totalorder %v7252_v8, %v9481_v32  ;;  %vm1958_vm8 = vcmp.eq.s32.totalorder %v7275_v22, %v9269_v44  ;;  %vm9552_vm5 = vmpackc.low %vm1950_vm4, %vm1942_vm15 }
 0x14c   : > { %vm6344_vm13 = vmpackc.low %vm4508_vm11, %vm4500_vm2  ;;  %6091 = vmatprep.subr.msk.bf16.mxu0 %vm6090_vm0, %v7076_v58  ;;  %vm1966_vm12 = vcmp.eq.s32.totalorder %v7278_v25, %v9269_v44  ;;  %vm2730_vm6 = vcmp.eq.s32.totalorder %v7275_v22, %v9291_v34  ;;  %v9525_v33 = vrot.slane %v1072_v37, %v7141_v9  ;;  %vm3744_vm3 = vcmp.eq.s32.totalorder %v7264_v18, %v9399_v56 }
 0x14d   : > { %6345 = vmatpush1.bf16.xpose.msk.msra.mxu1 %vm6344_vm13, %v7076_v58  ;;  %vm3761_vm2 = vcmp.eq.s32.totalorder %v7275_v22, %v9235_v30  ;;  %v1686_v46 = vrot.slane %v9499_v49, %v7159_v17  ;;  %v469_v62 = vmul.f32 %v438_v5, %v7261_v16  ;;  %v633_v3 = vmul.f32 %v602_v41, %v7313_v23  ;;  %vm9571_vm15 = vmpackc.low %vm2722_vm9, %vm2714_vm14 }
 0x14e   : > { %6347 = vmatprep.subr.msk.bf16.mxu1 %vm6346_vm10, %v7076_v58  ;;  %v813_v42 = vmul.f32 %v782_v48, %v7272_v21  ;;  %v1154_v39 = vrot.slane %v9241_v63, %v7141_v9  ;;  %vm3752_vm4 = vcmp.eq.s32.totalorder %v7267_v19, %v9399_v56  ;;  %v1314_v55 = vrot.slane %v9241_v63, %v7154_v14 }
 0x14f   : > { %7025 = vrcp.f32 %v1686_v46  ;;  %v1490_v43 = vrot.slane %v9241_v63, %v7159_v17  ;;  %vm11379_vm10 = vcmp.eq.s32.totalorder %v7275_v22, %v9060_v38  ;;  %vm11380_vm13 = vcmp.eq.s32.totalorder %v7278_v25, %v9060_v38  ;;  %v9742_v46 = vld [vmem:[%s11204_s1 + $0x30] sm:$0x77] }
 0x150   : > { %vm5694_vm14 = vmpackc.low %vm11380_vm13, %vm11379_vm10  ;;  %vm3769_vm9 = vcmp.eq.s32.totalorder %v7278_v25, %v9235_v30  ;;  %vm4533_vm1 = vcmp.eq.s32.totalorder %v7275_v22, %v9256_v47  ;;  %v649_v0 = vadd.f32 %v633_v3, %v469_v62  ;;  %v1234_v61 = vrot.slane %v1154_v39, %v7141_v9  ;;  %5693 = vmatmul.mubr.msk.bf16.gmra.mrb[4].mxu0 %vm9552_vm5, %v7076_v58 }
 0x151   : > { %vm11381_vm0 = vcmp.eq.s32.totalorder %v7275_v22, %v9164_v1  ;;  %vm11382_vm11 = vcmp.eq.s32.totalorder %v7278_v25, %v9164_v1  ;;  %vm4516_vm10 = vcmp.eq.s32.totalorder %v7264_v18, %v9481_v32  ;;  %vm4524_vm7 = vcmp.eq.s32.totalorder %v7267_v19, %v9481_v32  ;;  %5949 = vmatmul.mubr.msk.bf16.gmra.mrb[4].mxu1 %vm9571_vm15, %v7076_v58  ;;  %vm6094_vm5 = vmpackc.low %vm3769_vm9, %vm3761_vm2 }
 0x152   : > { %vm5950_vm13 = vmpackc.low %vm11382_vm11, %vm11381_vm0  ;;  %v1394_v63 = vrot.slane %v1314_v55, %v7154_v14  ;;  %v1570_v59 = vrot.slane %v1490_v43, %v7159_v17  ;;  %5695 = vmatprep.mubr.msk.bf16.mxu0 %vm5694_vm14, %v7076_v58  ;;  %vm4541_vm0 = vcmp.eq.s32.totalorder %v7278_v25, %v9256_v47  ;;  %v9620_v35 = vrot.slane %v1856_v29, %v7141_v9 }
 0x153   : > { %vm6092_vm11 = vmpackc.low %vm3752_vm4, %vm3744_vm3  ;;  %v829_v2 = vadd.f32 %v813_v42, %v649_v0  ;;  %5951 = vmatprep.mubr.msk.bf16.mxu1 %vm5950_vm13, %v7076_v58  ;;  %vm1974_vm3 = vcmp.eq.s32.totalorder %v11221_v51, %v9269_v44  ;;  %v1265_v45 = vmul.f32 %v1234_v61, %v7261_v16  ;;  %vm3777_vm4 = vcmp.eq.s32.totalorder %v11221_v51, %v9235_v30 }
 0x154   : > { %6093 = vmatpush1.bf16.xpose.msk.msra.mxu0 %vm6092_vm11, %v7076_v58  ;;  %v1425_v13 = vmul.f32 %v1394_v63, %v7313_v23  ;;  %v1601_v37 = vmul.f32 %v1570_v59, %v7272_v21  ;;  %v7024_v26 = vpop.eup %7023  ;;  %vm6348_vm2 = vmpackc.low %vm4524_vm7, %vm4516_vm10  ;;  %vm3785_vm14 = vcmp.eq.s32.totalorder %v11222_v52, %v9235_v30  ;;  %v1071_v27 = vshra.s32 %v9271_v36, 6 }
 0x155   : > { %6095 = vmatprep.subr.msk.bf16.mxu0 %vm6094_vm5, %v7076_v58  ;;  %v9654_v15 = vadd.f32 %v7330_v28, %v829_v2  ;;  %6349 = vmatpush1.bf16.xpose.msk.msra.mxu1 %vm6348_vm2, %v7076_v58  ;;  %vm6350_vm7 = vmpackc.low %vm4541_vm0, %vm4533_vm1  ;;  %vm4549_vm10 = vcmp.eq.s32.totalorder %v11221_v51, %v9256_v47  ;;  %vm4557_vm11 = vcmp.eq.s32.totalorder %v11222_v52, %v9256_v47 }
 0x156   : > { %v942_v36 = vmul.f32 %v7024_v26, %v9439_v60  ;;  %v1441_v40 = vadd.f32 %v1425_v13, %v1265_v45  ;;  %6351 = vmatprep.subr.msk.bf16.mxu1 %vm6350_vm7, %v7076_v58  ;;  %vm9675_vm5 = vmpackc.low %vm1966_vm12, %vm1958_vm8  ;;  %vm3760_vm1 = vcmp.eq.s32.totalorder %v7275_v22, %v9399_v56  ;;  %vm3768_vm0 = vcmp.eq.s32.totalorder %v7278_v25, %v9399_v56 }
 0x157   : > { %v898_v60 = vrot.slane %v9654_v15, %v7159_v17  ;;  %vm11385_vm8 = vcmp.eq.s32.totalorder %v7278_v25, %v9291_v34  ;;  %vm4245_vm13 = vcmp.eq.s32.totalorder %v7132_v6, %v9620_v35  ;;  %vm4532_vm7 = vcmp.eq.s32.totalorder %v7275_v22, %v9481_v32 }
 0x158   : > { %vm9700_vm12 = vmpackc.low %vm11385_vm8, %vm2730_vm6  ;;  %v6843_v11 = vround.rtne.f32 %v942_v36  ;;  %v1617_v54 = vadd.f32 %v1601_v37, %v1441_v40  ;;  %vm11388_vm6 = vcmp.eq.s32.totalorder %v11221_v51, %v9060_v38  ;;  %vm11389_vm8 = vcmp.eq.s32.totalorder %v11222_v52, %v9060_v38  ;;  %5697 = vmatmul.mubr.msk.bf16.gmra.mrb[8].mxu0 %vm9675_vm5, %v7076_v58 }
 0x159   : > { %vm5698_vm15 = vmpackc.low %vm11389_vm8, %vm11388_vm6  ;;  %vm4540_vm2 = vcmp.eq.s32.totalorder %v7278_v25, %v9481_v32  ;;  %v9723_v31 = vrot.slane %v1071_v27, %v7141_v9  ;;  %7027 = vrcp.f32 %v898_v60  ;;  %v7026_v5 = vpop.eup %7025  ;;  %vm11390_vm9 = vcmp.eq.s32.totalorder %v11221_v51, %v9164_v1  ;;  %5953 = vmatmul.mubr.msk.bf16.gmra.mrb[8].mxu1 %vm9700_vm12, %v7076_v58 }
 0x15a   : > { %vm11391_vm6 = vcmp.eq.s32.totalorder %v11222_v52, %v9164_v1  ;;  %v978_v38 = vmul.f32 64.0, %v6843_v11  ;;  %v1010_v41 = vrot.slane %v6843_v11, 1  ;;  %v9735_v48 = vadd.f32 %v1617_v54, %v7330_v28  ;;  %5699 = vmatprep.mubr.msk.bf16.mxu0 %vm5698_vm15, %v7076_v58  ;;  %vm6098_vm15 = vmpackc.low %vm3785_vm14, %vm3777_vm4 }
 0x15b   : > { %vm5954_vm8 = vmpackc.low %vm11391_vm6, %vm11390_vm9  ;;  %v370_v29 = vrot.slane %v9692_v50, %v7135_v7  ;;  %v1726_v1 = vmul.f32 %v7026_v5, %v9499_v49  ;;  %v534_v57 = vrot.slane %v9692_v50, %v7144_v10  ;;  %v714_v62 = vrot.slane %v9692_v50, %v7150_v12 }
 0x15c   : > { %vm6096_vm9 = vmpackc.low %vm3768_vm0, %vm3760_vm1  ;;  %5955 = vmatprep.mubr.msk.bf16.mxu1 %vm5954_vm8, %v7076_v58  ;;  %v1042_v3 = vadd.f32 %v1010_v41, %v978_v38  ;;  %v1855_v49 = vshra.s32 %v9413_v4, 6  ;;  %v1682_v42 = vrot.slane %v9735_v48, %v7159_v17  ;;  %v1166_v4 = vrot.slane %v9742_v46, %v7135_v7 }
 0x15d   : > { %6097 = vmatpush1.bf16.xpose.msk.msra.mxu0 %vm6096_vm9, %v7076_v58  ;;  %v450_v39 = vrot.slane %v370_v29, %v7141_v9  ;;  %vm6352_vm5 = vmpackc.low %vm4540_vm2, %vm4532_vm7  ;;  %v6891_v53 = vround.rtne.f32 %v1726_v1  ;;  %v614_v30 = vrot.slane %v534_v57, %v7154_v14  ;;  %v794_v55 = vrot.slane %v714_v62, %v7159_v17 }
 0x15e   : > { %6099 = vmatprep.subr.msk.bf16.mxu0 %vm6098_vm15, %v7076_v58  ;;  %6353 = vmatpush1.bf16.xpose.msk.msra.mxu1 %vm6352_vm5, %v7076_v58  ;;  %vm6354_vm4 = vmpackc.low %vm4557_vm11, %vm4549_vm10  ;;  %v6870_v43 = vtrunc.f32 %v1042_v3  ;;  %7029 = vrcp.f32 %v1682_v42  ;;  %v1326_v61 = vrot.slane %v9742_v46, %v7144_v10  ;;  %vm11392_vm14 = vcmp.eq.s32.totalorder %v11222_v52, %v9269_v44 }
 0x15f   : > { %v472_v0 = vmul.f32 %v450_v39, %v7261_v16  ;;  %6355 = vmatprep.subr.msk.bf16.mxu1 %vm6354_vm4, %v7076_v58  ;;  %vm9799_vm1 = vmpackc.low %vm11392_vm14, %vm1974_vm3  ;;  %v1762_v47 = vmul.f32 64.0, %v6891_v53  ;;  %v1794_v59 = vrot.slane %v6891_v53, 1  ;;  %v636_v2 = vmul.f32 %v614_v30, %v7313_v23 }
 0x160   : > { %v816_v45 = vmul.f32 %v794_v55, %v7272_v21  ;;  %vm11395_vm10 = vcmp.eq.s32.totalorder %v11221_v51, %v9291_v34  ;;  %vm11396_vm11 = vcmp.eq.s32.totalorder %v11222_v52, %v9291_v34  ;;  %v9815_v44 = vcvt.f32.s32 %v6870_v43  ;;  %5701 = vmatmul.mubr.msk.bf16.gmra.mrb[12].mxu0 %vm9799_vm1, %v7076_v58 }
 0x161   : > { %vm9811_vm0 = vmpackc.low %vm11396_vm11, %vm11395_vm10  ;;  %vm3489_vm3 = vcmp.eq.s32.totalorder %v7264_v18, %v9525_v33  ;;  %v1246_v37 = vrot.slane %v1166_v4, %v7141_v9  ;;  %v1406_v26 = vrot.slane %v1326_v61, %v7154_v14  ;;  %v1502_v27 = vrot.slane %v9742_v46, %v7150_v12 }
 0x162   : > { %vm11399_vm2 = vcmp.eq.s32.totalorder %v11221_v51, %v9399_v56  ;;  %vm11400_vm7 = vcmp.eq.s32.totalorder %v11222_v52, %v9399_v56  ;;  %v1826_v36 = vadd.f32 %v1794_v59, %v1762_v47  ;;  %v9834_v40 = vrot.slane %v1855_v49, %v7141_v9  ;;  %5957 = vmatmul.mubr.msk.bf16.gmra.mrb[12].mxu1 %vm9811_vm0, %v7076_v58 }
 0x163   : > { %vm9829_vm12 = vmpackc.low %vm11400_vm7, %vm11399_vm2  ;;  %vm3497_vm6 = vcmp.eq.s32.totalorder %v7267_v19, %v9525_v33  ;;  %v652_v20 = vadd.f32 %v636_v2, %v472_v0  ;;  %vm11403_vm8 = vcmp.eq.s32.totalorder %v7132_v6, %v9525_v33  ;;  %vm11404_vm9 = vcmp.eq.s32.totalorder %v7252_v8, %v9525_v33  ;;  %v7028_v24 = vpop.eup %7027 }
 0x164   : > { %vm6102_vm15 = vmpackc.low %vm11404_vm9, %vm11403_vm8  ;;  %vm4548_vm5 = vcmp.eq.s32.totalorder %v11221_v51, %v9481_v32  ;;  %vm4556_vm4 = vcmp.eq.s32.totalorder %v11222_v52, %v9481_v32  ;;  %v1090_v56 = vand.u32 63, %v9815_v44  ;;  %v1428_v60 = vmul.f32 %v1406_v26, %v7313_v23 }
 0x165   : > { %6103 = vmatprep.mubr.msk.bf16.mxu0 %vm6102_vm15, %v7076_v58  ;;  %vm11405_vm14 = vcmp.eq.s32.totalorder %v7252_v8, %v9620_v35  ;;  %v6918_v11 = vtrunc.f32 %v1826_v36  ;;  %v832_v54 = vadd.f32 %v816_v45, %v652_v20  ;;  %v1268_v5 = vmul.f32 %v1246_v37, %v7261_v16  ;;  %6101 = vmatpush1.bf16.xpose.msk.msra.mxu0 %vm9829_vm12, %v7076_v58 }
 0x166   : > { %vm6358_vm1 = vmpackc.low %vm11405_vm14, %vm4245_vm13  ;;  %v1582_v38 = vrot.slane %v1502_v27, %v7159_v17  ;;  %v9870_v41 = vrot.slane %v1090_v56, %v7141_v9  ;;  %vm3472_vm10 = vcmp.eq.s32.totalorder %v7132_v6, %v9723_v31  ;;  %v940_v29 = vmul.f32 %v7028_v24, %v9654_v15 }
 0x167   : > { %6359 = vmatprep.mubr.msk.bf16.mxu1 %vm6358_vm1, %v7076_v58  ;;  %vm6356_vm13 = vmpackc.low %vm4556_vm4, %vm4548_vm5  ;;  %v9881_v1 = vcvt.f32.s32 %v6918_v11  ;;  %vm3480_vm11 = vcmp.eq.s32.totalorder %v7252_v8, %v9723_v31  ;;  %v9886_v57 = vadd.f32 %v7330_v28, %v832_v54  ;;  %v1444_v62 = vadd.f32 %v1428_v60, %v1268_v5 }
 0x168   : > { %6357 = vmatpush1.bf16.xpose.msk.msra.mxu1 %vm6356_vm13, %v7076_v58  ;;  %vm3731_vm0 = vcmp.eq.s32.totalorder %v7132_v6, %v9870_v41  ;;  %vm3739_vm2 = vcmp.eq.s32.totalorder %v7252_v8, %v9870_v41  ;;  %v6842_v15 = vround.rtne.f32 %v940_v29  ;;  %v1604_v32 = vmul.f32 %v1582_v38, %v7272_v21  ;;  %v7030_v49 = vpop.eup %7029  ;;  %vm6104_vm4 = vmpackc.low %vm3480_vm11, %vm3472_vm10 }
 0x169   : > { %vm6118_vm7 = vmpackc.low %vm3739_vm2, %vm3731_vm0  ;;  %v1874_v3 = vand.u32 63, %v9881_v1  ;;  %vm4244_vm12 = vcmp.eq.s32.totalorder %v7132_v6, %v9834_v40  ;;  %vm4252_vm8 = vcmp.eq.s32.totalorder %v7252_v8, %v9834_v40  ;;  %vm4261_vm9 = vcmp.eq.s32.totalorder %v7264_v18, %v9620_v35 }
 0x16a   : > { %6119 = vmatprep.subr.msk.bf16.mxu0 %vm6118_vm7, %v7076_v58  ;;  %v977_v42 = vmul.f32 64.0, %v6842_v15  ;;  %v1009_v39 = vrot.slane %v6842_v15, 1  ;;  %vm4269_vm15 = vcmp.eq.s32.totalorder %v7267_v19, %v9620_v35  ;;  %vm3488_vm5 = vcmp.eq.s32.totalorder %v7264_v18, %v9723_v31  ;;  %vm9920_vm13 = vmpackc.low %vm4252_vm8, %vm4244_vm12 }
 0x16b   : > { %v9907_v53 = vrot.slane %v1874_v3, %v7141_v9  ;;  %v1724_v30 = vmul.f32 %v7030_v49, %v9735_v48  ;;  %vm3496_vm14 = vcmp.eq.s32.totalorder %v7267_v19, %v9723_v31  ;;  %vm4260_vm1 = vcmp.eq.s32.totalorder %v7264_v18, %v9834_v40  ;;  %vm6106_vm2 = vmpackc.low %vm3497_vm6, %vm3489_vm3 }
 0x16c   : > { %v1041_v4 = vadd.f32 %v1009_v39, %v977_v42  ;;  %v910_v43 = vrot.slane %v9886_v57, %v7159_v17  ;;  %v1620_v0 = vadd.f32 %v1604_v32, %v1444_v62  ;;  %6105 = vmatmul.mubr.msk.bf16.vlgmr.msra.gmra.mrb[16].mxu0 %vm6104_vm4, %v7076_v58  ;;  %vm3505_vm7 = vcmp.eq.s32.totalorder %v7275_v22, %v9525_v33  ;;  %vm6362_vm3 = vmpackc.low %vm4269_vm15, %vm4261_vm9 }
 0x16d   : > { %vm4503_vm10 = vcmp.eq.s32.totalorder %v7132_v6, %v9907_v53  ;;  %vm4511_vm11 = vcmp.eq.s32.totalorder %v7252_v8, %v9907_v53  ;;  %v6890_v48 = vround.rtne.f32 %v1724_v30  ;;  %6107 = vmatprep.mubr.msk.bf16.mxu0 %vm6106_vm2, %v7076_v58  ;;  %vm3513_vm8 = vcmp.eq.s32.totalorder %v7278_v25, %v9525_v33  ;;  %vm6108_vm2 = vmpackc.low %vm3496_vm14, %vm3488_vm5 }
 0x16e   : > { %vm6374_vm12 = vmpackc.low %vm4511_vm11, %vm4503_vm10  ;;  %v6868_v61 = vtrunc.f32 %v1041_v4  ;;  %vm4277_vm4 = vcmp.eq.s32.totalorder %v7275_v22, %v9620_v35  ;;  %vm4285_vm0 = vcmp.eq.s32.totalorder %v7278_v25, %v9620_v35  ;;  %vm3504_vm6 = vcmp.eq.s32.totalorder %v7275_v22, %v9723_v31 }
 0x16f   : > { %6375 = vmatprep.subr.msk.bf16.mxu1 %vm6374_vm12, %v7076_v58  ;;  %6361 = vmatmul.mubr.msk.bf16.vlgmr.msra.gmra.mrb[16].mxu1 %vm9920_vm13, %v7076_v58  ;;  %v1761_v63 = vmul.f32 64.0, %v6890_v48  ;;  %v1793_v47 = vrot.slane %v6890_v48, 1  ;;  %v530_v59 = vrot.slane %v9692_v50, %v7154_v14  ;;  %7031 = vrcp.f32 %v910_v43 }
 0x170   : > { %v9962_v2 = vcvt.f32.s32 %v6868_v61  ;;  %6363 = vmatprep.mubr.msk.bf16.mxu1 %vm6362_vm3, %v7076_v58  ;;  %v9966_v45 = vadd.f32 %v1620_v0, %v7330_v28  ;;  %v366_v13 = vrot.slane %v9692_v50, %v7141_v9  ;;  %vm3512_vm9 = vcmp.eq.s32.totalorder %v7278_v25, %v9723_v31 }
 0x171   : > { %v1825_v37 = vadd.f32 %v1793_v47, %v1761_v63  ;;  %vm4276_vm15 = vcmp.eq.s32.totalorder %v7275_v22, %v9834_v40  ;;  %vm4284_vm13 = vcmp.eq.s32.totalorder %v7278_v25, %v9834_v40  ;;  %v1074_v36 = vshra.s32 %v9815_v44, 6 }
 0x172   : > { %v1089_v26 = vand.u32 63, %v9962_v2  ;;  %v1694_v27 = vrot.slane %v9966_v45, %v7159_v17  ;;  %v610_v20 = vrot.slane %v530_v59, %v7154_v14  ;;  %v710_v56 = vrot.slane %v9692_v50, %v7159_v17 }
 0x173   : > { %v6916_v34 = vtrunc.f32 %v1825_v37  ;;  %vm11408_vm12 = vcmp.eq.s32.totalorder %v7267_v19, %v9834_v40  ;;  %v446_v44 = vrot.slane %v366_v13, %v7141_v9  ;;  %vm3747_vm14 = vcmp.eq.s32.totalorder %v7264_v18, %v9870_v41 }
 0x174   : > { %v9994_v60 = vrot.slane %v1089_v26, %v7141_v9  ;;  %vm10002_vm3 = vmpackc.low %vm11408_vm12, %vm4260_vm1  ;;  %7033 = vrcp.f32 %v1694_v27  ;;  %vm3755_vm11 = vcmp.eq.s32.totalorder %v7267_v19, %v9870_v41  ;;  %6109 = vmatmul.mubr.msk.bf16.gmra.mrb[20].mxu0 %vm6108_vm2, %v7076_v58  ;;  %v635_v11 = vmul.f32 %v610_v20, %v7313_v23 }
 0x175   : > { %v10009_v50 = vcvt.f32.s32 %v6916_v34  ;;  %vm6110_vm1 = vmpackc.low %vm3513_vm8, %vm3505_vm7  ;;  %v790_v54 = vrot.slane %v710_v56, %v7159_v17  ;;  %v10050_v38 = vrot.slane %v1074_v36, %v7141_v9  ;;  %v471_v29 = vmul.f32 %v446_v44, %v7261_v16 }
 0x176   : > { %vm3730_vm5 = vcmp.eq.s32.totalorder %v7132_v6, %v9994_v60  ;;  %vm3738_vm10 = vcmp.eq.s32.totalorder %v7252_v8, %v9994_v60  ;;  %6111 = vmatprep.mubr.msk.bf16.mxu0 %vm6110_vm1, %v7076_v58  ;;  %vm6366_vm2 = vmpackc.low %vm4285_vm0, %vm4277_vm4  ;;  %vm4519_vm1 = vcmp.eq.s32.totalorder %v7264_v18, %v9907_v53  ;;  %v1858_v32 = vshra.s32 %v9881_v1, 6 }
 0x177   : > { %vm6120_vm12 = vmpackc.low %vm3738_vm10, %vm3730_vm5  ;;  %v1873_v5 = vand.u32 63, %v10009_v50  ;;  %6365 = vmatmul.mubr.msk.bf16.gmra.mrb[20].mxu1 %vm10002_vm3, %v7076_v58  ;;  %vm3763_vm3 = vcmp.eq.s32.totalorder %v7275_v22, %v9870_v41  ;;  %vm3771_vm5 = vcmp.eq.s32.totalorder %v7278_v25, %v9870_v41  ;;  %v651_v42 = vadd.f32 %v635_v11, %v471_v29 }
 0x178   : > { %6121 = vmatpush1.bf16.xpose.msk.msra.mxu0 %vm6120_vm12, %v7076_v58  ;;  %vm6122_vm10 = vmpackc.low %vm3755_vm11, %vm3747_vm14  ;;  %6367 = vmatprep.mubr.msk.bf16.mxu1 %vm6366_vm2, %v7076_v58  ;;  %vm4527_vm11 = vcmp.eq.s32.totalorder %v7267_v19, %v9907_v53  ;;  %v815_v39 = vmul.f32 %v790_v54, %v7272_v21  ;;  %v1162_v30 = vrot.slane %v9742_v46, %v7141_v9 }
 0x179   : > { %v10066_v62 = vrot.slane %v1873_v5, %v7141_v9  ;;  %6123 = vmatprep.subr.msk.bf16.mxu0 %vm6122_vm10, %v7076_v58  ;;  %vm10079_vm14 = vmpackc.low %vm3512_vm9, %vm3504_vm6  ;;  %v7032_v3 = vpop.eup %7031  ;;  %v1322_v1 = vrot.slane %v9742_v46, %v7154_v14  ;;  %vm3475_vm10 = vcmp.eq.s32.totalorder %v7132_v6, %v10050_v38  ;;  %v1498_v4 = vrot.slane %v9742_v46, %v7159_v17 }
 0x17a   : > { %vm10090_vm12 = vmpackc.low %vm4284_vm13, %vm4276_vm15  ;;  %vm11415_vm15 = vcmp.eq.s32.totalorder %v11221_v51, %v9525_v33  ;;  %vm11416_vm13 = vcmp.eq.s32.totalorder %v11222_v52, %v9525_v33  ;;  %vm3746_vm0 = vcmp.eq.s32.totalorder %v7264_v18, %v9994_v60  ;;  %vm3754_vm8 = vcmp.eq.s32.totalorder %v7267_v19, %v9994_v60 }
 0x17b   : > { %vm4502_vm6 = vcmp.eq.s32.totalorder %v7132_v6, %v10066_v62  ;;  %vm4510_vm9 = vcmp.eq.s32.totalorder %v7252_v8, %v10066_v62  ;;  %vm10109_vm2 = vmpackc.low %vm11416_vm13, %vm11415_vm15  ;;  %vm4535_vm7 = vcmp.eq.s32.totalorder %v7275_v22, %v9907_v53  ;;  %vm3483_vm15 = vcmp.eq.s32.totalorder %v7252_v8, %v10050_v38 }
 0x17c   : > { %vm6376_vm4 = vmpackc.low %vm4510_vm9, %vm4502_vm6  ;;  %vm4518_vm9 = vcmp.eq.s32.totalorder %v7264_v18, %v10066_v62  ;;  %6113 = vmatmul.mubr.msk.bf16.gmra.mrb[24].mxu0 %vm10079_vm14, %v7076_v58  ;;  %v10138_v33 = vrot.slane %v1858_v32, %v7141_v9  ;;  %v946_v46 = vmul.f32 %v7032_v3, %v9886_v57  ;;  %v831_v0 = vadd.f32 %v815_v39, %v651_v42 }
 0x17d   : > { %6377 = vmatpush1.bf16.xpose.msk.msra.mxu1 %vm6376_vm4, %v7076_v58  ;;  %vm6378_vm6 = vmpackc.low %vm4527_vm11, %vm4519_vm1  ;;  %6115 = vmatprep.mubr.msk.bf16.mxu0 %vm10109_vm2, %v7076_v58  ;;  %vm11419_vm4 = vcmp.eq.s32.totalorder %v11221_v51, %v9620_v35  ;;  %vm11420_vm1 = vcmp.eq.s32.totalorder %v11222_v52, %v9620_v35  ;;  %v1242_v48 = vrot.slane %v1162_v30, %v7141_v9  ;;  %v1073_v32 = vshra.s32 %v9962_v2, 6  ;;  %v10288_v30 = vld [vmem:[%s11203_s0 + $0x38] sm:$0x77] }
 0x17e   : > { %v7034_v43 = vpop.eup %7033  ;;  %6379 = vmatprep.subr.msk.bf16.mxu1 %vm6378_vm6, %v7076_v58  ;;  %vm6370_vm11 = vmpackc.low %vm11420_vm1, %vm11419_vm4  ;;  %v1402_v61 = vrot.slane %v1322_v1, %v7154_v14  ;;  %vm4526_vm13 = vcmp.eq.s32.totalorder %v7267_v19, %v10066_v62  ;;  %v6845_v35 = vround.rtne.f32 %v946_v46  ;;  %v1578_v63 = vrot.slane %v1498_v4, %v7159_v17 }
 0x17f   : > { %vm6124_vm14 = vmpackc.low %vm3754_vm8, %vm3746_vm0  ;;  %6369 = vmatmul.mubr.msk.bf16.gmra.mrb[24].mxu1 %vm10090_vm12, %v7076_v58  ;;  %v1730_v57 = vmul.f32 %v7034_v43, %v9966_v45  ;;  %v10175_v47 = vadd.f32 %v7330_v28, %v831_v0  ;;  %v1267_v59 = vmul.f32 %v1242_v48, %v7261_v16  ;;  %vm11421_vm0 = vcmp.eq.s32.totalorder %v11221_v51, %v9723_v31  ;;  %v10316_v0 = vld [vmem:[%s11204_s1 + $0x38] sm:$0x77] }
 0x180   : > { %6125 = vmatpush1.bf16.xpose.msk.msra.mxu0 %vm6124_vm14, %v7076_v58  ;;  %vm6126_vm8 = vmpackc.low %vm3771_vm5, %vm3763_vm3  ;;  %6371 = vmatprep.mubr.msk.bf16.mxu1 %vm6370_vm11, %v7076_v58  ;;  %v1427_v45 = vmul.f32 %v1402_v61, %v7313_v23  ;;  %vm11422_vm12 = vcmp.eq.s32.totalorder %v11222_v52, %v9723_v31  ;;  %v980_v37 = vmul.f32 64.0, %v6845_v35  ;;  %v1012_v26 = vrot.slane %v6845_v35, 1 }
 0x181   : > { %6127 = vmatprep.subr.msk.bf16.mxu0 %vm6126_vm8, %v7076_v58  ;;  %vm10186_vm2 = vmpackc.low %vm11422_vm12, %vm11421_vm0  ;;  %v6893_v27 = vround.rtne.f32 %v1730_v57  ;;  %v1603_v34 = vmul.f32 %v1578_v63, %v7272_v21  ;;  %vm4543_vm3 = vcmp.eq.s32.totalorder %v7278_v25, %v9907_v53  ;;  %vm11425_vm5 = vcmp.eq.s32.totalorder %v11221_v51, %v9834_v40 }
 0x182   : > { %vm11426_vm6 = vcmp.eq.s32.totalorder %v11222_v52, %v9834_v40  ;;  %vm4247_vm1 = vcmp.eq.s32.totalorder %v7132_v6, %v10138_v33  ;;  %v906_v36 = vrot.slane %v10175_v47, %v7159_v17  ;;  %v1443_v20 = vadd.f32 %v1427_v45, %v1267_v59  ;;  %vm10213_vm11 = vmpackc.low %vm3483_vm15, %vm3475_vm10 }
 0x183   : > { %vm10199_vm4 = vmpackc.low %vm11426_vm6, %vm11425_vm5  ;;  %vm4255_vm14 = vcmp.eq.s32.totalorder %v7252_v8, %v10138_v33  ;;  %v1044_v40 = vadd.f32 %v1012_v26, %v980_v37  ;;  %v1764_v24 = vmul.f32 64.0, %v6893_v27  ;;  %v1796_v44 = vrot.slane %v6893_v27, 1 }
 0x184   : > { %vm6380_vm8 = vmpackc.low %vm4526_vm13, %vm4518_vm9  ;;  %vm3762_vm0 = vcmp.eq.s32.totalorder %v7275_v22, %v9994_v60  ;;  %vm3770_vm10 = vcmp.eq.s32.totalorder %v7278_v25, %v9994_v60  ;;  %7035 = vrcp.f32 %v906_v36  ;;  %v1619_v11 = vadd.f32 %v1603_v34, %v1443_v20  ;;  %6117 = vmatmul.mubr.msk.bf16.gmra.mrb[28].mxu0 %vm10186_vm2, %v7076_v58 }
 0x185   : > { %6381 = vmatpush1.bf16.xpose.msk.msra.mxu1 %vm6380_vm8, %v7076_v58  ;;  %vm6382_vm15 = vmpackc.low %vm4543_vm3, %vm4535_vm7  ;;  %vm3779_vm9 = vcmp.eq.s32.totalorder %v11221_v51, %v9870_v41  ;;  %vm3787_vm13 = vcmp.eq.s32.totalorder %v11222_v52, %v9870_v41  ;;  %v6874_v54 = vtrunc.f32 %v1044_v40  ;;  %v1828_v5 = vadd.f32 %v1796_v44, %v1764_v24  ;;  %6135 = vmatprep.mubr.msk.bf16.mxu0 %vm10213_vm11, %v7076_v58 }
 0x186   : > { %6383 = vmatprep.subr.msk.bf16.mxu1 %vm6382_vm15, %v7076_v58  ;;  %vm6390_vm7 = vmpackc.low %vm4255_vm14, %vm4247_vm1  ;;  %v10254_v41 = vadd.f32 %v1619_v11, %v7330_v28  ;;  %vm4534_vm3 = vcmp.eq.s32.totalorder %v7275_v22, %v10066_v62  ;;  %vm4542_vm5 = vcmp.eq.s32.totalorder %v7278_v25, %v10066_v62  ;;  %vm4551_vm6 = vcmp.eq.s32.totalorder %v11221_v51, %v9907_v53 }
 0x187   : > { %vm6128_vm12 = vmpackc.low %vm3770_vm10, %vm3762_vm0  ;;  %6373 = vmatmul.mubr.msk.bf16.gmra.mrb[28].mxu1 %vm10199_vm4, %v7076_v58  ;;  %v10262_v29 = vcvt.f32.s32 %v6874_v54  ;;  %v6922_v15 = vtrunc.f32 %v1828_v5  ;;  %vm4559_vm4 = vcmp.eq.s32.totalorder %v11222_v52, %v9907_v53  ;;  %vm3778_vm11 = vcmp.eq.s32.totalorder %v11221_v51, %v9994_v60 }
 0x188   : > { %6129 = vmatpush1.bf16.xpose.msk.msra.mxu0 %vm6128_vm12, %v7076_v58  ;;  %vm6130_vm2 = vmpackc.low %vm3787_vm13, %vm3779_vm9  ;;  %6391 = vmatprep.mubr.msk.bf16.mxu1 %vm6390_vm7, %v7076_v58  ;;  %v1690_v3 = vrot.slane %v10254_v41, %v7159_v17  ;;  %vm3786_vm14 = vcmp.eq.s32.totalorder %v11222_v52, %v9994_v60  ;;  %v10295_v53 = vrot.slane %v1073_v32, %v7141_v9  ;;  %v1857_v1 = vshra.s32 %v10009_v50, 6 }
 0x189   : > { %6131 = vmatprep.subr.msk.bf16.mxu0 %vm6130_vm2, %v7076_v58  ;;  %v1092_v49 = vand.u32 63, %v10262_v29  ;;  %v10275_v42 = vcvt.f32.s32 %v6922_v15  ;;  %vm6384_vm1 = vmpackc.low %vm4542_vm5, %vm4534_vm3  ;;  %v378_v46 = vrot.slane %v10288_v30, %v7135_v7  ;;  %v542_v50 = vrot.slane %v10288_v30, %v7144_v10 }
 0x18a   : > { %7037 = vrcp.f32 %v1690_v3  ;;  %vm6386_vm8 = vmpackc.low %vm4559_vm4, %vm4551_vm6  ;;  %v722_v43 = vrot.slane %v10288_v30, %v7150_v12  ;;  %vm3491_vm9 = vcmp.eq.s32.totalorder %v7264_v18, %v10050_v38  ;;  %vm4550_vm13 = vcmp.eq.s32.totalorder %v11221_v51, %v10066_v62 }
 0x18b   : > { %v10282_v2 = vrot.slane %v1092_v49, %v7141_v9  ;;  %v1876_v39 = vand.u32 63, %v10275_v42  ;;  %vm6132_vm15 = vmpackc.low %vm3786_vm14, %vm3778_vm11  ;;  %vm3474_vm12 = vcmp.eq.s32.totalorder %v7132_v6, %v10295_v53  ;;  %v10330_v61 = vrot.slane %v1857_v1, %v7141_v9 }
 0x18c   : > { %vm3499_vm2 = vcmp.eq.s32.totalorder %v7267_v19, %v10050_v38  ;;  %vm4558_vm3 = vcmp.eq.s32.totalorder %v11222_v52, %v10066_v62  ;;  %vm4263_vm6 = vcmp.eq.s32.totalorder %v7264_v18, %v10138_v33  ;;  %vm4271_vm4 = vcmp.eq.s32.totalorder %v7267_v19, %v10138_v33 }
 0x18d   : > { %6385 = vmatpush1.bf16.xpose.msk.msra.mxu1 %vm6384_vm1, %v7076_v58  ;;  %vm3733_vm0 = vcmp.eq.s32.totalorder %v7132_v6, %v10282_v2  ;;  %vm3741_vm10 = vcmp.eq.s32.totalorder %v7252_v8, %v10282_v2  ;;  %v10304_v55 = vrot.slane %v1876_v39, %v7141_v9  ;;  %v1174_v35 = vrot.slane %v10316_v0, %v7135_v7 }
 0x18e   : > { %v7036_v4 = vpop.eup %7035  ;;  %6387 = vmatprep.subr.msk.bf16.mxu1 %vm6386_vm8, %v7076_v58  ;;  %vm6150_vm7 = vmpackc.low %vm3741_vm10, %vm3733_vm0  ;;  %v458_v57 = vrot.slane %v378_v46, %v7141_v9  ;;  %v622_v63 = vrot.slane %v542_v50, %v7154_v14  ;;  %vm3482_vm11 = vcmp.eq.s32.totalorder %v7252_v8, %v10295_v53  ;;  %vm3490_vm14 = vcmp.eq.s32.totalorder %v7264_v18, %v10295_v53 }
 0x18f   : > { %v944_v48 = vmul.f32 %v7036_v4, %v10175_v47  ;;  %vm4505_vm5 = vcmp.eq.s32.totalorder %v7132_v6, %v10304_v55  ;;  %vm4513_vm1 = vcmp.eq.s32.totalorder %v7252_v8, %v10304_v55  ;;  %v802_v47 = vrot.slane %v722_v43, %v7159_v17  ;;  %vm6388_vm8 = vmpackc.low %vm4558_vm3, %vm4550_vm13 }
 0x190   : > { %6133 = vmatpush1.bf16.xpose.msk.msra.mxu0 %vm6132_vm15, %v7076_v58  ;;  %vm4246_vm0 = vcmp.eq.s32.totalorder %v7132_v6, %v10330_v61  ;;  %vm4254_vm10 = vcmp.eq.s32.totalorder %v7252_v8, %v10330_v61  ;;  %v474_v7 = vmul.f32 %v458_v57, %v7261_v16  ;;  %v638_v37 = vmul.f32 %v622_v63, %v7313_v23  ;;  %vm6406_vm15 = vmpackc.low %vm4513_vm1, %vm4505_vm5 }
 0x191   : > { %6151 = vmatprep.subr.msk.bf16.mxu0 %vm6150_vm7, %v7076_v58  ;;  %v6844_v60 = vround.rtne.f32 %v944_v48  ;;  %vm3498_vm13 = vcmp.eq.s32.totalorder %v7267_v19, %v10295_v53  ;;  %v818_v27 = vmul.f32 %v802_v47, %v7272_v21  ;;  %vm6136_vm7 = vmpackc.low %vm3482_vm11, %vm3474_vm12  ;;  %v1254_v31 = vrot.slane %v1174_v35, %v7141_v9 }
 0x192   : > { %v654_v34 = vadd.f32 %v638_v37, %v474_v7  ;;  %v1334_v36 = vrot.slane %v10316_v0, %v7144_v10  ;;  %v1510_v20 = vrot.slane %v10316_v0, %v7150_v12  ;;  %vm6138_vm3 = vmpackc.low %vm3499_vm2, %vm3491_vm9  ;;  %vm4262_vm12 = vcmp.eq.s32.totalorder %v7264_v18, %v10330_v61 }
 0x193   : > { %v979_v59 = vmul.f32 64.0, %v6844_v60  ;;  %v1011_v45 = vrot.slane %v6844_v60, 1  ;;  %vm4270_vm5 = vcmp.eq.s32.totalorder %v7267_v19, %v10330_v61  ;;  %vm3507_vm1 = vcmp.eq.s32.totalorder %v7275_v22, %v10050_v38  ;;  %vm6392_vm9 = vmpackc.low %vm4254_vm10, %vm4246_vm0 }
 0x194   : > { %v7038_v13 = vpop.eup %7037  ;;  %vm3515_vm11 = vcmp.eq.s32.totalorder %v7278_v25, %v10050_v38  ;;  %v834_v10 = vadd.f32 %v818_v27, %v654_v34  ;;  %v1414_v12 = vrot.slane %v1334_v36, %v7154_v14  ;;  %v1590_v24 = vrot.slane %v1510_v20, %v7159_v17 }
 0x195   : > { %6389 = vmatpush1.bf16.xpose.msk.msra.mxu1 %vm6388_vm8, %v7076_v58  ;;  %v1043_v62 = vadd.f32 %v1011_v45, %v979_v59  ;;  %v1728_v26 = vmul.f32 %v7038_v13, %v10254_v41  ;;  %v374_v44 = vrot.slane %v10288_v30, %v7141_v9  ;;  %v538_v41 = vrot.slane %v10288_v30, %v7154_v14  ;;  %vm6394_vm8 = vmpackc.low %vm4271_vm4, %vm4263_vm6 }
 0x196   : > { %6407 = vmatprep.subr.msk.bf16.mxu1 %vm6406_vm15, %v7076_v58  ;;  %v10414_v15 = vadd.f32 %v7330_v28, %v834_v10  ;;  %v1270_v32 = vmul.f32 %v1254_v31, %v7261_v16  ;;  %v1430_v3 = vmul.f32 %v1414_v12, %v7313_v23  ;;  %v1606_v49 = vmul.f32 %v1590_v24, %v7272_v21  ;;  %vm6140_vm4 = vmpackc.low %vm3498_vm13, %vm3490_vm14 }
 0x197   : > { %6137 = vmatmul.mubr.msk.bf16.vlgmr.msra.gmra.mrb[16].mxu0 %vm6136_vm7, %v7076_v58  ;;  %v6872_v56 = vtrunc.f32 %v1043_v62  ;;  %v6892_v40 = vround.rtne.f32 %v1728_v26  ;;  %vm4279_vm2 = vcmp.eq.s32.totalorder %v7275_v22, %v10138_v33  ;;  %v618_v4 = vrot.slane %v538_v41, %v7154_v14  ;;  %vm6142_vm14 = vmpackc.low %vm3515_vm11, %vm3507_vm1 }
 0x198   : > { %6139 = vmatprep.mubr.msk.bf16.mxu0 %vm6138_vm3, %v7076_v58  ;;  %v918_v46 = vrot.slane %v10414_v15, %v7159_v17  ;;  %v1446_v50 = vadd.f32 %v1430_v3, %v1270_v32  ;;  %v454_v43 = vrot.slane %v374_v44, %v7141_v9  ;;  %v718_v48 = vrot.slane %v10288_v30, %v7159_v17 }
 0x199   : > { %v10409_v11 = vcvt.f32.s32 %v6872_v56  ;;  %v1763_v54 = vmul.f32 64.0, %v6892_v40  ;;  %v1795_v5 = vrot.slane %v6892_v40, 1  ;;  %vm3749_vm0 = vcmp.eq.s32.totalorder %v7264_v18, %v10282_v2 }
 0x19a   : > { %vm3757_vm6 = vcmp.eq.s32.totalorder %v7267_v19, %v10282_v2  ;;  %7039 = vrcp.f32 %v918_v46  ;;  %v1622_v30 = vadd.f32 %v1606_v49, %v1446_v50  ;;  %v637_v57 = vmul.f32 %v618_v4, %v7313_v23 }
 0x19b   : > { %v1091_v39 = vand.u32 63, %v10409_v11  ;;  %v1827_v1 = vadd.f32 %v1795_v5, %v1763_v54  ;;  %v798_v63 = vrot.slane %v718_v48, %v7159_v17  ;;  %vm4287_vm13 = vcmp.eq.s32.totalorder %v7278_v25, %v10138_v33  ;;  %vm6154_vm1 = vmpackc.low %vm3757_vm6, %vm3749_vm0 }
 0x19c   : > { %6393 = vmatmul.mubr.msk.bf16.vlgmr.msra.gmra.mrb[16].mxu1 %vm6392_vm9, %v7076_v58  ;;  %vm3506_vm3 = vcmp.eq.s32.totalorder %v7275_v22, %v10295_v53  ;;  %vm3514_vm9 = vcmp.eq.s32.totalorder %v7278_v25, %v10295_v53  ;;  %v473_v59 = vmul.f32 %v454_v43, %v7261_v16  ;;  %v10493_v13 = vadd.f32 %v1622_v30, %v7330_v28 }
 0x19d   : > { %v10442_v60 = vrot.slane %v1091_v39, %v7141_v9  ;;  %6395 = vmatprep.mubr.msk.bf16.mxu1 %vm6394_vm8, %v7076_v58  ;;  %v6920_v35 = vtrunc.f32 %v1827_v1  ;;  %vm4278_vm8 = vcmp.eq.s32.totalorder %v7275_v22, %v10330_v61  ;;  %vm3531_vm0 = vcmp.eq.s32.totalorder %v11222_v52, %v10050_v38 }
 0x19e   : > { %v1076_v7 = vshra.s32 %v10262_v29, 6  ;;  %v653_v37 = vadd.f32 %v637_v57, %v473_v59  ;;  %v817_v62 = vmul.f32 %v798_v63, %v7272_v21  ;;  %vm4521_vm6 = vcmp.eq.s32.totalorder %v7264_v18, %v10304_v55 }
 0x19f   : > { %vm3732_vm10 = vcmp.eq.s32.totalorder %v7132_v6, %v10442_v60  ;;  %vm3740_vm15 = vcmp.eq.s32.totalorder %v7252_v8, %v10442_v60  ;;  %v10461_v47 = vcvt.f32.s32 %v6920_v35  ;;  %6141 = vmatmul.mubr.msk.bf16.gmra.mrb[20].mxu0 %vm6140_vm4, %v7076_v58  ;;  %vm3523_vm4 = vcmp.eq.s32.totalorder %v11221_v51, %v10050_v38 }
 0x1a0   : > { %vm6152_vm7 = vmpackc.low %vm3740_vm15, %vm3732_vm10  ;;  %6143 = vmatprep.mubr.msk.bf16.mxu0 %vm6142_vm14, %v7076_v58  ;;  %vm4529_vm15 = vcmp.eq.s32.totalorder %v7267_v19, %v10304_v55  ;;  %v1702_v29 = vrot.slane %v10493_v13, %v7159_v17  ;;  %v833_v34 = vadd.f32 %v817_v62, %v653_v37  ;;  %v1170_v31 = vrot.slane %v10316_v0, %v7141_v9 }
 0x1a1   : > { %6153 = vmatpush1.bf16.xpose.msk.msra.mxu0 %vm6152_vm7, %v7076_v58  ;;  %v1875_v45 = vand.u32 63, %v10461_v47  ;;  %vm6396_vm10 = vmpackc.low %vm4270_vm5, %vm4262_vm12  ;;  %v1330_v36 = vrot.slane %v10316_v0, %v7154_v14  ;;  %v1506_v20 = vrot.slane %v10316_v0, %v7159_v17  ;;  %vm3756_vm7 = vcmp.eq.s32.totalorder %v7267_v19, %v10442_v60 }
 0x1a2   : > { %6155 = vmatprep.subr.msk.bf16.mxu0 %vm6154_vm1, %v7076_v58  ;;  %vm6398_vm12 = vmpackc.low %vm4287_vm13, %vm4279_vm2  ;;  %vm3748_vm13 = vcmp.eq.s32.totalorder %v7264_v18, %v10442_v60  ;;  %vm3765_vm1 = vcmp.eq.s32.totalorder %v7275_v22, %v10282_v2  ;;  %vm4303_vm11 = vcmp.eq.s32.totalorder %v11222_v52, %v10138_v33  ;;  %v10578_v38 = vrot.slane %v1076_v7, %v7141_v9 }
 0x1a3   : > { %v10507_v26 = vrot.slane %v1875_v45, %v7141_v9  ;;  %vm10528_vm5 = vmpackc.low %vm3514_vm9, %vm3506_vm3  ;;  %7041 = vrcp.f32 %v1702_v29  ;;  %v10581_v56 = vadd.f32 %v7330_v28, %v833_v34  ;;  %v1860_v10 = vshra.s32 %v10275_v42, 6 }
 0x1a4   : > { %6397 = vmatmul.mubr.msk.bf16.gmra.mrb[20].mxu1 %vm6396_vm10, %v7076_v58  ;;  %vm10553_vm3 = vmpackc.low %vm3531_vm0, %vm3523_vm4  ;;  %vm3773_vm10 = vcmp.eq.s32.totalorder %v7278_v25, %v10282_v2  ;;  %vm3522_vm0 = vcmp.eq.s32.totalorder %v11221_v51, %v10295_v53  ;;  %v7040_v40 = vpop.eup %7039  ;;  %v1250_v12 = vrot.slane %v1170_v31, %v7141_v9  ;;  %v1410_v24 = vrot.slane %v1330_v36, %v7154_v14 }
 0x1a5   : > { %vm4504_vm2 = vcmp.eq.s32.totalorder %v7132_v6, %v10507_v26  ;;  %vm4512_vm14 = vcmp.eq.s32.totalorder %v7252_v8, %v10507_v26  ;;  %6399 = vmatprep.mubr.msk.bf16.mxu1 %vm6398_vm12, %v7076_v58  ;;  %vm4295_vm12 = vcmp.eq.s32.totalorder %v11221_v51, %v10138_v33  ;;  %vm6410_vm4 = vmpackc.low %vm4529_vm15, %vm4521_vm6  ;;  %v1586_v44 = vrot.slane %v1506_v20, %v7159_v17 }
 0x1a6   : > { %vm6408_vm9 = vmpackc.low %vm4512_vm14, %vm4504_vm2  ;;  %vm3530_vm2 = vcmp.eq.s32.totalorder %v11222_v52, %v10295_v53  ;;  %v950_v42 = vmul.f32 %v7040_v40, %v10414_v15  ;;  %v914_v14 = vrot.slane %v10581_v56, %v7159_v17  ;;  %vm4545_vm14 = vcmp.eq.s32.totalorder %v7278_v25, %v10304_v55 }
 0x1a7   : > { %6409 = vmatpush1.bf16.xpose.msk.msra.mxu1 %vm6408_vm9, %v7076_v58  ;;  %6145 = vmatmul.mubr.msk.bf16.gmra.mrb[24].mxu0 %vm10528_vm5, %v7076_v58  ;;  %vm6156_vm6 = vmpackc.low %vm3756_vm7, %vm3748_vm13  ;;  %vm4537_vm5 = vcmp.eq.s32.totalorder %v7275_v22, %v10304_v55  ;;  %vm11435_vm13 = vcmp.eq.s32.totalorder %v7278_v25, %v10330_v61  ;;  %v1269_v54 = vmul.f32 %v1250_v12, %v7261_v16  ;;  %v1075_v46 = vshra.s32 %v10409_v11, 6 }
 0x1a8   : > { %6411 = vmatprep.subr.msk.bf16.mxu1 %vm6410_vm4, %v7076_v58  ;;  %6147 = vmatprep.mubr.msk.bf16.mxu0 %vm10553_vm3, %v7076_v58  ;;  %vm6158_vm15 = vmpackc.low %vm3773_vm10, %vm3765_vm1  ;;  %v1429_v5 = vmul.f32 %v1410_v24, %v7313_v23  ;;  %v1605_v41 = vmul.f32 %v1586_v44, %v7272_v21  ;;  %vm4520_vm3 = vcmp.eq.s32.totalorder %v7264_v18, %v10507_v26  ;;  %v6847_v15 = vround.rtne.f32 %v950_v42 }
 0x1a9   : > { %6157 = vmatpush1.bf16.xpose.msk.msra.mxu0 %vm6156_vm6, %v7076_v58  ;;  %vm6400_vm7 = vmpackc.low %vm11435_vm13, %vm4278_vm8  ;;  %vm4528_vm9 = vcmp.eq.s32.totalorder %v7267_v19, %v10507_v26  ;;  %7043 = vrcp.f32 %v914_v14  ;;  %vm3477_vm10 = vcmp.eq.s32.totalorder %v7132_v6, %v10578_v38  ;;  %v10649_v21 = vrot.slane %v1860_v10, %v7141_v9 }
 0x1aa   : > { %6159 = vmatprep.subr.msk.bf16.mxu0 %vm6158_vm15, %v7076_v58  ;;  %vm6402_vm1 = vmpackc.low %vm4303_vm11, %vm4295_vm12  ;;  %vm3485_vm11 = vcmp.eq.s32.totalorder %v7252_v8, %v10578_v38  ;;  %v1445_v23 = vadd.f32 %v1429_v5, %v1269_v54  ;;  %vm3764_vm4 = vcmp.eq.s32.totalorder %v7275_v22, %v10442_v60  ;;  %v982_v33 = vmul.f32 64.0, %v6847_v15 }
 0x1ab   : > { %vm10640_vm8 = vmpackc.low %vm3530_vm2, %vm3522_vm0  ;;  %vm3772_vm0 = vcmp.eq.s32.totalorder %v7278_v25, %v10442_v60  ;;  %v1014_v53 = vrot.slane %v6847_v15, 1  ;;  %vm3781_vm15 = vcmp.eq.s32.totalorder %v11221_v51, %v10282_v2  ;;  %vm4294_vm13 = vcmp.eq.s32.totalorder %v11221_v51, %v10330_v61 }
 0x1ac   : > { %6401 = vmatmul.mubr.msk.bf16.gmra.mrb[24].mxu1 %vm6400_vm7, %v7076_v58  ;;  %vm6414_vm12 = vmpackc.low %vm4545_vm14, %vm4537_vm5  ;;  %vm3789_vm5 = vcmp.eq.s32.totalorder %v11222_v52, %v10282_v2  ;;  %v1621_v32 = vadd.f32 %v1605_v41, %v1445_v23  ;;  %vm4302_vm7 = vcmp.eq.s32.totalorder %v11222_v52, %v10330_v61  ;;  %v10743_v30 = vrot.slane %v1075_v46, %v7141_v9 }
 0x1ad   : > { %6403 = vmatprep.mubr.msk.bf16.mxu1 %vm6402_vm1, %v7076_v58  ;;  %vm6412_vm6 = vmpackc.low %vm4528_vm9, %vm4520_vm3  ;;  %v1046_v3 = vadd.f32 %v1014_v53, %v982_v33  ;;  %v7042_v39 = vpop.eup %7041  ;;  %vm4249_vm9 = vcmp.eq.s32.totalorder %v7132_v6, %v10649_v21  ;;  %vm4257_vm1 = vcmp.eq.s32.totalorder %v7252_v8, %v10649_v21  ;;  %v11440_v5 = vmov 0 }
 0x1ae   : > { %vm6166_vm2 = vmpackc.low %vm3485_vm11, %vm3477_vm10  ;;  %v1637_v49 = vadd.f32 %v1621_v32, %v7330_v28  ;;  %v1734_v4 = vmul.f32 %v7042_v39, %v10493_v13  ;;  %vm4544_vm10 = vcmp.eq.s32.totalorder %v7278_v25, %v10507_v26  ;;  %vm4553_vm11 = vcmp.eq.s32.totalorder %v11221_v51, %v10304_v55 }
 0x1af   : > { %6413 = vmatpush1.bf16.xpose.msk.msra.mxu1 %vm6412_vm6, %v7076_v58  ;;  %6149 = vmatmul.mubr.msk.bf16.gmra.mrb[28].mxu0 %vm10640_vm8, %v7076_v58  ;;  %vm6160_vm14 = vmpackc.low %vm3772_vm0, %vm3764_vm4  ;;  %v6878_v1 = vtrunc.f32 %v1046_v3  ;;  %vm4536_vm8 = vcmp.eq.s32.totalorder %v7275_v22, %v10507_v26  ;;  %vm4561_vm4 = vcmp.eq.s32.totalorder %v11222_v52, %v10304_v55  ;;  %vm3780_vm6 = vcmp.eq.s32.totalorder %v11221_v51, %v10442_v60 }
 0x1b0   : > { %6415 = vmatprep.subr.msk.bf16.mxu1 %vm6414_vm12, %v7076_v58  ;;  %6167 = vmatprep.mubr.msk.bf16.mxu0 %vm6166_vm2, %v7076_v58  ;;  %vm6162_vm3 = vmpackc.low %vm3789_vm5, %vm3781_vm15  ;;  %v1698_v28 = vrot.slane %v1637_v49, %v7159_v17  ;;  %v6895_v17 = vround.rtne.f32 %v1734_v4  ;;  %vm3788_vm15 = vcmp.eq.s32.totalorder %v11222_v52, %v10442_v60  ;;  %v1859_v55 = vshra.s32 %v10461_v47, 6 }
 0x1b1   : > { %6161 = vmatpush1.bf16.xpose.msk.msra.mxu0 %vm6160_vm14, %v7076_v58  ;;  %vm6404_vm12 = vmpackc.low %vm4302_vm7, %vm4294_vm13  ;;  %v10712_v2 = vcvt.f32.s32 %v6878_v1 }
 0x1b2   : > { %6163 = vmatprep.subr.msk.bf16.mxu0 %vm6162_vm3, %v7076_v58  ;;  %vm6422_vm0 = vmpackc.low %vm4257_vm1, %vm4249_vm9  ;;  %7045 = vrcp.f32 %v1698_v28  ;;  %v1766_v11 = vmul.f32 64.0, %v6895_v17  ;;  %v1798_v43 = vrot.slane %v6895_v17, 1  ;;  %vm4552_vm9 = vcmp.eq.s32.totalorder %v11221_v51, %v10507_v26 }
 0x1b3   : > { %v7044_v50 = vpop.eup %7043  ;;  %v1094_v61 = vand.u32 63, %v10712_v2  ;;  %vm6416_vm5 = vmpackc.low %vm4544_vm10, %vm4536_vm8  ;;  %vm4560_vm1 = vcmp.eq.s32.totalorder %v11222_v52, %v10507_v26  ;;  %vm3476_vm8 = vcmp.eq.s32.totalorder %v7132_v6, %v10743_v30  ;;  %vm3484_vm10 = vcmp.eq.s32.totalorder %v7252_v8, %v10743_v30 }
 0x1b4   : > { %6405 = vmatmul.mubr.msk.bf16.gmra.mrb[28].mxu1 %vm6404_vm12, %v7076_v58  ;;  %v948_v48 = vmul.f32 %v7044_v50, %v10581_v56  ;;  %vm6418_vm2 = vmpackc.low %vm4561_vm4, %vm4553_vm11  ;;  %v1830_v35 = vadd.f32 %v1798_v43, %v1766_v11  ;;  %v10763_v7 = vrot.slane %v1859_v55, %v7141_v9  ;;  %vm3493_vm11 = vcmp.eq.s32.totalorder %v7264_v18, %v10578_v38 }
 0x1b5   : > { %6423 = vmatprep.mubr.msk.bf16.mxu1 %vm6422_vm0, %v7076_v58  ;;  %v10739_v60 = vrot.slane %v1094_v61, %v7141_v9  ;;  %vm6164_vm14 = vmpackc.low %vm3788_vm15, %vm3780_vm6  ;;  %vm3501_vm12 = vcmp.eq.s32.totalorder %v7267_v19, %v10578_v38  ;;  %v1078_v14 = vshra.s32 %v10712_v2, 6 }
 0x1b6   : > { %v6846_v57 = vround.rtne.f32 %v948_v48  ;;  %v6926_v63 = vtrunc.f32 %v1830_v35  ;;  %vm6420_vm4 = vmpackc.low %vm4560_vm1, %vm4552_vm9  ;;  %vm4248_vm15 = vcmp.eq.s32.totalorder %v7132_v6, %v10763_v7  ;;  %vm3492_vm9 = vcmp.eq.s32.totalorder %v7264_v18, %v10743_v30 }
 0x1b7   : > { %6417 = vmatpush1.bf16.xpose.msk.msra.mxu1 %vm6416_vm5, %v7076_v58  ;;  %vm3735_vm13 = vcmp.eq.s32.totalorder %v7132_v6, %v10739_v60  ;;  %vm3743_vm7 = vcmp.eq.s32.totalorder %v7252_v8, %v10739_v60  ;;  %vm6168_vm0 = vmpackc.low %vm3484_vm10, %vm3476_vm8  ;;  %vm4265_vm5 = vcmp.eq.s32.totalorder %v7264_v18, %v10649_v21  ;;  %vm3500_vm1 = vcmp.eq.s32.totalorder %v7267_v19, %v10743_v30 }
 0x1b8   : > { %6419 = vmatprep.subr.msk.bf16.mxu1 %vm6418_vm2, %v7076_v58  ;;  %vm6182_vm3 = vmpackc.low %vm3743_vm7, %vm3735_vm13  ;;  %v981_v59 = vmul.f32 64.0, %v6846_v57  ;;  %v1013_v45 = vrot.slane %v6846_v57, 1  ;;  %v10756_v13 = vcvt.f32.s32 %v6926_v63  ;;  %vm4273_vm2 = vcmp.eq.s32.totalorder %v7267_v19, %v10649_v21 }
 0x1b9   : > { %6165 = vmatpush1.bf16.xpose.msk.msra.mxu0 %vm6164_vm14, %v7076_v58  ;;  %vm6170_vm6 = vmpackc.low %vm3501_vm12, %vm3493_vm11  ;;  %vm4256_vm7 = vcmp.eq.s32.totalorder %v7252_v8, %v10763_v7  ;;  %vm3751_vm11 = vcmp.eq.s32.totalorder %v7264_v18, %v10739_v60  ;;  %vm3759_vm12 = vcmp.eq.s32.totalorder %v7267_v19, %v10739_v60  ;;  %v10899_v54 = vrot.slane %v1078_v14, %v7141_v9 }
 0x1ba   : > { %6183 = vmatprep.subr.msk.bf16.mxu0 %vm6182_vm3, %v7076_v58  ;;  %v1045_v47 = vadd.f32 %v1013_v45, %v981_v59  ;;  %v1878_v62 = vand.u32 63, %v10756_v13  ;;  %vm6426_vm8 = vmpackc.low %vm4273_vm2, %vm4265_vm5  ;;  %vm3509_vm5 = vcmp.eq.s32.totalorder %v7275_v22, %v10578_v38 }
 0x1bb   : > { %vm6424_vm10 = vmpackc.low %vm4256_vm7, %vm4248_vm15  ;;  %vm3517_vm15 = vcmp.eq.s32.totalorder %v7278_v25, %v10578_v38  ;;  %vm4272_vm7 = vcmp.eq.s32.totalorder %v7267_v19, %v10763_v7 }
 0x1bc   : > { %v7046_v37 = vpop.eup %7045  ;;  %v6876_v26 = vtrunc.f32 %v1045_v47  ;;  %v10772_v27 = vrot.slane %v1878_v62, %v7141_v9 }
 0x1bd   : > { %v1732_v29 = vmul.f32 %v7046_v37, %v1637_v49 }
 0x1be   : > { %v10775_v34 = vcvt.f32.s32 %v6876_v26  ;;  %vm4507_vm14 = vcmp.eq.s32.totalorder %v7132_v6, %v10772_v27  ;;  %vm4515_vm13 = vcmp.eq.s32.totalorder %v7252_v8, %v10772_v27 }
 0x1bf   : > { %6421 = vmatpush1.bf16.xpose.msk.msra.mxu1 %vm6420_vm4, %v7076_v58  ;;  %v6894_v31 = vround.rtne.f32 %v1732_v29  ;;  %vm6438_vm3 = vmpackc.low %vm4515_vm13, %vm4507_vm14  ;;  %vm4264_vm13 = vcmp.eq.s32.totalorder %v7264_v18, %v10763_v7 }
 0x1c0   : > { %6169 = vmatmul.mubr.msk.bf16.vlgmr.msra.gmra.mrb[16].mxu0 %vm6168_vm0, %v7076_v58  ;;  %v1093_v36 = vand.u32 63, %v10775_v34  ;;  %6439 = vmatprep.subr.msk.bf16.mxu1 %vm6438_vm3, %v7076_v58  ;;  %vm6186_vm14 = vmpackc.low %vm3759_vm12, %vm3751_vm11  ;;  %vm3767_vm12 = vcmp.eq.s32.totalorder %v7275_v22, %v10739_v60  ;;  %v1077_v15 = vshra.s32 %v10775_v34, 6 }
 0x1c1   : > { %6171 = vmatprep.mubr.msk.bf16.mxu0 %vm6170_vm6, %v7076_v58  ;;  %v1765_v20 = vmul.f32 64.0, %v6894_v31  ;;  %v1797_v0 = vrot.slane %v6894_v31, 1  ;;  %vm6172_vm6 = vmpackc.low %vm3500_vm1, %vm3492_vm9  ;;  %vm4281_vm9 = vcmp.eq.s32.totalorder %v7275_v22, %v10649_v21  ;;  %vm4289_vm1 = vcmp.eq.s32.totalorder %v7278_v25, %v10649_v21 }
 0x1c2   : > { %v10797_v56 = vrot.slane %v1093_v36, %v7141_v9  ;;  %vm6174_vm3 = vmpackc.low %vm3517_vm15, %vm3509_vm5  ;;  %v3467_v16 = vrot.slane %v1077_v15, %v7141_v9 }
 0x1c3   : > { %v1829_v40 = vadd.f32 %v1797_v0, %v1765_v20  ;;  %vm6428_vm11 = vmpackc.low %vm4272_vm7, %vm4264_vm13  ;;  %vm3525_vm7 = vcmp.eq.s32.totalorder %v11221_v51, %v10578_v38 }
 0x1c4   : > { %vm3734_vm4 = vcmp.eq.s32.totalorder %v7132_v6, %v10797_v56  ;;  %vm3742_vm0 = vcmp.eq.s32.totalorder %v7252_v8, %v10797_v56  ;;  %vm6430_vm5 = vmpackc.low %vm4289_vm1, %vm4281_vm9 }
 0x1c5   : > { %vm6184_vm2 = vmpackc.low %vm3742_vm0, %vm3734_vm4  ;;  %v6924_v10 = vtrunc.f32 %v1829_v40  ;;  %vm3775_vm4 = vcmp.eq.s32.totalorder %v7278_v25, %v10739_v60  ;;  %vm3750_vm0 = vcmp.eq.s32.totalorder %v7264_v18, %v10797_v56 }
 0x1c6   : > { %6425 = vmatmul.mubr.msk.bf16.vlgmr.msra.gmra.mrb[16].mxu1 %vm6424_vm10, %v7076_v58  ;;  %6185 = vmatpush1.bf16.xpose.msk.msra.mxu0 %vm6184_vm2, %v7076_v58  ;;  %vm3516_vm10 = vcmp.eq.s32.totalorder %v7278_v25, %v10743_v30  ;;  %vm4523_vm2 = vcmp.eq.s32.totalorder %v7264_v18, %v10772_v27  ;;  %vm6190_vm13 = vmpackc.low %vm3775_vm4, %vm3767_vm12  ;;  %vm4288_vm12 = vcmp.eq.s32.totalorder %v7278_v25, %v10763_v7 }
 0x1c7   : > { %6427 = vmatprep.mubr.msk.bf16.mxu1 %vm6426_vm8, %v7076_v58  ;;  %v10821_v12 = vcvt.f32.s32 %v6924_v10  ;;  %6187 = vmatprep.subr.msk.bf16.mxu0 %vm6186_vm14, %v7076_v58  ;;  %vm3508_vm8 = vcmp.eq.s32.totalorder %v7275_v22, %v10743_v30  ;;  %vm4531_vm14 = vcmp.eq.s32.totalorder %v7267_v19, %v10772_v27 }
 0x1c8   : > { %6173 = vmatmul.mubr.msk.bf16.gmra.mrb[20].mxu0 %vm6172_vm6, %v7076_v58  ;;  %vm3758_vm6 = vcmp.eq.s32.totalorder %v7267_v19, %v10797_v56  ;;  %vm10846_vm15 = vmpackc.low %vm3516_vm10, %vm3508_vm8  ;;  %vm3533_vm8 = vcmp.eq.s32.totalorder %v11222_v52, %v10578_v38  ;;  %v1862_v38 = vshra.s32 %v10756_v13, 6 }
 0x1c9   : > { %6175 = vmatprep.mubr.msk.bf16.mxu0 %vm6174_vm3, %v7076_v58  ;;  %v1877_v24 = vand.u32 63, %v10821_v12  ;;  %vm6188_vm1 = vmpackc.low %vm3758_vm6, %vm3750_vm0  ;;  %vm4297_vm0 = vcmp.eq.s32.totalorder %v11221_v51, %v10649_v21  ;;  %vm4305_vm6 = vcmp.eq.s32.totalorder %v11222_v52, %v10649_v21  ;;  %v1861_v21 = vshra.s32 %v10821_v12, 6 }
 0x1ca   : > { %vm6442_vm4 = vmpackc.low %vm4531_vm14, %vm4523_vm2  ;;  %vm3524_vm2 = vcmp.eq.s32.totalorder %v11221_v51, %v10743_v30  ;;  %vm3532_vm14 = vcmp.eq.s32.totalorder %v11222_v52, %v10743_v30  ;;  %v10928_v41 = vrot.slane %v1862_v38, %v7141_v9 }
 0x1cb   : > { %v10844_v44 = vrot.slane %v1877_v24, %v7141_v9  ;;  %v4239_v23 = vrot.slane %v1861_v21, %v7141_v9 }
 0x1cd   : > { %vm4506_vm3 = vcmp.eq.s32.totalorder %v7132_v6, %v10844_v44  ;;  %vm4514_vm9 = vcmp.eq.s32.totalorder %v7252_v8, %v10844_v44 }
 0x1ce   : > { %6429 = vmatmul.mubr.msk.bf16.gmra.mrb[20].mxu1 %vm6428_vm11, %v7076_v58  ;;  %vm6440_vm10 = vmpackc.low %vm4514_vm9, %vm4506_vm3  ;;  %6189 = vmatpush1.bf16.xpose.msk.msra.mxu0 %vm6188_vm1, %v7076_v58  ;;  %vm4280_vm11 = vcmp.eq.s32.totalorder %v7275_v22, %v10763_v7  ;;  %vm3783_vm3 = vcmp.eq.s32.totalorder %v11221_v51, %v10739_v60  ;;  %vm3791_vm9 = vcmp.eq.s32.totalorder %v11222_v52, %v10739_v60 }
 0x1cf   : > { %6431 = vmatprep.mubr.msk.bf16.mxu1 %vm6430_vm5, %v7076_v58  ;;  %6441 = vmatpush1.bf16.xpose.msk.msra.mxu1 %vm6440_vm10, %v7076_v58  ;;  %vm6178_vm5 = vmpackc.low %vm3533_vm8, %vm3525_vm7  ;;  %vm3774_vm7 = vcmp.eq.s32.totalorder %v7278_v25, %v10797_v56  ;;  %vm4522_vm8 = vcmp.eq.s32.totalorder %v7264_v18, %v10844_v44  ;;  %vm4530_vm10 = vcmp.eq.s32.totalorder %v7267_v19, %v10844_v44 }
 0x1d0   : > { %6191 = vmatprep.subr.msk.bf16.mxu0 %vm6190_vm13, %v7076_v58  ;;  %6443 = vmatprep.subr.msk.bf16.mxu1 %vm6442_vm4, %v7076_v58  ;;  %vm6432_vm13 = vmpackc.low %vm4288_vm12, %vm4280_vm11  ;;  %vm4539_vm12 = vcmp.eq.s32.totalorder %v7275_v22, %v10772_v27  ;;  %vm4547_vm4 = vcmp.eq.s32.totalorder %v7278_v25, %v10772_v27 }
 0x1d1   : > { %6177 = vmatmul.mubr.msk.bf16.gmra.mrb[24].mxu0 %vm10846_vm15, %v7076_v58  ;;  %vm3766_vm15 = vcmp.eq.s32.totalorder %v7275_v22, %v10797_v56  ;;  %vm6434_vm1 = vmpackc.low %vm4305_vm6, %vm4297_vm0  ;;  %vm3479_vm6 = vcmp.eq.s32.totalorder %v7132_v6, %v10899_v54 }
 0x1d2   : > { %6179 = vmatprep.mubr.msk.bf16.mxu0 %vm6178_vm5, %v7076_v58  ;;  %vm10913_vm11 = vmpackc.low %vm3532_vm14, %vm3524_vm2  ;;  %vm3487_vm2 = vcmp.eq.s32.totalorder %v7252_v8, %v10899_v54 }
 0x1d3   : > { %v11441_v5 = vsel %vm10913_vm11, 4294967295, %v11440_v5  ;;  %vm6194_vm5 = vmpackc.low %vm3791_vm9, %vm3783_vm3  ;;  %vm4296_vm3 = vcmp.eq.s32.totalorder %v11221_v51, %v10763_v7  ;;  %vm4304_vm9 = vcmp.eq.s32.totalorder %v11222_v52, %v10763_v7 }
 0x1d4   : > { %vm6192_vm0 = vmpackc.low %vm3774_vm7, %vm3766_vm15  ;;  %vm4251_vm7 = vcmp.eq.s32.totalorder %v7132_v6, %v10928_v41 }
 0x1d5   : > { %vm6444_vm14 = vmpackc.low %vm4530_vm10, %vm4522_vm8  ;;  %vm3782_vm8 = vcmp.eq.s32.totalorder %v11221_v51, %v10797_v56  ;;  %vm3790_vm10 = vcmp.eq.s32.totalorder %v11222_v52, %v10797_v56 }
 0x1d6   : > { %6433 = vmatmul.mubr.msk.bf16.gmra.mrb[24].mxu1 %vm6432_vm13, %v7076_v58  ;;  %6193 = vmatpush1.bf16.xpose.msk.msra.mxu0 %vm6192_vm0, %v7076_v58  ;;  %vm6446_vm11 = vmpackc.low %vm4547_vm4, %vm4539_vm12  ;;  %vm11442_vm13 = vnez %v11441_v5  ;;  %vm4546_vm12 = vcmp.eq.s32.totalorder %v7278_v25, %v10844_v44  ;;  %vm4563_vm0 = vcmp.eq.s32.totalorder %v11222_v52, %v10772_v27 }
 0x1d7   : > { %6435 = vmatprep.mubr.msk.bf16.mxu1 %vm6434_vm1, %v7076_v58  ;;  %6445 = vmatpush1.bf16.xpose.msk.msra.mxu1 %vm6444_vm14, %v7076_v58  ;;  %vm6198_vm15 = vmpackc.low %vm3487_vm2, %vm3479_vm6  ;;  %vm4259_vm1 = vcmp.eq.s32.totalorder %v7252_v8, %v10928_v41 }
 0x1d8   : > { %6195 = vmatprep.subr.msk.bf16.mxu0 %vm6194_vm5, %v7076_v58  ;;  %6447 = vmatprep.subr.msk.bf16.mxu1 %vm6446_vm11, %v7076_v58  ;;  %vm4538_vm11 = vcmp.eq.s32.totalorder %v7275_v22, %v10844_v44  ;;  %vm6436_vm4 = vmpackc.low %vm4304_vm9, %vm4296_vm3  ;;  %vm4555_vm5 = vcmp.eq.s32.totalorder %v11221_v51, %v10772_v27  ;;  %vm3478_vm3 = vcmp.eq.s32.totalorder %v7132_v6, %v3467_v16 }
 0x1d9   : > { %6181 = vmatmul.mubr.msk.bf16.gmra.mrb[28].mxu0 %vm11442_vm13, %v7076_v58  ;;  %vm6454_vm6 = vmpackc.low %vm4259_vm1, %vm4251_vm7  ;;  %vm3486_vm9 = vcmp.eq.s32.totalorder %v7252_v8, %v3467_v16  ;;  %vm3503_vm7 = vcmp.eq.s32.totalorder %v7267_v19, %v10899_v54  ;;  %vm4554_vm1 = vcmp.eq.s32.totalorder %v11221_v51, %v10844_v44 }
 0x1da   : > { %6199 = vmatprep.mubr.msk.bf16.mxu0 %vm6198_vm15, %v7076_v58  ;;  %vm6196_vm2 = vmpackc.low %vm3790_vm10, %vm3782_vm8  ;;  %vm3495_vm15 = vcmp.eq.s32.totalorder %v7264_v18, %v10899_v54  ;;  %vm4562_vm8 = vcmp.eq.s32.totalorder %v11222_v52, %v10844_v44 }
 0x1db   : > { %vm6448_vm14 = vmpackc.low %vm4546_vm12, %vm4538_vm11 }
 0x1dc   : > { %vm6450_vm13 = vmpackc.low %vm4563_vm0, %vm4555_vm5  ;;  %vm3519_vm5 = vcmp.eq.s32.totalorder %v7278_v25, %v10899_v54  ;;  %vm3494_vm0 = vcmp.eq.s32.totalorder %v7264_v18, %v3467_v16 }
 0x1dd   : > { %vm6200_vm10 = vmpackc.low %vm3486_vm9, %vm3478_vm3  ;;  %vm4275_vm3 = vcmp.eq.s32.totalorder %v7267_v19, %v10928_v41 }
 0x1de   : > { %6437 = vmatmul.mubr.msk.bf16.gmra.mrb[28].mxu1 %vm6436_vm4, %v7076_v58  ;;  %6197 = vmatpush1.bf16.xpose.msk.msra.mxu0 %vm6196_vm2, %v7076_v58  ;;  %vm6202_vm11 = vmpackc.low %vm3503_vm7, %vm3495_vm15  ;;  %vm3511_vm4 = vcmp.eq.s32.totalorder %v7275_v22, %v10899_v54  ;;  %vm4250_vm2 = vcmp.eq.s32.totalorder %v7132_v6, %v4239_v23 }
 0x1df   : > { %6455 = vmatprep.mubr.msk.bf16.mxu1 %vm6454_vm6, %v7076_v58  ;;  %6449 = vmatpush1.bf16.xpose.msk.msra.mxu1 %vm6448_vm14, %v7076_v58  ;;  %vm6452_vm12 = vmpackc.low %vm4562_vm8, %vm4554_vm1  ;;  %vm3502_vm6 = vcmp.eq.s32.totalorder %v7267_v19, %v3467_v16  ;;  %vm4258_vm14 = vcmp.eq.s32.totalorder %v7252_v8, %v4239_v23  ;;  %vm3527_vm8 = vcmp.eq.s32.totalorder %v11221_v51, %v10899_v54 }
 0x1e0   : > { %6451 = vmatprep.subr.msk.bf16.mxu1 %vm6450_vm13, %v7076_v58  ;;  %vm4267_vm13 = vcmp.eq.s32.totalorder %v7264_v18, %v10928_v41  ;;  %vm6206_vm9 = vmpackc.low %vm3519_vm5, %vm3511_vm4  ;;  %vm4266_vm4 = vcmp.eq.s32.totalorder %v7264_v18, %v4239_v23  ;;  %vm4274_vm5 = vcmp.eq.s32.totalorder %v7267_v19, %v4239_v23 }
 0x1e1   : > { %vm6204_vm15 = vmpackc.low %vm3502_vm6, %vm3494_vm0  ;;  %vm4283_vm0 = vcmp.eq.s32.totalorder %v7275_v22, %v10928_v41  ;;  %vm4291_vm6 = vcmp.eq.s32.totalorder %v7278_v25, %v10928_v41 }
 0x1e2   : > { %vm6456_vm7 = vmpackc.low %vm4258_vm14, %vm4250_vm2 }
 0x1e3   : > { %vm6458_vm1 = vmpackc.low %vm4275_vm3, %vm4267_vm13 }
 0x1e4   : > { %vm6460_vm13 = vmpackc.low %vm4274_vm5, %vm4266_vm4  ;;  %vm4298_vm5 = vcmp.eq.s32.totalorder %v11221_v51, %v4239_v23 }
 0x1e5   : > { %6201 = vmatmul.mubr.msk.bf16.vlgmr.msra.gmra.mrb[16].mxu0 %vm6200_vm10, %v7076_v58  ;;  %vm3535_vm10 = vcmp.eq.s32.totalorder %v11222_v52, %v10899_v54  ;;  %vm6462_vm3 = vmpackc.low %vm4291_vm6, %vm4283_vm0  ;;  %vm4306_vm0 = vcmp.eq.s32.totalorder %v11222_v52, %v4239_v23 }
 0x1e6   : > { %6203 = vmatprep.mubr.msk.bf16.mxu0 %vm6202_vm11, %v7076_v58  ;;  %vm3510_vm11 = vcmp.eq.s32.totalorder %v7275_v22, %v3467_v16  ;;  %vm6210_vm2 = vmpackc.low %vm3535_vm10, %vm3527_vm8  ;;  %vm4299_vm8 = vcmp.eq.s32.totalorder %v11221_v51, %v10928_v41  ;;  %vm4307_vm10 = vcmp.eq.s32.totalorder %v11222_v52, %v10928_v41 }
 0x1e7   : > { %6453 = vmatpush1.bf16.xpose.msk.msra.mxu1 %vm6452_vm12, %v7076_v58  ;;  %vm3518_vm12 = vcmp.eq.s32.totalorder %v7278_v25, %v3467_v16  ;;  %vm6466_vm4 = vmpackc.low %vm4307_vm10, %vm4299_vm8 }
 0x1e8   : > { %vm6208_vm14 = vmpackc.low %vm3518_vm12, %vm3510_vm11 }
 0x1e9   : > { %vm6468_vm6 = vmpackc.low %vm4306_vm0, %vm4298_vm5 }
 0x1ed   : > { %6205 = vmatmul.mubr.msk.bf16.gmra.mrb[20].mxu0 %vm6204_vm15, %v7076_v58  ;;  %vm3534_vm15 = vcmp.eq.s32.totalorder %v11222_v52, %v3467_v16 }
 0x1ee   : > { %6457 = vmatmul.mubr.msk.bf16.vlgmr.msra.gmra.mrb[16].mxu1 %vm6456_vm7, %v7076_v58  ;;  %6207 = vmatprep.mubr.msk.bf16.mxu0 %vm6206_vm9, %v7076_v58  ;;  %vm3526_vm9 = vcmp.eq.s32.totalorder %v11221_v51, %v3467_v16  ;;  %vm4282_vm7 = vcmp.eq.s32.totalorder %v7275_v22, %v4239_v23 }
 0x1ef   : > { %6459 = vmatprep.mubr.msk.bf16.mxu1 %vm6458_vm1, %v7076_v58  ;;  %vm4290_vm1 = vcmp.eq.s32.totalorder %v7278_v25, %v4239_v23  ;;  %vm6212_vm11 = vmpackc.low %vm3534_vm15, %vm3526_vm9 }
 0x1f0   : > { %vm6464_vm12 = vmpackc.low %vm4290_vm1, %vm4282_vm7 }
 0x1f5   : > { %6209 = vmatmul.mubr.msk.bf16.gmra.mrb[24].mxu0 %vm6208_vm14, %v7076_v58 }
 0x1f6   : > { %6461 = vmatmul.mubr.msk.bf16.gmra.mrb[20].mxu1 %vm6460_vm13, %v7076_v58  ;;  %6211 = vmatprep.mubr.msk.bf16.mxu0 %vm6210_vm2, %v7076_v58  ;;  %vm5024_vm2 = vcmask 523264  }
 0x1f7   : > { %6463 = vmatprep.mubr.msk.bf16.mxu1 %vm6462_vm3, %v7076_v58 }
 0x1fd   : > { %6213 = vmatmul.mubr.msk.bf16.gmra.mrb[28].mxu0 %vm6212_vm11, %v7076_v58 }
 0x1fe   : > { %6465 = vmatmul.mubr.msk.bf16.gmra.mrb[24].mxu1 %vm6464_vm12, %v7076_v58 }
 0x1ff   : > { %6467 = vmatprep.mubr.msk.bf16.mxu1 %vm6466_vm4, %v7076_v58 }
 0x206   : > { %6469 = vmatmul.mubr.msk.bf16.gmra.mrb[28].mxu1 %vm6468_vm6, %v7076_v58 }
 0x21b   : > { %v11026_v6 = vpop.f32.mrb[0].mxu0 }
 0x21c   : > { %v11028_v9 = vpop.f32.mrb[0].mxu1  ;;  %v2631_v8 = vpop.f32.mrb[1].mxu0 }
 0x21d   : > { %v3432_v18 = vsub.f32 %v11026_v6, %v11028_v9  ;;  %v3403_v19 = vpop.f32.mrb[1].mxu1  ;;  %v11032_v22 = vpop.f32.mrb[2].mxu0 }
 0x21e   : > { %v11034_v25 = vpop.f32.mrb[2].mxu1  ;;  %v2634_v33 = vpop.f32.mrb[3].mxu0 }
 0x21f   : > { %v3433_v51 = vsub.f32 %v11032_v22, %v11034_v25  ;;  %v3406_v52 = vpop.f32.mrb[3].mxu1 }
 0x223   : > { %v11038_v53 = vpop.f32.mrb[4].mxu0 }
 0x224   : > { %v11040_v58 = vpop.f32.mrb[4].mxu1  ;;  %v2639_v32 = vpop.f32.mrb[5].mxu0 }
 0x225   : > { %v3434_v3 = vsub.f32 %v11038_v53, %v11040_v58  ;;  %v3411_v49 = vpop.f32.mrb[5].mxu1  ;;  %v11044_v39 = vpop.f32.mrb[6].mxu0 }
 0x226   : > { %v11046_v1 = vpop.f32.mrb[6].mxu1  ;;  %v2642_v4 = vpop.f32.mrb[7].mxu0 }
 0x227   : > { %v3435_v28 = vsub.f32 %v11044_v39, %v11046_v1  ;;  %v3414_v2 = vpop.f32.mrb[7].mxu1 }
 0x22b   : > { %v11050_v17 = vpop.f32.mrb[8].mxu0 }
 0x22c   : > { %v11052_v46 = vpop.f32.mrb[8].mxu1  ;;  %v2647_v50 = vpop.f32.mrb[9].mxu0 }
 0x22d   : > { %v3436_v61 = vsub.f32 %v11050_v17, %v11052_v46  ;;  %v3419_v11 = vpop.f32.mrb[9].mxu1  ;;  %v11056_v43 = vpop.f32.mrb[10].mxu0 }
 0x22e   : > { %v11058_v48 = vpop.f32.mrb[10].mxu1  ;;  %v2650_v60 = vpop.f32.mrb[11].mxu0 }
 0x22f   : > { %v3437_v35 = vsub.f32 %v11056_v43, %v11058_v48  ;;  %v3422_v30 = vpop.f32.mrb[11].mxu1  ;;  %v5035_v43 = vld [vmem:[%s11206_s3 + $0x10] sm:$0xff]  ;;  %v5036_v48 = vld [vmem:[%s11206_s3 + $0x18] sm:$0xff] }
 0x233   : > { %v11062_v57 = vpop.f32.mrb[12].mxu0 }
 0x234   : > { %v2655_v63 = vpop.f32.mrb[13].mxu0 }
 0x235   : > { %v11064_v55 = vpop.f32.mrb[12].mxu1  ;;  %v11068_v13 = vpop.f32.mrb[14].mxu0 }
 0x236   : > { %v3438_v59 = vsub.f32 %v11062_v57, %v11064_v55  ;;  %v3427_v45 = vpop.f32.mrb[13].mxu1  ;;  %v2658_v7 = vpop.f32.mrb[15].mxu0  ;;  %v5038_v57 = vld [vmem:[%s11206_s3 + $0x28] sm:$0xff]  ;;  %v5039_v55 = vld [vmem:[%s11206_s3 + $0x30] sm:$0xff] }
 0x237   : > { %v11070_v47 = vpop.f32.mrb[14].mxu1  ;;  %v5033_v7 = vld [vmem:[%s11206_s3] sm:$0xff] }
 0x238   : > { %v3439_v37 = vsub.f32 %v11068_v13, %v11070_v47  ;;  %v3430_v62 = vpop.f32.mrb[15].mxu1  ;;  %6536 = vmatprep.mubr.msk.f32.mxu0 %vm5024_vm2, %v5033_v7 }
 0x2b8   : > { %v4181_v26 = vpop.f32.mrb[16].mxu0 }
 0x2b9   : > { %v4183_v29 = vpop.f32.mrb[17].mxu0 }
 0x2ba   : > { %v4184_v27 = vpop.f32.mrb[18].mxu0 }
 0x2bb   : > { %v4186_v34 = vpop.f32.mrb[19].mxu0 }
 0x2c0   : > { %v4189_v31 = vpop.f32.mrb[20].mxu0 }
 0x2c1   : > { %v4953_v36 = vpop.f32.mrb[16].mxu1  ;;  %v4191_v20 = vpop.f32.mrb[21].mxu0 }
 0x2c2   : > { %v4984_v0 = vsub.f32 %v4181_v26, %v4953_v36  ;;  %v4955_v56 = vpop.f32.mrb[17].mxu1  ;;  %v4192_v40 = vpop.f32.mrb[22].mxu0  ;;  %v5170_v36 = vld [vmem:[%s11207_s4] sm:$0xff]  ;;  %v5171_v20 = vld [vmem:[%s11207_s4 + $0x8] sm:$0xff] }
 0x2c3   : > { %v4956_v10 = vpop.f32.mrb[18].mxu1  ;;  %v4194_v12 = vpop.f32.mrb[23].mxu0  ;;  %v6608_v56 = vpack.c.bf16 %v5171_v20, %v5170_v36 }
 0x2c4   : > { %v4985_v24 = vsub.f32 %v4184_v27, %v4956_v10  ;;  %v4958_v44 = vpop.f32.mrb[19].mxu1  ;;  %v5174_v12 = vld [vmem:[%s11207_s4 + $0x20] sm:$0xff] }
 0x2c5   : > { %6609 = vmatprep.subr.bf16.mxu1 %v6608_v56 }
 0x2c6   : > { %v6962_v42 = vpack.i.bf16 %v4985_v24, %v4984_v0  ;;  %v5172_v0 = vld [vmem:[%s11207_s4 + $0x10] sm:$0xff]  ;;  %v5175_v24 = vld [vmem:[%s11207_s4 + $0x28] sm:$0xff]  ;;  %6611 = vmatpush3.bf16.msra.mxu1 %v6608_v56 }
 0x2c7   : > { %v6616_v44 = vpack.c.bf16 %v5175_v24, %v5174_v12 }
 0x2c8   : > { %6963 = vrot.lane.b32.xlu1 %v6962_v42, %s7077_s14  ;;  %v4197_v14 = vpop.f32.mrb[24].mxu0  ;;  %v5176_v42 = vld [vmem:[%s11207_s4 + $0x30] sm:$0xff] }
 0x2c9   : > { %v4961_v54 = vpop.f32.mrb[20].mxu1  ;;  %v4199_v38 = vpop.f32.mrb[25].mxu0 }
 0x2ca   : > { %v4986_v5 = vsub.f32 %v4189_v31, %v4961_v54  ;;  %v4963_v41 = vpop.f32.mrb[21].mxu1  ;;  %v4200_v15 = vpop.f32.mrb[26].mxu0  ;;  %v5178_v38 = vld [vmem:[%s11207_s4 + $0x40] sm:$0xff] }
 0x2cb   : > { %v4964_v16 = vpop.f32.mrb[22].mxu1  ;;  %v4202_v21 = vpop.f32.mrb[27].mxu0 }
 0x2cc   : > { %v4987_v23 = vsub.f32 %v4192_v40, %v4964_v16  ;;  %v4966_v8 = vpop.f32.mrb[23].mxu1  ;;  %v5173_v40 = vld [vmem:[%s11207_s4 + $0x18] sm:$0xff] }
 0x2cd   : > { %v6612_v10 = vpack.c.bf16 %v5173_v40, %v5172_v0  ;;  %v5181_v16 = vld [vmem:[%s11207_s4 + $0x58] sm:$0xff]  ;;  %v5183_v8 = vld [vmem:[%s11207_s4 + $0x68] sm:$0xff] }
 0x2ce   : > { %v6967_v19 = vpack.i.bf16 %v4987_v23, %v4986_v5  ;;  %v5179_v5 = vld [vmem:[%s11207_s4 + $0x48] sm:$0xff]  ;;  %v5182_v23 = vld [vmem:[%s11207_s4 + $0x60] sm:$0xff] }
 0x2cf   : > { %6613 = vmatprep.subr.bf16.mxu1 %v6612_v10  ;;  %v6624_v41 = vpack.c.bf16 %v5179_v5, %v5178_v38 }
 0x2d0   : > { %6968 = vrot.lane.b32.xlu0 %v6967_v19, %s7077_s14  ;;  %v4205_v33 = vpop.f32.mrb[28].mxu0  ;;  %6615 = vmatpush3.bf16.msra.mxu1 %v6612_v10  ;;  %v6632_v19 = vpack.c.bf16 %v5183_v8, %v5182_v23 }
 0x2d1   : > { %v4969_v52 = vpop.f32.mrb[24].mxu1  ;;  %v4207_v32 = vpop.f32.mrb[29].mxu0  ;;  %6617 = vmatprep.subr.bf16.mxu1 %v6616_v44 }
 0x2d2   : > { %v4988_v49 = vsub.f32 %v4197_v14, %v4969_v52  ;;  %v4971_v4 = vpop.f32.mrb[25].mxu1  ;;  %v4208_v2 = vpop.f32.mrb[30].mxu0  ;;  %v5177_v14 = vld [vmem:[%s11207_s4 + $0x38] sm:$0xff] }
 0x2d3   : > { %v4972_v50 = vpop.f32.mrb[26].mxu1  ;;  %v4210_v11 = vpop.f32.mrb[31].mxu0  ;;  %v6620_v54 = vpack.c.bf16 %v5177_v14, %v5176_v42  ;;  %v5185_v52 = vld [vmem:[%s11207_s4 + $0x78] sm:$0xff] }
 0x2d4   : > { %v4989_v60 = vsub.f32 %v4200_v15, %v4972_v50  ;;  %v4974_v30 = vpop.f32.mrb[27].mxu1  ;;  %6619 = vmatpush3.bf16.msra.mxu1 %v6616_v44  ;;  %v5180_v15 = vld [vmem:[%s11207_s4 + $0x50] sm:$0xff] }
 0x2d5   : > { %6621 = vmatprep.subr.bf16.mxu1 %v6620_v54  ;;  %v6628_v21 = vpack.c.bf16 %v5181_v16, %v5180_v15 }
 0x2d6   : > { %v6972_v63 = vpack.i.bf16 %v4989_v60, %v4988_v49 }
 0x2d8   : > { %6973 = vrot.lane.b32.xlu1 %v6972_v63, %s7077_s14  ;;  %6623 = vmatpush3.bf16.msra.mxu1 %v6620_v54 }
 0x2d9   : > { %v4977_v45 = vpop.f32.mrb[28].mxu1  ;;  %6625 = vmatprep.subr.bf16.mxu1 %v6624_v41 }
 0x2da   : > { %v4990_v62 = vsub.f32 %v4205_v33, %v4977_v45  ;;  %v4979_v26 = vpop.f32.mrb[29].mxu1  ;;  %v5184_v33 = vld [vmem:[%s11207_s4 + $0x70] sm:$0xff] }
 0x2db   : > { %v4980_v29 = vpop.f32.mrb[30].mxu1  ;;  %v6636_v32 = vpack.c.bf16 %v5185_v52, %v5184_v33 }
 0x2dc   : > { %v4991_v27 = vsub.f32 %v4208_v2, %v4980_v29  ;;  %v4982_v34 = vpop.f32.mrb[31].mxu1  ;;  %6627 = vmatpush3.bf16.msra.mxu1 %v6624_v41 }
 0x2dd   : > { %6629 = vmatprep.subr.bf16.mxu1 %v6628_v21 }
 0x2de   : > { %v6977_v31 = vpack.i.bf16 %v4991_v27, %v4990_v62 }
 0x2e0   : > { %6978 = vrot.lane.b32.xlu0 %v6977_v31, %s7077_s14  ;;  %6631 = vmatpush3.bf16.msra.mxu1 %v6628_v21 }
 0x2e1   : > { %6633 = vmatprep.subr.bf16.mxu1 %v6632_v19 }
 0x2e4   : > { %6635 = vmatpush3.bf16.msra.mxu1 %v6632_v19 }
 0x2e5   : > { %6637 = vmatprep.subr.bf16.mxu1 %v6636_v32 }
 0x2e8   : > { %6639 = vmatpush3.bf16.msra.mxu1 %v6636_v32 }
 0x33a   : > { %v6964_v49 = vpop.permute.xlu1 %6963 }
 0x33b   : > { %v6966_v4 = vunpack.i.h.bf16 %v6964_v49  ;;  %v6965_v2 = vunpack.i.l.bf16 %v6964_v49 }
 0x33d   : > { %v5025_v50 = vsel %vm5024_vm2, %v3432_v18, %v6965_v2  ;;  %v5026_v11 = vsel %vm5024_vm2, %v3433_v51, %v6966_v4 }
 0x33e   : > { %v6592_v60 = vpack.c.bf16 %v5026_v11, %v5025_v50 }
 0x340   : > { %6593 = vmatprep.subr.bf16.mxu0 %v6592_v60 }
 0x341   : > { %6595 = vmatpush3.bf16.msra.mxu0 %v6592_v60 }
 0x342   : > { %v6969_v30 = vpop.permute.xlu0 %6968 }
 0x343   : > { %v6971_v63 = vunpack.i.h.bf16 %v6969_v30  ;;  %v6970_v45 = vunpack.i.l.bf16 %v6969_v30 }
 0x345   : > { %v5027_v7 = vsel %vm5024_vm2, %v3434_v3, %v6970_v45  ;;  %v5028_v6 = vsel %vm5024_vm2, %v3435_v28, %v6971_v63 }
 0x346   : > { %v6596_v9 = vpack.c.bf16 %v5028_v6, %v5027_v7 }
 0x348   : > { %6597 = vmatprep.subr.bf16.mxu0 %v6596_v9 }
 0x349   : > { %6599 = vmatpush3.bf16.msra.mxu0 %v6596_v9 }
 0x34a   : > { %v6974_v18 = vpop.permute.xlu1 %6973 }
 0x34b   : > { %v6976_v22 = vunpack.i.h.bf16 %v6974_v18  ;;  %v6975_v25 = vunpack.i.l.bf16 %v6974_v18 }
 0x34d   : > { %v5029_v51 = vsel %vm5024_vm2, %v3436_v61, %v6975_v25  ;;  %v5030_v53 = vsel %vm5024_vm2, %v3437_v35, %v6976_v22  ;;  %v5034_v61 = vld [vmem:[%s11206_s3 + $0x8] sm:$0xff]  ;;  %v5037_v35 = vld [vmem:[%s11206_s3 + $0x20] sm:$0xff] }
 0x34e   : > { %v6600_v58 = vpack.c.bf16 %v5030_v53, %v5029_v51 }
 0x350   : > { %6601 = vmatprep.subr.bf16.mxu0 %v6600_v58 }
 0x351   : > { %6603 = vmatpush3.bf16.msra.mxu0 %v6600_v58 }
 0x352   : > { %v6979_v3 = vpop.permute.xlu0 %6978 }
 0x353   : > { %v6981_v39 = vunpack.i.h.bf16 %v6979_v3  ;;  %v6980_v1 = vunpack.i.l.bf16 %v6979_v3 }
 0x355   : > { %v5031_v28 = vsel %vm5024_vm2, %v3438_v59, %v6980_v1  ;;  %v5032_v17 = vsel %vm5024_vm2, %v3439_v37, %v6981_v39  ;;  %v5040_v59 = vld [vmem:[%s11206_s3 + $0x38] sm:$0xff] }
 0x356   : > { %v6604_v46 = vpack.c.bf16 %v5032_v17, %v5031_v28 }
 0x358   : > { %6605 = vmatprep.subr.bf16.mxu0 %v6604_v46 }
 0x359   : > { %6607 = vmatpush3.bf16.msra.mxu0 %v6604_v46 }
 0x35c   : > { %6537 = vmatmul.mubr.msk.f32.vlgmr.msra.gmra.mrb[32].mxu0 %vm5024_vm2, %v5034_v61 }
 0x35d   : > { %6539 = vmatprep.mubr.msk.f32.mxu0 %vm5024_vm2, %v5035_v43 }
 0x360   : > { %6540 = vmatmul.mubr.msk.f32.gmra.mrb[34].mxu0 %vm5024_vm2, %v5036_v48 }
 0x361   : > { %6542 = vmatprep.mubr.msk.f32.mxu0 %vm5024_vm2, %v5037_v35 }
 0x364   : > { %6543 = vmatmul.mubr.msk.f32.gmra.mrb[36].mxu0 %vm5024_vm2, %v5038_v57 }
 0x365   : > { %6545 = vmatprep.mubr.msk.f32.mxu0 %vm5024_vm2, %v5039_v55 }
 0x368   : > { %6546 = vmatmul.mubr.msk.f32.gmra.mrb[38].mxu0 %vm5024_vm2, %v5040_v59 }
 0x42f   : > { %v6538_v13 = vpop.f32.mrb[32].mxu0 }
 0x430   : > { %v5131_v47 = vpop.f32.mrb[33].mxu0 }
 0x431   : > { %6580 = vmatprep.mubr.f32.mxu1 %v5131_v47 }
 0x432   : > { %6581 = vmatmul.mubr.f32.vlgmr.msra.gmra.mrb[32].mxu1 %v6538_v13 }
 0x433   : > { %v6541_v37 = vpop.f32.mrb[34].mxu0 }
 0x434   : > { %v5141_v62 = vpop.f32.mrb[35].mxu0 }
 0x435   : > { %6583 = vmatprep.mubr.f32.mxu1 %v5141_v62 }
 0x436   : > { %6584 = vmatmul.mubr.f32.gmra.mrb[34].mxu1 %v6541_v37 }
 0x437   : > { %v6544_v26 = vpop.f32.mrb[36].mxu0 }
 0x438   : > { %v5151_v29 = vpop.f32.mrb[37].mxu0 }
 0x439   : > { %6586 = vmatprep.mubr.f32.mxu1 %v5151_v29 }
 0x43a   : > { %6587 = vmatmul.mubr.f32.gmra.mrb[36].mxu1 %v6544_v26 }
 0x43b   : > { %v6547_v27 = vpop.f32.mrb[38].mxu0 }
 0x43c   : > { %v5161_v34 = vpop.f32.mrb[39].mxu0 }
 0x43d   : > { %6589 = vmatprep.mubr.f32.mxu1 %v5161_v34 }
 0x43e   : > { %6590 = vmatmul.mubr.f32.gmra.mrb[38].mxu1 %v6547_v27 }
 0x505   : > { %v6582_v31 = vpop.f32.mrb[32].mxu1 }
 0x506   : > { %v5292_v36 = vand.u32 2147483647, %v6582_v31  ;;  %v5252_v20 = vpop.f32.mrb[33].mxu1 }
 0x507   : > { %v5291_v0 = vand.u32 2147483647, %v5252_v20 }
 0x508   : > { %5301 = vadd.xlane.f32.xlu0 %v5292_v36 }
 0x509   : > { %v6585_v56 = vpop.f32.mrb[34].mxu1  ;;  %5299 = vadd.xlane.f32.xlu1 %v5291_v0 }
 0x50a   : > { %v5294_v40 = vand.u32 2147483647, %v6585_v56  ;;  %v5262_v10 = vpop.f32.mrb[35].mxu1 }
 0x50b   : > { %v5293_v12 = vand.u32 2147483647, %v5262_v10 }
 0x50d   : > { %5303 = vadd.xlane.f32.xlu0 %v5293_v12  ;;  %v6588_v24 = vpop.f32.mrb[36].mxu1  ;;  %5305 = vadd.xlane.f32.xlu1 %v5294_v40 }
 0x50e   : > { %v5296_v44 = vand.u32 2147483647, %v6588_v24  ;;  %v5272_v42 = vpop.f32.mrb[37].mxu1 }
 0x50f   : > { %v5295_v14 = vand.u32 2147483647, %v5272_v42 }
 0x511   : > { %5307 = vadd.xlane.f32.xlu0 %v5295_v14  ;;  %v6591_v54 = vpop.f32.mrb[38].mxu1  ;;  %5309 = vadd.xlane.f32.xlu1 %v5296_v44 }
 0x512   : > { %v5298_v38 = vand.u32 2147483647, %v6591_v54  ;;  %v5282_v5 = vpop.f32.mrb[39].mxu1 }
 0x513   : > { %v5297_v41 = vand.u32 2147483647, %v5282_v5 }
 0x515   : > { %5311 = vadd.xlane.f32.xlu0 %v5297_v41  ;;  %5313 = vadd.xlane.f32.xlu1 %v5298_v38 }
 0x595   : > { %v5302_v15 = vpop.xlane.xlu0 %5301 }
 0x596   : > { %v5300_v16 = vpop.xlane.xlu1 %5299 }
 0x597   : > { %v5315_v21 = vadd.f32 %v5302_v15, %v5300_v16 }
 0x59a   : > { %v5304_v23 = vpop.xlane.xlu0 %5303  ;;  %v5306_v8 = vpop.xlane.xlu1 %5305 }
 0x59b   : > { %v5316_v19 = vadd.f32 %v5315_v21, %v5304_v23 }
 0x59d   : > { %v5317_v33 = vadd.f32 %v5316_v19, %v5306_v8 }
 0x59e   : > { %v5308_v52 = vpop.xlane.xlu0 %5307  ;;  %v5310_v32 = vpop.xlane.xlu1 %5309 }
 0x59f   : > { %v5318_v49 = vadd.f32 %v5317_v33, %v5308_v52 }
 0x5a1   : > { %v5319_v4 = vadd.f32 %v5318_v49, %v5310_v32 }
 0x5a2   : > { %v5312_v2 = vpop.xlane.xlu0 %5311  ;;  %v5314_v11 = vpop.xlane.xlu1 %5313 }
 0x5a3   : > { %v5320_v50 = vadd.f32 %v5319_v4, %v5312_v2 }
 0x5a5   : > { %v5321_v60 = vadd.f32 %v5320_v50, %v5314_v11 }
 0x5a7   : > { %v5322_v30 = vrot.slane %v5321_v60, 4 }
 0x5a9   : > { %v5323_v63 = vadd.f32 %v5322_v30, %v5321_v60 }
 0x5ab   : > { %v5324_v45 = vrot.slane %v5323_v63, 2 }
 0x5ad   : > { %v5325_v7 = vadd.f32 %v5324_v45, %v5323_v63 }
 0x5af   : > { %v5326_v6 = vrot.slane %v5325_v7, 1 }
 0x5b1   : > { %v5327_v9 = vadd.f32 %v5326_v6, %v5325_v7 }
 0x5b3   : > { %5328 = vst [vmem:[%s291_s28] sm:$0xff] %v5327_v9 }
 0x5b4 PF: > { %s15_s20 = sadd.s32 1, %s7070_s20   ;;  %s11443_s18 = smov %s7066_s19 }
 0x5b5   : > { %p12_p5 = scmp.ge.s32.totalorder %s15_s20, 5   ;;  %s11444_s19 = smov %s11446_s21 }
 0x5b7   :  { %14 = sbr.rel (!%p12_p5) target bundleno = 2 (0x2), region = 76 }

</bundles_post_ra>
